<compile_context>
chip_gen: v7x
topology: tpu7x:2x2x1
jax: 0.10.0
libtpu: 0.0.40
codegen_flags: <defaults>
</compile_context>

<pallas_src>
import numpy as np
import jax
import jax.numpy as jnp
from jax import lax
from jax.experimental import pallas as pl
from jax.experimental.pallas import tpu as pltpu


# ---------------------------------------------------------------------------
# Fused kernel: conv1 -> pool -> conv2 -> pool -> fc1 -> fc2 -> fc3
# (every layer is a dense, lane-aligned MXU matmul; pools are elementwise maxima)
# ---------------------------------------------------------------------------
def _fused_cnn_kernel(x_ref, w1_ref, b1_ref, w2_ref, b2_ref,
                      fw1_ref, fb1_ref, fw2_ref, fb2_ref, fw3_ref, fb3_ref,
                      o_ref):
    f32 = jnp.float32
    mxu_dt = w1_ref.dtype                       # f32 or bf16 MXU-operand dtype

    x = x_ref[...].astype(mxu_dt)               # (bb, 64) flattened 8x8, 1 channel

    # conv1 + bias + ReLU for all 36 output positions x 4 pool-window shifts,
    # as ONE dense MXU matmul (weights pre-scattered/shifted in prepare_params).
    h = jnp.dot(x, w1_ref[...], preferred_element_type=f32) + b1_ref[...]
    h = jnp.maximum(h, 0.0)                     # (bb, 4*1152), lane-dense, f32

    # maxpool1 (2x2, stride 1): elementwise max of the 4 pre-shifted copies.
    # Slices sit at lane offsets 0/1152/2304/3456 (multiples of 128): no shuffles.
    p1 = jnp.maximum(jnp.maximum(h[:, 0:1152], h[:, 1152:2304]),
                     jnp.maximum(h[:, 2304:3456], h[:, 3456:4608]))

    # conv2 + bias + ReLU, again for the 4 pool-window shifts in one MXU matmul.
    g = jnp.dot(p1.astype(mxu_dt), w2_ref[...],
                preferred_element_type=f32) + b2_ref[...]
    g = jnp.maximum(g, 0.0)                     # (bb, 4*256)

    # maxpool2 (2x2, stride 1, 3x3 -> 2x2); result lands directly in the NHWC
    # flatten order fc1 expects -> a single fused K=256 fc1 matmul below.
    p2 = jnp.maximum(jnp.maximum(g[:, 0:256], g[:, 256:512]),
                     jnp.maximum(g[:, 512:768], g[:, 768:1024]))

    h1 = jnp.maximum(jnp.dot(p2.astype(mxu_dt), fw1_ref[...],
                             preferred_element_type=f32) + fb1_ref[...], 0.0)
    h2 = jnp.maximum(jnp.dot(h1.astype(mxu_dt), fw2_ref[...],
                             preferred_element_type=f32) + fb2_ref[...], 0.0)
    # fc3 with 128-lane padded columns -> lane-dense (unmasked) output store.
    o_ref[...] = (jnp.dot(h2.astype(mxu_dt), fw3_ref[...],
                          preferred_element_type=f32) + fb3_ref[...]
                  ).astype(o_ref.dtype)


# ---------------------------------------------------------------------------
# One-time weight relayout (PyTorch layouts -> kernel-ready dense matrices)
# ---------------------------------------------------------------------------
def prepare_params(p, mxu_dtype=jnp.float32):
    """Relayout params into dense 'conv as matmul' weights.

    Each conv weight is additionally replicated 4x with its output columns
    pre-shifted by the 2x2/stride-1 pool-window offsets, so the in-kernel pools
    become elementwise maxima of 128-aligned lane slices (zero lane shuffles).
    Matmul weights are stored in `mxu_dtype` (use bfloat16 on v6e/v7x); biases
    stay float32 since they are added to f32 accumulators.
    """
    f32 = jnp.float32

    # ---- conv1 as (B,64) @ (64, 4*36*32) ------------------------------------
    w1t = p["w1"].reshape(32, 9).T.astype(f32)              # (9, 32)  [tap, out]
    S1 = np.zeros((64, 36, 9), np.float32)                  # scatter q -> (pos, tap)
    for r in range(6):
        for c in range(6):
            for kh in range(3):
                for kw in range(3):
                    S1[(r + kh) * 8 + (c + kw), r * 6 + c, kh * 3 + kw] = 1.0
    w1d = jnp.einsum("qpt,to->qpo", S1, w1t)                # (64, 36, 32)
    w1d = jnp.pad(w1d, ((0, 0), (0, 7), (0, 0)))            # room for pool shifts
    w1cat = jnp.concatenate(                                # window shifts 0,1,6,7
        [w1d[:, d:d + 36, :].reshape(64, 36 * 32) for d in (0, 1, 6, 7)], axis=1)

    # ---- conv2 as (B, 36*32) @ (36*32, 4*4*64) -------------------------------
    w2r = p["w2"].reshape(64, 32, 9).astype(f32)            # [out, in, tap]
    S2 = np.zeros((36, 9, 9), np.float32)                   # (in-pos, out-pos, tap)
    for i in range(3):
        for j in range(3):
            for kh in range(3):
                for kw in range(3):
                    S2[(i + kh) * 6 + (j + kw), i * 3 + j, kh * 3 + kw] = 1.0
    w2d = jnp.einsum("abt,oct->acbo", S2, w2r).reshape(36 * 32, 9, 64)
    base = np.array([0, 1, 3, 4])                           # 2x2 pool bases in 3x3 frame
    w2cat = jnp.concatenate(                                # window shifts 0,1,3,4
        [w2d[:, base + d, :].reshape(36 * 32, 4 * 64) for d in (0, 1, 3, 4)], axis=1)

    # ---- fc1 in pooled-NHWC order; fc3 zero-padded to 128 output lanes -------
    fw1 = jnp.transpose(p["fw1"].reshape(64, 4, 64), (1, 0, 2)).reshape(256, 64)
    fw3 = jnp.pad(p["fw3"], ((0, 0), (0, 128 - p["fw3"].shape[1])))
    fb3 = jnp.pad(p["fb3"], (0, 128 - p["fb3"].shape[0]))

    return {
        "w1": w1cat.astype(mxu_dtype),
        "b1": jnp.tile(p["b1"].astype(f32), 4 * 36).reshape(1, 4 * 36 * 32),
        "w2": w2cat.astype(mxu_dtype),
        "b2": jnp.tile(p["b2"].astype(f32), 4 * 4).reshape(1, 4 * 4 * 64),
        "fw1": fw1.astype(mxu_dtype), "fb1": p["fb1"].reshape(1, 64).astype(f32),
        "fw2": p["fw2"].astype(mxu_dtype), "fb2": p["fb2"].reshape(1, 32).astype(f32),
        "fw3": fw3.astype(mxu_dtype), "fb3": fb3.reshape(1, 128).astype(f32),
    }


# ---------------------------------------------------------------------------
# Wrapper: single fused pallas_call over a batch-tiled "parallel" grid
# ---------------------------------------------------------------------------
def forward(x_nchw, kp, block_b=256, num_classes=10):
    B, C, H, W = x_nchw.shape
    assert (C, H, W) == (1, 8, 8), "model expects (B, 1, 8, 8) inputs"
    x = x_nchw.reshape(B, H * W)                # single channel: pure reshape

    # Batch tiling: bb is a multiple of 8 (sublane aligned), large at real batch
    # sizes, and chosen so the grid has >=2 steps whenever the padded batch
    # allows it (v7x: shards the "parallel" axis across both TensorCores).
    B8 = pl.cdiv(B, 8) * 8
    half = ((B8 // 2) // 8) * 8
    bb = min(block_b, half) if half >= 8 else B8
    Bp = pl.cdiv(B, bb) * bb
    if Bp != B:
        x = jnp.pad(x, ((0, Bp - B), (0, 0)))

    weights = (kp["w1"], kp["b1"], kp["w2"], kp["b2"], kp["fw1"], kp["fb1"],
               kp["fw2"], kp["fb2"], kp["fw3"], kp["fb3"])

    def full(a):                                # whole-array, grid-invariant block
        return pl.BlockSpec(a.shape, lambda i: (0,) * len(a.shape))

    wbytes = sum(int(w.size) * w.dtype.itemsize for w in weights)
    flops = 2 * Bp * (64 * 4608 + 1152 * 1024 + 256 * 64 + 64 * 32 + 32 * 128)
    cost = pl.CostEstimate(flops=flops, transcendentals=0,
                           bytes_accessed=Bp * (64 + 128) * 4 + wbytes)

    out = pl.pallas_call(
        _fused_cnn_kernel,
        out_shape=jax.ShapeDtypeStruct((Bp, 128), jnp.float32),
        grid=(Bp // bb,),
        in_specs=[pl.BlockSpec((bb, 64), lambda i: (i, 0))] +
                 [full(w) for w in weights],
        out_specs=pl.BlockSpec((bb, 128), lambda i: (i, 0)),
        compiler_params=pltpu.CompilerParams(
            dimension_semantics=("parallel",),
            vmem_limit_bytes=48 * 1024 * 1024),
        cost_estimate=cost,
    )(x, *weights)
    return out[:B, :num_classes]


# ---------------------------------------------------------------------------
# Deterministic parameter init (PyTorch-style uniform(-1/sqrt(fan_in), ...))
# ---------------------------------------------------------------------------
def init_params(key):
    ks = jax.random.split(key, 10)

    def u(k, shape, fan_in):
        bound = 1.0 / jnp.sqrt(jnp.float32(fan_in))
        return jax.random.uniform(k, shape, jnp.float32, -bound, bound)

    return {
        "w1": u(ks[0], (32, 1, 3, 3), 1 * 9),
        "b1": u(ks[1], (32,), 1 * 9),
        "w2": u(ks[2], (64, 32, 3, 3), 32 * 9),
        "b2": u(ks[3], (64,), 32 * 9),
        "fw1": u(ks[4], (256, 64), 256),   # stored as [in, out]
        "fb1": u(ks[5], (64,), 256),
        "fw2": u(ks[6], (64, 32), 64),
        "fb2": u(ks[7], (32,), 64),
        "fw3": u(ks[8], (32, 10), 32),
        "fb3": u(ks[9], (10,), 32),
    }


# ---------------------------------------------------------------------------
# Pure-JAX reference (lax.conv / reduce_window) for correctness check
# ---------------------------------------------------------------------------
def reference_forward(x_nchw, p):
    dn = ("NCHW", "OIHW", "NCHW")
    prec = lax.Precision.HIGHEST
    y = lax.conv_general_dilated(x_nchw, p["w1"], (1, 1), "VALID",
                                 dimension_numbers=dn, precision=prec)
    y = jnp.maximum(y + p["b1"][None, :, None, None], 0.0)
    y = lax.reduce_window(y, -jnp.inf, lax.max, (1, 1, 2, 2), (1, 1, 1, 1), "VALID")
    y = lax.conv_general_dilated(y, p["w2"], (1, 1), "VALID",
                                 dimension_numbers=dn, precision=prec)
    y = jnp.maximum(y + p["b2"][None, :, None, None], 0.0)
    y = lax.reduce_window(y, -jnp.inf, lax.max, (1, 1, 2, 2), (1, 1, 1, 1), "VALID")
    y = y.reshape(y.shape[0], -1)
    y = jnp.maximum(jnp.dot(y, p["fw1"], precision=prec) + p["fb1"], 0.0)
    y = jnp.maximum(jnp.dot(y, p["fw2"], precision=prec) + p["fb2"], 0.0)
    return jnp.dot(y, p["fw3"], precision=prec) + p["fb3"]


if __name__ == "__main__":
    key = jax.random.PRNGKey(0)
    kx, kw = jax.random.split(key)
    # fc1 expects 64*2*2 features -> spatial chain 8 -3-> 6 -pool-> 5 -3-> 3 -pool-> 2
    x = jax.random.normal(kx, (2, 1, 8, 8), jnp.float32)   # NCHW, like PyTorch
    params = init_params(kw)
    ref = reference_forward(x, params)

    # f32 MXU operands: exact-path check against the pure-JAX reference.
    kparams_f32 = prepare_params(params)
    out_f32 = jax.block_until_ready(jax.jit(forward)(x, kparams_f32))
    assert out_f32.shape == (2, 10), out_f32.shape
    err = float(jnp.max(jnp.abs(out_f32 - ref)))
    assert err < 1e-3, f"f32 mismatch vs reference: max abs err = {err}"

    # bf16 MXU operands (v6e/v7x fast path), f32 accumulation: looser tolerance.
    kparams_bf16 = prepare_params(params, mxu_dtype=jnp.bfloat16)
    out_bf16 = jax.block_until_ready(jax.jit(forward)(x, kparams_bf16))
    err16 = float(jnp.max(jnp.abs(out_bf16 - ref)))
    assert err16 < 5e-2, f"bf16 mismatch vs reference: max abs err = {err16}"

    print("KERNEL_OK")
</pallas_src>

<mosaic_0001>
module attributes {stable_mosaic.version = 11 : i64} {
  func.func @_fused_cnn_kernel(%arg0: i32, %arg1: memref<8x64xf32, #tpu.memory_space<vmem>>, %arg2: memref<64x4608xf32, #tpu.memory_space<vmem>>, %arg3: memref<1x4608xf32, #tpu.memory_space<vmem>>, %arg4: memref<1152x1024xf32, #tpu.memory_space<vmem>>, %arg5: memref<1x1024xf32, #tpu.memory_space<vmem>>, %arg6: memref<256x64xf32, #tpu.memory_space<vmem>>, %arg7: memref<1x64xf32, #tpu.memory_space<vmem>>, %arg8: memref<64x32xf32, #tpu.memory_space<vmem>>, %arg9: memref<1x32xf32, #tpu.memory_space<vmem>>, %arg10: memref<32x128xf32, #tpu.memory_space<vmem>>, %arg11: memref<1x128xf32, #tpu.memory_space<vmem>>, %arg12: memref<8x128xf32, #tpu.memory_space<vmem>>) attributes {dimension_semantics = [#tpu.dimension_semantics<parallel>], iteration_bounds = array<i64: 1>, scalar_prefetch = 0 : i64, scratch_operands = 0 : i64, tpu.core_type = #tpu.core_type<tc>, window_params = [{transform_indices = @transform_0, window_bounds = array<i64: 8, 64>}, {pipeline_mode = #tpu.pipeline_mode<synchronous>, transform_indices = @transform_1, window_bounds = array<i64: 64, 4608>}, {pipeline_mode = #tpu.pipeline_mode<synchronous>, transform_indices = @transform_2, window_bounds = array<i64: 1, 4608>}, {pipeline_mode = #tpu.pipeline_mode<synchronous>, transform_indices = @transform_3, window_bounds = array<i64: 1152, 1024>}, {pipeline_mode = #tpu.pipeline_mode<synchronous>, transform_indices = @transform_4, window_bounds = array<i64: 1, 1024>}, {pipeline_mode = #tpu.pipeline_mode<synchronous>, transform_indices = @transform_5, window_bounds = array<i64: 256, 64>}, {pipeline_mode = #tpu.pipeline_mode<synchronous>, transform_indices = @transform_6, window_bounds = array<i64: 1, 64>}, {pipeline_mode = #tpu.pipeline_mode<synchronous>, transform_indices = @transform_7, window_bounds = array<i64: 64, 32>}, {pipeline_mode = #tpu.pipeline_mode<synchronous>, transform_indices = @transform_8, window_bounds = array<i64: 1, 32>}, {pipeline_mode = #tpu.pipeline_mode<synchronous>, transform_indices = @transform_9, window_bounds = array<i64: 32, 128>}, {pipeline_mode = #tpu.pipeline_mode<synchronous>, transform_indices = @transform_10, window_bounds = array<i64: 1, 128>}, {transform_indices = @transform_11, window_bounds = array<i64: 8, 128>}]} {
    %c0 = arith.constant 0 : index
    %c0_0 = arith.constant 0 : index
    %0 = vector.load %arg1[%c0, %c0_0] : memref<8x64xf32, #tpu.memory_space<vmem>>, vector<8x64xf32>
    %c0_1 = arith.constant 0 : index
    %c0_2 = arith.constant 0 : index
    %1 = vector.load %arg2[%c0_1, %c0_2] : memref<64x4608xf32, #tpu.memory_space<vmem>>, vector<64x4608xf32>
    %cst = arith.constant dense<0.000000e+00> : vector<8x4608xf32>
    %2 = tpu.matmul %0, %1, %cst {dimension_numbers = #tpu.dot_dimension_numbers<[1], [0], [0], [1], [0, 0, 1, 1], [], []>} : vector<8x64xf32>, vector<64x4608xf32>, vector<8x4608xf32> -> vector<8x4608xf32>
    %c0_3 = arith.constant 0 : index
    %c0_4 = arith.constant 0 : index
    %3 = vector.load %arg3[%c0_3, %c0_4] : memref<1x4608xf32, #tpu.memory_space<vmem>>, vector<1x4608xf32>
    %4 = vector.broadcast %3 : vector<1x4608xf32> to vector<8x4608xf32>
    %5 = arith.addf %2, %4 : vector<8x4608xf32>
    %cst_5 = arith.constant 0.000000e+00 : f32
    %6 = vector.broadcast %cst_5 : f32 to vector<8x4608xf32>
    %7 = arith.maximumf %5, %6 : vector<8x4608xf32>
    %8 = vector.extract_strided_slice %7 {offsets = [0, 0], sizes = [8, 1152], strides = [1, 1]} : vector<8x4608xf32> to vector<8x1152xf32>
    %9 = vector.extract_strided_slice %7 {offsets = [0, 1152], sizes = [8, 1152], strides = [1, 1]} : vector<8x4608xf32> to vector<8x1152xf32>
    %10 = arith.maximumf %8, %9 : vector<8x1152xf32>
    %11 = vector.extract_strided_slice %7 {offsets = [0, 2304], sizes = [8, 1152], strides = [1, 1]} : vector<8x4608xf32> to vector<8x1152xf32>
    %12 = vector.extract_strided_slice %7 {offsets = [0, 3456], sizes = [8, 1152], strides = [1, 1]} : vector<8x4608xf32> to vector<8x1152xf32>
    %13 = arith.maximumf %11, %12 : vector<8x1152xf32>
    %14 = arith.maximumf %10, %13 : vector<8x1152xf32>
    %c0_6 = arith.constant 0 : index
    %c0_7 = arith.constant 0 : index
    %15 = vector.load %arg4[%c0_6, %c0_7] : memref<1152x1024xf32, #tpu.memory_space<vmem>>, vector<1152x1024xf32>
    %cst_8 = arith.constant dense<0.000000e+00> : vector<8x1024xf32>
    %16 = tpu.matmul %14, %15, %cst_8 {dimension_numbers = #tpu.dot_dimension_numbers<[1], [0], [0], [1], [0, 0, 1, 1], [], []>} : vector<8x1152xf32>, vector<1152x1024xf32>, vector<8x1024xf32> -> vector<8x1024xf32>
    %c0_9 = arith.constant 0 : index
    %c0_10 = arith.constant 0 : index
    %17 = vector.load %arg5[%c0_9, %c0_10] : memref<1x1024xf32, #tpu.memory_space<vmem>>, vector<1x1024xf32>
    %18 = vector.broadcast %17 : vector<1x1024xf32> to vector<8x1024xf32>
    %19 = arith.addf %16, %18 : vector<8x1024xf32>
    %cst_11 = arith.constant 0.000000e+00 : f32
    %20 = vector.broadcast %cst_11 : f32 to vector<8x1024xf32>
    %21 = arith.maximumf %19, %20 : vector<8x1024xf32>
    %22 = vector.extract_strided_slice %21 {offsets = [0, 0], sizes = [8, 256], strides = [1, 1]} : vector<8x1024xf32> to vector<8x256xf32>
    %23 = vector.extract_strided_slice %21 {offsets = [0, 256], sizes = [8, 256], strides = [1, 1]} : vector<8x1024xf32> to vector<8x256xf32>
    %24 = arith.maximumf %22, %23 : vector<8x256xf32>
    %25 = vector.extract_strided_slice %21 {offsets = [0, 512], sizes = [8, 256], strides = [1, 1]} : vector<8x1024xf32> to vector<8x256xf32>
    %26 = vector.extract_strided_slice %21 {offsets = [0, 768], sizes = [8, 256], strides = [1, 1]} : vector<8x1024xf32> to vector<8x256xf32>
    %27 = arith.maximumf %25, %26 : vector<8x256xf32>
    %28 = arith.maximumf %24, %27 : vector<8x256xf32>
    %c0_12 = arith.constant 0 : index
    %c0_13 = arith.constant 0 : index
    %29 = vector.load %arg6[%c0_12, %c0_13] : memref<256x64xf32, #tpu.memory_space<vmem>>, vector<256x64xf32>
    %cst_14 = arith.constant dense<0.000000e+00> : vector<8x64xf32>
    %30 = tpu.matmul %28, %29, %cst_14 {dimension_numbers = #tpu.dot_dimension_numbers<[1], [0], [0], [1], [0, 0, 1, 1], [], []>} : vector<8x256xf32>, vector<256x64xf32>, vector<8x64xf32> -> vector<8x64xf32>
    %c0_15 = arith.constant 0 : index
    %c0_16 = arith.constant 0 : index
    %31 = vector.load %arg7[%c0_15, %c0_16] : memref<1x64xf32, #tpu.memory_space<vmem>>, vector<1x64xf32>
    %32 = vector.broadcast %31 : vector<1x64xf32> to vector<8x64xf32>
    %33 = arith.addf %30, %32 : vector<8x64xf32>
    %cst_17 = arith.constant 0.000000e+00 : f32
    %34 = vector.broadcast %cst_17 : f32 to vector<8x64xf32>
    %35 = arith.maximumf %33, %34 : vector<8x64xf32>
    %c0_18 = arith.constant 0 : index
    %c0_19 = arith.constant 0 : index
    %36 = vector.load %arg8[%c0_18, %c0_19] : memref<64x32xf32, #tpu.memory_space<vmem>>, vector<64x32xf32>
    %cst_20 = arith.constant dense<0.000000e+00> : vector<8x32xf32>
    %37 = tpu.matmul %35, %36, %cst_20 {dimension_numbers = #tpu.dot_dimension_numbers<[1], [0], [0], [1], [0, 0, 1, 1], [], []>} : vector<8x64xf32>, vector<64x32xf32>, vector<8x32xf32> -> vector<8x32xf32>
    %c0_21 = arith.constant 0 : index
    %c0_22 = arith.constant 0 : index
    %38 = vector.load %arg9[%c0_21, %c0_22] : memref<1x32xf32, #tpu.memory_space<vmem>>, vector<1x32xf32>
    %39 = vector.broadcast %38 : vector<1x32xf32> to vector<8x32xf32>
    %40 = arith.addf %37, %39 : vector<8x32xf32>
    %cst_23 = arith.constant 0.000000e+00 : f32
    %41 = vector.broadcast %cst_23 : f32 to vector<8x32xf32>
    %42 = arith.maximumf %40, %41 : vector<8x32xf32>
    %c0_24 = arith.constant 0 : index
    %c0_25 = arith.constant 0 : index
    %43 = vector.load %arg10[%c0_24, %c0_25] : memref<32x128xf32, #tpu.memory_space<vmem>>, vector<32x128xf32>
    %cst_26 = arith.constant dense<0.000000e+00> : vector<8x128xf32>
    %44 = tpu.matmul %42, %43, %cst_26 {dimension_numbers = #tpu.dot_dimension_numbers<[1], [0], [0], [1], [0, 0, 1, 1], [], []>} : vector<8x32xf32>, vector<32x128xf32>, vector<8x128xf32> -> vector<8x128xf32>
    %c0_27 = arith.constant 0 : index
    %c0_28 = arith.constant 0 : index
    %45 = vector.load %arg11[%c0_27, %c0_28] : memref<1x128xf32, #tpu.memory_space<vmem>>, vector<1x128xf32>
    %46 = vector.broadcast %45 : vector<1x128xf32> to vector<8x128xf32>
    %47 = arith.addf %44, %46 : vector<8x128xf32>
    %c0_29 = arith.constant 0 : index
    %c0_30 = arith.constant 0 : index
    %48 = vector.load %arg12[%c0_29, %c0_30] : memref<8x128xf32, #tpu.memory_space<vmem>>, vector<8x128xf32>
    tpu.vector_store %arg12[%c0_29, %c0_30], %47 {strides = array<i32>} : memref<8x128xf32, #tpu.memory_space<vmem>>, vector<8x128xf32>,
    return
  }
  func.func @transform_0(%arg0: i32) -> (i32, i32) {
    %c0_i32 = arith.constant 0 : i32
    %c0_i32_0 = arith.constant 0 : i32
    return %arg0, %c0_i32 : i32, i32
  }
  func.func @transform_1(%arg0: i32) -> (i32, i32) {
    %c0_i32 = arith.constant 0 : i32
    %c0_i32_0 = arith.constant 0 : i32
    %c0_i32_1 = arith.constant 0 : i32
    return %c0_i32, %c0_i32_0 : i32, i32
  }
  func.func @transform_2(%arg0: i32) -> (i32, i32) {
    %c0_i32 = arith.constant 0 : i32
    %c0_i32_0 = arith.constant 0 : i32
    %c0_i32_1 = arith.constant 0 : i32
    return %c0_i32, %c0_i32_0 : i32, i32
  }
  func.func @transform_3(%arg0: i32) -> (i32, i32) {
    %c0_i32 = arith.constant 0 : i32
    %c0_i32_0 = arith.constant 0 : i32
    %c0_i32_1 = arith.constant 0 : i32
    return %c0_i32, %c0_i32_0 : i32, i32
  }
  func.func @transform_4(%arg0: i32) -> (i32, i32) {
    %c0_i32 = arith.constant 0 : i32
    %c0_i32_0 = arith.constant 0 : i32
    %c0_i32_1 = arith.constant 0 : i32
    return %c0_i32, %c0_i32_0 : i32, i32
  }
  func.func @transform_5(%arg0: i32) -> (i32, i32) {
    %c0_i32 = arith.constant 0 : i32
    %c0_i32_0 = arith.constant 0 : i32
    %c0_i32_1 = arith.constant 0 : i32
    return %c0_i32, %c0_i32_0 : i32, i32
  }
  func.func @transform_6(%arg0: i32) -> (i32, i32) {
    %c0_i32 = arith.constant 0 : i32
    %c0_i32_0 = arith.constant 0 : i32
    %c0_i32_1 = arith.constant 0 : i32
    return %c0_i32, %c0_i32_0 : i32, i32
  }
  func.func @transform_7(%arg0: i32) -> (i32, i32) {
    %c0_i32 = arith.constant 0 : i32
    %c0_i32_0 = arith.constant 0 : i32
    %c0_i32_1 = arith.constant 0 : i32
    return %c0_i32, %c0_i32_0 : i32, i32
  }
  func.func @transform_8(%arg0: i32) -> (i32, i32) {
    %c0_i32 = arith.constant 0 : i32
    %c0_i32_0 = arith.constant 0 : i32
    %c0_i32_1 = arith.constant 0 : i32
    return %c0_i32, %c0_i32_0 : i32, i32
  }
  func.func @transform_9(%arg0: i32) -> (i32, i32) {
    %c0_i32 = arith.constant 0 : i32
    %c0_i32_0 = arith.constant 0 : i32
    %c0_i32_1 = arith.constant 0 : i32
    return %c0_i32, %c0_i32_0 : i32, i32
  }
  func.func @transform_10(%arg0: i32) -> (i32, i32) {
    %c0_i32 = arith.constant 0 : i32
    %c0_i32_0 = arith.constant 0 : i32
    %c0_i32_1 = arith.constant 0 : i32
    return %c0_i32, %c0_i32_0 : i32, i32
  }
  func.func @transform_11(%arg0: i32) -> (i32, i32) {
    %c0_i32 = arith.constant 0 : i32
    %c0_i32_0 = arith.constant 0 : i32
    return %arg0, %c0_i32 : i32, i32
  }
}

</mosaic_0001>

<bundles_post_ra>
// kernel: forward.1
= control target key start
LH: loop header
LB: loop body
LE: loop exit
PB: predicated region body
PF: predicated region fallthrough
CT: control target
= control target key end

     0   :  { %16 = vsyncpa [#allocation3], 0  ;;  %s7261_s0 = inlined_call_operand.vmem [shape: f32[8,64], index: 0, kind: input, shape index: {}]   ;;  %s7262_s1 = inlined_call_operand.hbm [shape: f32[64,4608], index: 1, kind: input, shape index: {}]   ;;  %s7263_s2 = inlined_call_operand.hbm [shape: f32[1,4608], index: 2, kind: input, shape index: {}]   ;;  %s7264_s3 = inlined_call_operand.hbm [shape: f32[1152,1024], index: 3, kind: input, shape index: {}]   ;;  %s7265_s4 = inlined_call_operand.hbm [shape: f32[1,1024], index: 4, kind: input, shape index: {}]   ;;  %s7266_s5 = inlined_call_operand.vmem [shape: f32[256,64], index: 5, kind: input, shape index: {}]   ;;  %s7267_s6 = inlined_call_operand.hbm [shape: f32[1,64], index: 6, kind: input, shape index: {}]   ;;  %s7268_s7 = inlined_call_operand.vmem [shape: f32[64,32], index: 7, kind: input, shape index: {}]   ;;  %s7269_s8 = inlined_call_operand.hbm [shape: f32[1,32], index: 8, kind: input, shape index: {}]   ;;  %s7270_s9 = inlined_call_operand.hbm [shape: f32[32,128], index: 9, kind: input, shape index: {}]   ;;  %s7271_s10 = inlined_call_operand.hbm [shape: f32[1,128], index: 10, kind: input, shape index: {}]   ;;  %s7272_s11 = inlined_call_operand.vmem [shape: f32[8,128], index: 11, kind: output, shape index: {}]  }
   0x1   :  { %17 = vsyncpa [#allocation5], 0 }
   0x2   :  { %18 = vsyncpa [#allocation8], 0 }
   0x3   :  { %19 = vsyncpa [#allocation11], 0 }
   0x4   :  { %20 = vsyncpa [#allocation14], 0  ;;  %s6719_s17 = smov [#allocation4]   ;;  %s6720_s19 = smov [#allocation7]  }
   0x5   :  { %s41_s18 = sshll.u32 %s6719_s17, 4  ;;  %s63_s20 = sshll.u32 %s6720_s19, 4  ;;  %s42_s18 = int_to_ptr.vmem [resolvable:$true] %s41_s18  ;;  %s64_s20 = int_to_ptr.vmem [resolvable:$true] %s63_s20 }
   0x6   :  { %s6533_s23 = scalar_lea.hbm %s7263_s2, 576 }
   0x7   :  { %p6534_p0 = scmp.ne.s32.totalorder %s7263_s2, %s6533_s23  ;;  %p6537_p1 = scmp.lt.u32.totalorder %s6533_s23, %s7263_s2 }
   0x9   :  { %p6539_p2 = pnand %p6537_p1, %p6534_p0 }
   0xb   :  { %6542 = shalt.err (!%p6539_p2)
}
   0xc   :  { %s6543_s28 = scalar_lea.vmem %s42_s18, 576  ;;  %p6548_p4 = scmp.lt.s32.totalorder %s42_s18, %s42_s18 }
   0xd   :  { %p6544_p3 = scmp.ne.s32.totalorder %s42_s18, %s6543_s28  ;;  %p6549_p5 = scmp.lt.s32.totalorder %s6543_s28, %s6543_s28 }
   0xf   :  { %p6550_p6 = por %p6549_p5, %p6548_p4 }
  0x11   :  { %p6551_p7 = pnand %p6550_p6, %p6544_p3 }
  0x13   :  { %6554 = shalt.err (!%p6551_p7)
}
  0x14   :  { %44 = dma.hbm_to_vmem [thread:$0]  %s7263_s2, 576, %s42_s18, [#allocation5]  }
  0x15   :  { %s6555_s14 = scalar_lea.hbm %s7265_s4, 128 }
  0x16   :  { %p6556_p8 = scmp.ne.s32.totalorder %s7265_s4, %s6555_s14  ;;  %p6559_p9 = scmp.lt.u32.totalorder %s6555_s14, %s7265_s4 }
  0x18   :  { %p6561_p10 = pnand %p6559_p9, %p6556_p8 }
  0x1a   :  { %6564 = shalt.err (!%p6561_p10)
}
  0x1b   :  { %s6565_s21 = scalar_lea.vmem %s64_s20, 128  ;;  %p6570_p12 = scmp.lt.s32.totalorder %s64_s20, %s64_s20 }
  0x1c   :  { %p6566_p11 = scmp.ne.s32.totalorder %s64_s20, %s6565_s21  ;;  %p6571_p13 = scmp.lt.s32.totalorder %s6565_s21, %s6565_s21 }
  0x1e   :  { %p6572_p0 = por %p6571_p13, %p6570_p12 }
  0x20   :  { %p6573_p1 = pnand %p6572_p0, %p6566_p11 }
  0x22   :  { %6576 = shalt.err (!%p6573_p1)
}
  0x23   :  { %66 = dma.hbm_to_vmem [thread:$0]  %s7265_s4, 128, %s64_s20, [#allocation8]  }
  0x24   :  { %s6721_s22 = smov [#allocation10]   ;;  %s6722_s24 = smov [#allocation2]  }
  0x25   :  { %s87_s23 = sshll.u32 %s6721_s22, 4  ;;  %s28_s25 = sshll.u32 %s6722_s24, 4  ;;  %s88_s23 = int_to_ptr.vmem [resolvable:$true] %s87_s23  ;;  %s6820_s25 = int_to_ptr.vmem [resolvable:$true] %s28_s25 }
  0x26   :  { %s6577_s28 = scalar_lea.hbm %s7269_s8, 16 }
  0x27   :  { %p6578_p2 = scmp.ne.s32.totalorder %s7269_s8, %s6577_s28  ;;  %p6581_p3 = scmp.lt.u32.totalorder %s6577_s28, %s7269_s8 }
  0x29   :  { %p6583_p4 = pnand %p6581_p3, %p6578_p2 }
  0x2b   :  { %6586 = shalt.err (!%p6583_p4)
}
  0x2c   :  { %s6587_s4 = scalar_lea.vmem %s88_s23, 16  ;;  %s6591_s20 = scalar_lea.vmem %s88_s23, 32 }
  0x2d   :  { %p6588_p5 = scmp.ne.s32.totalorder %s88_s23, %s6587_s4  ;;  %p6592_p6 = scmp.lt.s32.totalorder %s88_s23, %s88_s23 }
  0x2e   :  { %p6593_p7 = scmp.lt.s32.totalorder %s6591_s20, %s6587_s4 }
  0x30   :  { %p6594_p8 = por %p6593_p7, %p6592_p6 }
  0x32   :  { %p6595_p9 = pnand %p6594_p8, %p6588_p5 }
  0x34   :  { %6598 = shalt.err (!%p6595_p9)
}
  0x35   :  { %90 = dma.hbm_to_vmem [thread:$0]  %s7269_s8, 16, %s88_s23, [#allocation11]  }
  0x36   :  { %s6599_s19 = scalar_lea.hbm %s7262_s1, 36864 }
  0x37   :  { %p6600_p10 = scmp.ne.s32.totalorder %s7262_s1, %s6599_s19  ;;  %p6603_p11 = scmp.lt.u32.totalorder %s6599_s19, %s7262_s1 }
  0x39   :  { %p6605_p12 = pnand %p6603_p11, %p6600_p10 }
  0x3b   :  { %6608 = shalt.err (!%p6605_p12)
}
  0x3c   :  { %s6609_s24 = scalar_lea.vmem %s6820_s25, 36864  ;;  %p6614_p0 = scmp.lt.s32.totalorder %s6820_s25, %s6820_s25 }
  0x3d   :  { %p6610_p13 = scmp.ne.s32.totalorder %s6820_s25, %s6609_s24  ;;  %p6615_p1 = scmp.lt.s32.totalorder %s6609_s24, %s6609_s24 }
  0x3f   :  { %p6616_p2 = por %p6615_p1, %p6614_p0 }
  0x41   :  { %p6617_p3 = pnand %p6616_p2, %p6610_p13 }
  0x43   :  { %6620 = shalt.err (!%p6617_p3)
}
  0x44   :  { %s6723_s8 = smov 4608   ;;  %s6724_s23 = smov 288  }
  0x45   :  { %34 = dma.hbm_to_vmem [thread:$0]  %s7262_s1, 36864, %s6820_s25, [#allocation3], %s6723_s8, %s6723_s8, %s6724_s23  }
  0x46   :  { %s6725_s28 = smov [#allocation6]   ;;  %s6621_s13 = scalar_lea.hbm %s7264_s3, 147456 }
  0x47   :  { %s50_s29 = sshll.u32 %s6725_s28, 4  ;;  %p6622_p4 = scmp.ne.s32.totalorder %s7264_s3, %s6621_s13  ;;  %s51_s29 = int_to_ptr.vmem [resolvable:$true] %s50_s29 }
  0x48   :  { %p6625_p5 = scmp.lt.u32.totalorder %s6621_s13, %s7264_s3 }
  0x4a   :  { %p6627_p6 = pnand %p6625_p5, %p6622_p4 }
  0x4c   :  { %6630 = shalt.err (!%p6627_p6)
}
  0x4d   :  { %s6631_s16 = scalar_lea.vmem %s51_s29, 147456  ;;  %p6636_p8 = scmp.lt.s32.totalorder %s51_s29, %s51_s29 }
  0x4e   :  { %p6632_p7 = scmp.ne.s32.totalorder %s51_s29, %s6631_s16  ;;  %p6637_p9 = scmp.lt.s32.totalorder %s6631_s16, %s6631_s16 }
  0x50   :  { %p6638_p10 = por %p6637_p9, %p6636_p8 }
  0x52   :  { %p6639_p11 = pnand %p6638_p10, %p6632_p7 }
  0x54   :  { %6642 = shalt.err (!%p6639_p11)
}
  0x55   :  { %s6726_s1 = smov 1024   ;;  %s6727_s25 = smov 64  }
  0x56   :  { %56 = dma.hbm_to_vmem [thread:$0]  %s7264_s3, 147456, %s51_s29, [#allocation5], %s6726_s1, %s6726_s1, %s6727_s25  }
  0x57   :  { %s6728_s21 = smov [#allocation9]   ;;  %s6729_s18 = smov [#allocation12]  }
  0x58   :  { %s75_s2 = sshll.u32 %s6728_s21, 4  ;;  %s96_s22 = sshll.u32 %s6729_s18, 4  ;;  %s76_s2 = int_to_ptr.vmem [resolvable:$true] %s75_s2  ;;  %s97_s22 = int_to_ptr.vmem [resolvable:$true] %s96_s22 }
  0x59   :  { %s6643_s23 = scalar_lea.hbm %s7267_s6, 16 }
  0x5a   :  { %p6644_p12 = scmp.ne.s32.totalorder %s7267_s6, %s6643_s23  ;;  %p6647_p13 = scmp.lt.u32.totalorder %s6643_s23, %s7267_s6 }
  0x5c   :  { %p6649_p0 = pnand %p6647_p13, %p6644_p12 }
  0x5e   :  { %6652 = shalt.err (!%p6649_p0)
}
  0x5f   :  { %s6653_s3 = scalar_lea.vmem %s76_s2, 16  ;;  %s6657_s29 = scalar_lea.vmem %s76_s2, 32 }
  0x60   :  { %p6654_p1 = scmp.ne.s32.totalorder %s76_s2, %s6653_s3  ;;  %p6658_p2 = scmp.lt.s32.totalorder %s76_s2, %s76_s2 }
  0x61   :  { %p6659_p3 = scmp.lt.s32.totalorder %s6657_s29, %s6653_s3 }
  0x63   :  { %p6660_p4 = por %p6659_p3, %p6658_p2 }
  0x65   :  { %p6661_p5 = pnand %p6660_p4, %p6654_p1 }
  0x67   :  { %6664 = shalt.err (!%p6661_p5)
}
  0x68   :  { %78 = dma.hbm_to_vmem [thread:$0]  %s7267_s6, 16, %s76_s2, [#allocation8]  }
  0x69   :  { %s6665_s14 = scalar_lea.hbm %s7270_s9, 512 }
  0x6a   :  { %p6666_p6 = scmp.ne.s32.totalorder %s7270_s9, %s6665_s14  ;;  %p6669_p7 = scmp.lt.u32.totalorder %s6665_s14, %s7270_s9 }
  0x6c   :  { %p6671_p8 = pnand %p6669_p7, %p6666_p6 }
  0x6e   :  { %6674 = shalt.err (!%p6671_p8)
}
  0x6f   :  { %s6675_s17 = scalar_lea.vmem %s97_s22, 512  ;;  %p6680_p10 = scmp.lt.s32.totalorder %s97_s22, %s97_s22 }
  0x70   :  { %p6676_p9 = scmp.ne.s32.totalorder %s97_s22, %s6675_s17  ;;  %p6681_p11 = scmp.lt.s32.totalorder %s6675_s17, %s6675_s17 }
  0x72   :  { %p6682_p12 = por %p6681_p11, %p6680_p10 }
  0x74   :  { %p6683_p13 = pnand %p6682_p12, %p6676_p9 }
  0x76   :  { %6686 = shalt.err (!%p6683_p13)
}
  0x77   :  { %s6730_s6 = smov 128   ;;  %s6731_s19 = smov 8  }
  0x78   :  { %102 = dma.hbm_to_vmem [thread:$0]  %s7270_s9, 512, %s97_s22, [#allocation11], %s6730_s6, %s6730_s6, %s6731_s19  }
  0x79   :  { %s6732_s18 = smov [#allocation13]   ;;  %s6687_s26 = scalar_lea.hbm %s7271_s10, 16 }
  0x7a   :  { %s109_s24 = sshll.u32 %s6732_s18, 4  ;;  %p6688_p0 = scmp.ne.s32.totalorder %s7271_s10, %s6687_s26  ;;  %s110_s24 = int_to_ptr.vmem [resolvable:$true] %s109_s24 }
  0x7b   :  { %p6691_p1 = scmp.lt.u32.totalorder %s6687_s26, %s7271_s10 }
  0x7d   :  { %p6693_p2 = pnand %p6691_p1, %p6688_p0 }
  0x7f   :  { %6696 = shalt.err (!%p6693_p2)
}
  0x80   :  { %s6697_s29 = scalar_lea.vmem %s110_s24, 16  ;;  %s6701_s9 = scalar_lea.vmem %s110_s24, 32 }
  0x81   :  { %p6698_p3 = scmp.ne.s32.totalorder %s110_s24, %s6697_s29  ;;  %p6702_p4 = scmp.lt.s32.totalorder %s110_s24, %s110_s24 }
  0x82   :  { %p6703_p5 = scmp.lt.s32.totalorder %s6701_s9, %s6697_s29 }
  0x84   :  { %p6704_p6 = por %p6703_p5, %p6702_p4 }
  0x86   :  { %p6705_p7 = pnand %p6704_p6, %p6698_p3 }
  0x88   :  { %6708 = shalt.err (!%p6705_p7)
}
  0x89   :  { %112 = dma.hbm_to_vmem [thread:$0]  %s7271_s10, 16, %s110_s24, [#allocation14]  }
  0x8a   :  { %6709 = dma.done.wait [#allocation3], 36864  }
  0x8b   :  { %6710 = vsyncadd [#allocation3], 4294930432 }
  0x8c   :  { %6711 = dma.done.wait [#allocation5], 148032  }
  0x8d   :  { %6712 = vsyncadd [#allocation5], 4294819264 }
  0x8e   :  { %6713 = dma.done.wait [#allocation8], 144  }
  0x8f   :  { %6714 = vsyncadd [#allocation8], 4294967152 }
  0x90   :  { %6715 = dma.done.wait [#allocation11], 528  }
  0x91   :  { %6716 = vsyncadd [#allocation11], 4294966768 }
  0x92   :  { %6717 = dma.done.wait [#allocation14], 16  }
  0x93   :  { %6718 = vsyncadd [#allocation14], 4294967280  ;;  %v6733_v0 = vmov 0.0   ;;  %v139_v1 = vld [vmem:[#allocation2 + $0x8] sm:$0xff]  ;;  %v141_v3 = vld [vmem:[#allocation2 + $0x18] sm:$0xff]  ;;  %vm616_vm0 = vcmask 523264  }
  0x94   :  { %684 = vmatprep.mubr.f32.mxu0 %v6733_v0  ;;  %755 = vmatprep.mubr.f32.mxu1 %v6733_v0  ;;  %v175_v2 = vld [vmem:[#allocation2 + $0x128] sm:$0xff]  ;;  %v177_v5 = vld [vmem:[#allocation2 + $0x138] sm:$0xff]  ;;  %v138_v6 = vld [vmem:[#allocation2] sm:$0xff]  ;;  %vm6735_vm1 = vmmov 0   ;;  %vm4799_vm2 = vcmask 261120  }
  0x95   :  { %v4985_v4 = vpack.c.bf16 %v175_v2, %v139_v1  ;;  %v174_v7 = vld [vmem:[#allocation2 + $0x120] sm:$0xff]  ;;  %v5001_v8 = vpack.c.bf16 %v177_v5, %v141_v3  ;;  %v140_v10 = vld [vmem:[#allocation2 + $0x10] sm:$0xff]  ;;  %v211_v12 = vld [vmem:[#allocation2 + $0x248] sm:$0xff] }
  0x96   :  { %v4987_v9 = vpack.c.bf16 %v174_v7, %v138_v6  ;;  %v176_v11 = vld [vmem:[#allocation2 + $0x130] sm:$0xff]  ;;  %v247_v14 = vld [vmem:[#allocation2 + $0x368] sm:$0xff]  ;;  %v213_v15 = vld [vmem:[#allocation2 + $0x258] sm:$0xff] }
  0x97   :  { %4986 = vmatprep.subr.bf16.mxu0 %v4985_v4  ;;  %v5003_v13 = vpack.c.bf16 %v176_v11, %v140_v10  ;;  %v249_v16 = vld [vmem:[#allocation2 + $0x378] sm:$0xff]  ;;  %5002 = vmatprep.subr.bf16.mxu1 %v5001_v8  ;;  %v4989_v17 = vpack.c.bf16 %v247_v14, %v211_v12  ;;  %v210_v19 = vld [vmem:[#allocation2 + $0x240] sm:$0xff]  ;;  %v212_v21 = vld [vmem:[#allocation2 + $0x250] sm:$0xff] }
  0x98   :  { %4988 = vmatpush1.bf16.msra.mxu0 %v4987_v9  ;;  %v5005_v18 = vpack.c.bf16 %v249_v16, %v213_v15  ;;  %v246_v20 = vld [vmem:[#allocation2 + $0x360] sm:$0xff]  ;;  %v248_v23 = vld [vmem:[#allocation2 + $0x370] sm:$0xff]  ;;  %v283_v24 = vld [vmem:[#allocation2 + $0x488] sm:$0xff] }
  0x99   :  { %5004 = vmatpush1.bf16.msra.mxu1 %v5003_v13  ;;  %v4991_v22 = vpack.c.bf16 %v246_v20, %v210_v19  ;;  %v319_v25 = vld [vmem:[#allocation2 + $0x5a8] sm:$0xff]  ;;  %4990 = vmatprep.subr.bf16.mxu0 %v4989_v17  ;;  %v5007_v26 = vpack.c.bf16 %v248_v23, %v212_v21  ;;  %v285_v28 = vld [vmem:[#allocation2 + $0x498] sm:$0xff]  ;;  %v282_v30 = vld [vmem:[#allocation2 + $0x480] sm:$0xff] }
  0x9a   :  { %5006 = vmatprep.subr.bf16.mxu1 %v5005_v18  ;;  %v4993_v27 = vpack.c.bf16 %v319_v25, %v283_v24  ;;  %v321_v29 = vld [vmem:[#allocation2 + $0x5b8] sm:$0xff]  ;;  %v318_v32 = vld [vmem:[#allocation2 + $0x5a0] sm:$0xff]  ;;  %v284_v33 = vld [vmem:[#allocation2 + $0x490] sm:$0xff] }
  0x9b   :  { %v5009_v31 = vpack.c.bf16 %v321_v29, %v285_v28  ;;  %v320_v34 = vld [vmem:[#allocation2 + $0x5b0] sm:$0xff]  ;;  %v4995_v35 = vpack.c.bf16 %v318_v32, %v282_v30  ;;  %v355_v36 = vld [vmem:[#allocation2 + $0x6c8] sm:$0xff]  ;;  %v357_v38 = vld [vmem:[#allocation2 + $0x6d8] sm:$0xff] }
  0x9c   :  { %4992 = vmatpush1.bf16.msra.mxu0 %v4991_v22  ;;  %v391_v37 = vld [vmem:[#allocation2 + $0x7e8] sm:$0xff]  ;;  %v5011_v39 = vpack.c.bf16 %v320_v34, %v284_v33  ;;  %v393_v41 = vld [vmem:[#allocation2 + $0x7f8] sm:$0xff]  ;;  %v354_v42 = vld [vmem:[#allocation2 + $0x6c0] sm:$0xff] }
  0x9d   :  { %5008 = vmatpush1.bf16.msra.mxu1 %v5007_v26  ;;  %4994 = vmatprep.subr.bf16.mxu0 %v4993_v27  ;;  %v4997_v40 = vpack.c.bf16 %v391_v37, %v355_v36  ;;  %v390_v43 = vld [vmem:[#allocation2 + $0x7e0] sm:$0xff]  ;;  %v5013_v44 = vpack.c.bf16 %v393_v41, %v357_v38  ;;  %v356_v45 = vld [vmem:[#allocation2 + $0x6d0] sm:$0xff]  ;;  %v143_v47 = vld [vmem:[#allocation2 + $0x28] sm:$0xff] }
  0x9e   :  { %5010 = vmatprep.subr.bf16.mxu1 %v5009_v31  ;;  %v392_v46 = vld [vmem:[#allocation2 + $0x7f0] sm:$0xff]  ;;  %v179_v48 = vld [vmem:[#allocation2 + $0x148] sm:$0xff]  ;;  %v145_v49 = vld [vmem:[#allocation2 + $0x38] sm:$0xff]  ;;  %v4999_v50 = vpack.c.bf16 %v390_v43, %v354_v42 }
  0x9f   :  { %v181_v51 = vld [vmem:[#allocation2 + $0x158] sm:$0xff]  ;;  %v5015_v52 = vpack.c.bf16 %v392_v46, %v356_v45  ;;  %v5017_v53 = vpack.c.bf16 %v179_v48, %v143_v47  ;;  %v142_v54 = vld [vmem:[#allocation2 + $0x20] sm:$0xff]  ;;  %v144_v56 = vld [vmem:[#allocation2 + $0x30] sm:$0xff] }
  0xa0   :  { %4996 = vmatpush1.bf16.msra.mxu0 %v4995_v35  ;;  %v178_v55 = vld [vmem:[#allocation2 + $0x140] sm:$0xff]  ;;  %v5033_v57 = vpack.c.bf16 %v181_v51, %v145_v49  ;;  %v180_v58 = vld [vmem:[#allocation2 + $0x150] sm:$0xff]  ;;  %v215_v59 = vld [vmem:[#allocation2 + $0x268] sm:$0xff] }
  0xa1   :  { %5012 = vmatpush1.bf16.msra.mxu1 %v5011_v39  ;;  %4998 = vmatprep.subr.bf16.mxu0 %v4997_v40  ;;  %v251_v60 = vld [vmem:[#allocation2 + $0x388] sm:$0xff]  ;;  %v217_v61 = vld [vmem:[#allocation2 + $0x278] sm:$0xff]  ;;  %v6904_v63 = vld [vmem:[%s7261_s0] sm:$0xff]  ;;  %v5019_v1 = vpack.c.bf16 %v178_v55, %v142_v54  ;;  %v5035_v2 = vpack.c.bf16 %v180_v58, %v144_v56 }
  0xa2   :  { %5014 = vmatprep.subr.bf16.mxu1 %v5013_v44  ;;  %v253_v62 = vld [vmem:[#allocation2 + $0x398] sm:$0xff]  ;;  %v5021_v3 = vpack.c.bf16 %v251_v60, %v215_v59  ;;  %v214_v4 = vld [vmem:[#allocation2 + $0x260] sm:$0xff]  ;;  %v216_v6 = vld [vmem:[#allocation2 + $0x270] sm:$0xff] }
  0xa3   :  { %v250_v5 = vld [vmem:[#allocation2 + $0x380] sm:$0xff]  ;;  %v5037_v7 = vpack.c.bf16 %v253_v62, %v217_v61  ;;  %v252_v8 = vld [vmem:[#allocation2 + $0x390] sm:$0xff]  ;;  %v287_v9 = vld [vmem:[#allocation2 + $0x4a8] sm:$0xff] }
  0xa4   :  { %5000 = vmatpush1.bf16.msra.mxu0 %v4999_v50  ;;  %v323_v10 = vld [vmem:[#allocation2 + $0x5c8] sm:$0xff]  ;;  %v289_v11 = vld [vmem:[#allocation2 + $0x4b8] sm:$0xff]  ;;  %v5023_v13 = vpack.c.bf16 %v250_v5, %v214_v4  ;;  %v5039_v14 = vpack.c.bf16 %v252_v8, %v216_v6  ;;  %v286_v16 = vld [vmem:[#allocation2 + $0x4a0] sm:$0xff] }
  0xa5   :  { %5016 = vmatpush1.bf16.msra.mxu1 %v5015_v52  ;;  %5018 = vmatprep.subr.bf16.mxu0 %v5017_v53  ;;  %v325_v12 = vld [vmem:[#allocation2 + $0x5d8] sm:$0xff]  ;;  %v5025_v15 = vpack.c.bf16 %v323_v10, %v287_v9  ;;  %v322_v17 = vld [vmem:[#allocation2 + $0x5c0] sm:$0xff]  ;;  %v288_v18 = vld [vmem:[#allocation2 + $0x4b0] sm:$0xff] }
  0xa6   :  { %5034 = vmatprep.subr.bf16.mxu1 %v5033_v57  ;;  %v5041_v19 = vpack.c.bf16 %v325_v12, %v289_v11  ;;  %v324_v20 = vld [vmem:[#allocation2 + $0x5d0] sm:$0xff]  ;;  %v359_v21 = vld [vmem:[#allocation2 + $0x6e8] sm:$0xff]  ;;  %v361_v23 = vld [vmem:[#allocation2 + $0x6f8] sm:$0xff]  ;;  %v5027_v25 = vpack.c.bf16 %v322_v17, %v286_v16 }
  0xa7   :  { %4883 = vmatmul.mubr.msk.f32.vlgmr.msra.gmra.mrb[0].mxu0 %vm616_vm0, %v6904_v63  ;;  %v395_v22 = vld [vmem:[#allocation2 + $0x808] sm:$0xff]  ;;  %v397_v24 = vld [vmem:[#allocation2 + $0x818] sm:$0xff]  ;;  %v5043_v26 = vpack.c.bf16 %v324_v20, %v288_v18  ;;  %v358_v28 = vld [vmem:[#allocation2 + $0x6e0] sm:$0xff] }
  0xa8   :  { %4884 = vmatmul.mubr.msk.f32.vlgmr.msra.gmra.mrb[0].mxu1 %vm616_vm0, %v6904_v63  ;;  %5020 = vmatpush1.bf16.msra.mxu0 %v5019_v1  ;;  %v5029_v27 = vpack.c.bf16 %v395_v22, %v359_v21  ;;  %v394_v29 = vld [vmem:[#allocation2 + $0x800] sm:$0xff]  ;;  %v360_v30 = vld [vmem:[#allocation2 + $0x6f0] sm:$0xff]  ;;  %v5045_v31 = vpack.c.bf16 %v397_v24, %v361_v23  ;;  %v147_v33 = vld [vmem:[#allocation2 + $0x48] sm:$0xff] }
  0xa9   :  { %5036 = vmatpush1.bf16.msra.mxu1 %v5035_v2  ;;  %5022 = vmatprep.subr.bf16.mxu0 %v5021_v3  ;;  %v396_v32 = vld [vmem:[#allocation2 + $0x810] sm:$0xff]  ;;  %v183_v34 = vld [vmem:[#allocation2 + $0x168] sm:$0xff]  ;;  %v149_v35 = vld [vmem:[#allocation2 + $0x58] sm:$0xff]  ;;  %v5031_v37 = vpack.c.bf16 %v394_v29, %v358_v28 }
  0xaa   :  { %5038 = vmatprep.subr.bf16.mxu1 %v5037_v7  ;;  %826 = vmatprep.mubr.f32.mxu0 %v6733_v0  ;;  %v185_v36 = vld [vmem:[#allocation2 + $0x178] sm:$0xff]  ;;  %v5047_v38 = vpack.c.bf16 %v396_v32, %v360_v30  ;;  %v5049_v39 = vpack.c.bf16 %v183_v34, %v147_v33  ;;  %v146_v40 = vld [vmem:[#allocation2 + $0x40] sm:$0xff]  ;;  %v148_v42 = vld [vmem:[#allocation2 + $0x50] sm:$0xff] }
  0xab   :  { %897 = vmatprep.mubr.f32.mxu1 %v6733_v0  ;;  %v182_v41 = vld [vmem:[#allocation2 + $0x160] sm:$0xff]  ;;  %v5065_v43 = vpack.c.bf16 %v185_v36, %v149_v35  ;;  %v184_v44 = vld [vmem:[#allocation2 + $0x170] sm:$0xff]  ;;  %v219_v45 = vld [vmem:[#allocation2 + $0x288] sm:$0xff] }
  0xac   :  { %5024 = vmatpush1.bf16.msra.mxu0 %v5023_v13  ;;  %v255_v46 = vld [vmem:[#allocation2 + $0x3a8] sm:$0xff]  ;;  %v221_v47 = vld [vmem:[#allocation2 + $0x298] sm:$0xff]  ;;  %v5051_v49 = vpack.c.bf16 %v182_v41, %v146_v40  ;;  %v5067_v50 = vpack.c.bf16 %v184_v44, %v148_v42  ;;  %v218_v52 = vld [vmem:[#allocation2 + $0x280] sm:$0xff] }
  0xad   :  { %5040 = vmatpush1.bf16.msra.mxu1 %v5039_v14  ;;  %5026 = vmatprep.subr.bf16.mxu0 %v5025_v15  ;;  %v257_v48 = vld [vmem:[#allocation2 + $0x3b8] sm:$0xff]  ;;  %v5053_v51 = vpack.c.bf16 %v255_v46, %v219_v45  ;;  %v254_v53 = vld [vmem:[#allocation2 + $0x3a0] sm:$0xff]  ;;  %v220_v54 = vld [vmem:[#allocation2 + $0x290] sm:$0xff] }
  0xae   :  { %5042 = vmatprep.subr.bf16.mxu1 %v5041_v19  ;;  %v5069_v55 = vpack.c.bf16 %v257_v48, %v221_v47  ;;  %v256_v56 = vld [vmem:[#allocation2 + $0x3b0] sm:$0xff]  ;;  %v291_v57 = vld [vmem:[#allocation2 + $0x4c8] sm:$0xff]  ;;  %v293_v59 = vld [vmem:[#allocation2 + $0x4d8] sm:$0xff]  ;;  %v5055_v61 = vpack.c.bf16 %v254_v53, %v218_v52 }
  0xaf   :  { %v327_v58 = vld [vmem:[#allocation2 + $0x5e8] sm:$0xff]  ;;  %v329_v60 = vld [vmem:[#allocation2 + $0x5f8] sm:$0xff]  ;;  %v5071_v62 = vpack.c.bf16 %v256_v56, %v220_v54  ;;  %v290_v2 = vld [vmem:[#allocation2 + $0x4c0] sm:$0xff] }
  0xb0   :  { %5028 = vmatpush1.bf16.msra.mxu0 %v5027_v25  ;;  %v5057_v1 = vpack.c.bf16 %v327_v58, %v291_v57  ;;  %v326_v3 = vld [vmem:[#allocation2 + $0x5e0] sm:$0xff]  ;;  %v292_v4 = vld [vmem:[#allocation2 + $0x4d0] sm:$0xff]  ;;  %v5073_v5 = vpack.c.bf16 %v329_v60, %v293_v59  ;;  %v363_v7 = vld [vmem:[#allocation2 + $0x708] sm:$0xff] }
  0xb1   :  { %5044 = vmatpush1.bf16.msra.mxu1 %v5043_v26  ;;  %5030 = vmatprep.subr.bf16.mxu0 %v5029_v27  ;;  %v328_v6 = vld [vmem:[#allocation2 + $0x5f0] sm:$0xff]  ;;  %v399_v8 = vld [vmem:[#allocation2 + $0x828] sm:$0xff]  ;;  %v365_v9 = vld [vmem:[#allocation2 + $0x718] sm:$0xff]  ;;  %v5059_v11 = vpack.c.bf16 %v326_v3, %v290_v2 }
  0xb2   :  { %5046 = vmatprep.subr.bf16.mxu1 %v5045_v31  ;;  %v401_v10 = vld [vmem:[#allocation2 + $0x838] sm:$0xff]  ;;  %v5075_v12 = vpack.c.bf16 %v328_v6, %v292_v4  ;;  %v5061_v13 = vpack.c.bf16 %v399_v8, %v363_v7  ;;  %v362_v14 = vld [vmem:[#allocation2 + $0x700] sm:$0xff]  ;;  %v364_v16 = vld [vmem:[#allocation2 + $0x710] sm:$0xff] }
  0xb3   :  { %v398_v15 = vld [vmem:[#allocation2 + $0x820] sm:$0xff]  ;;  %v5077_v17 = vpack.c.bf16 %v401_v10, %v365_v9  ;;  %v400_v18 = vld [vmem:[#allocation2 + $0x830] sm:$0xff]  ;;  %v151_v19 = vld [vmem:[#allocation2 + $0x68] sm:$0xff] }
  0xb4   :  { %5032 = vmatpush1.bf16.msra.mxu0 %v5031_v37  ;;  %v187_v20 = vld [vmem:[#allocation2 + $0x188] sm:$0xff]  ;;  %v153_v21 = vld [vmem:[#allocation2 + $0x78] sm:$0xff]  ;;  %v5063_v23 = vpack.c.bf16 %v398_v15, %v362_v14  ;;  %v5079_v24 = vpack.c.bf16 %v400_v18, %v364_v16  ;;  %v150_v26 = vld [vmem:[#allocation2 + $0x60] sm:$0xff] }
  0xb5   :  { %5048 = vmatpush1.bf16.msra.mxu1 %v5047_v38  ;;  %5050 = vmatprep.subr.bf16.mxu0 %v5049_v39  ;;  %v189_v22 = vld [vmem:[#allocation2 + $0x198] sm:$0xff]  ;;  %v5081_v25 = vpack.c.bf16 %v187_v20, %v151_v19  ;;  %v186_v27 = vld [vmem:[#allocation2 + $0x180] sm:$0xff]  ;;  %v152_v28 = vld [vmem:[#allocation2 + $0x70] sm:$0xff] }
  0xb6   :  { %5066 = vmatprep.subr.bf16.mxu1 %v5065_v43  ;;  %v5097_v29 = vpack.c.bf16 %v189_v22, %v153_v21  ;;  %v188_v30 = vld [vmem:[#allocation2 + $0x190] sm:$0xff]  ;;  %v223_v31 = vld [vmem:[#allocation2 + $0x2a8] sm:$0xff]  ;;  %v225_v33 = vld [vmem:[#allocation2 + $0x2b8] sm:$0xff]  ;;  %v5083_v35 = vpack.c.bf16 %v186_v27, %v150_v26 }
  0xb7   :  { %4885 = vmatmul.mubr.msk.f32.vlgmr.msra.gmra.mrb[2].mxu0 %vm616_vm0, %v6904_v63  ;;  %v259_v32 = vld [vmem:[#allocation2 + $0x3c8] sm:$0xff]  ;;  %v261_v34 = vld [vmem:[#allocation2 + $0x3d8] sm:$0xff]  ;;  %v5099_v36 = vpack.c.bf16 %v188_v30, %v152_v28  ;;  %v222_v38 = vld [vmem:[#allocation2 + $0x2a0] sm:$0xff] }
  0xb8   :  { %4886 = vmatmul.mubr.msk.f32.vlgmr.msra.gmra.mrb[2].mxu1 %vm616_vm0, %v6904_v63  ;;  %5052 = vmatpush1.bf16.msra.mxu0 %v5051_v49  ;;  %v5085_v37 = vpack.c.bf16 %v259_v32, %v223_v31  ;;  %v258_v39 = vld [vmem:[#allocation2 + $0x3c0] sm:$0xff]  ;;  %v224_v40 = vld [vmem:[#allocation2 + $0x2b0] sm:$0xff]  ;;  %v5101_v41 = vpack.c.bf16 %v261_v34, %v225_v33  ;;  %v295_v43 = vld [vmem:[#allocation2 + $0x4e8] sm:$0xff] }
  0xb9   :  { %5068 = vmatpush1.bf16.msra.mxu1 %v5067_v50  ;;  %5054 = vmatprep.subr.bf16.mxu0 %v5053_v51  ;;  %v260_v42 = vld [vmem:[#allocation2 + $0x3d0] sm:$0xff]  ;;  %v331_v44 = vld [vmem:[#allocation2 + $0x608] sm:$0xff]  ;;  %v297_v45 = vld [vmem:[#allocation2 + $0x4f8] sm:$0xff]  ;;  %v5087_v47 = vpack.c.bf16 %v258_v39, %v222_v38 }
  0xba   :  { %5070 = vmatprep.subr.bf16.mxu1 %v5069_v55  ;;  %968 = vmatprep.mubr.f32.mxu0 %v6733_v0  ;;  %v333_v46 = vld [vmem:[#allocation2 + $0x618] sm:$0xff]  ;;  %v5103_v48 = vpack.c.bf16 %v260_v42, %v224_v40  ;;  %v5089_v49 = vpack.c.bf16 %v331_v44, %v295_v43  ;;  %v294_v50 = vld [vmem:[#allocation2 + $0x4e0] sm:$0xff]  ;;  %v296_v52 = vld [vmem:[#allocation2 + $0x4f0] sm:$0xff] }
  0xbb   :  { %1039 = vmatprep.mubr.f32.mxu1 %v6733_v0  ;;  %v330_v51 = vld [vmem:[#allocation2 + $0x600] sm:$0xff]  ;;  %v5105_v53 = vpack.c.bf16 %v333_v46, %v297_v45  ;;  %v332_v54 = vld [vmem:[#allocation2 + $0x610] sm:$0xff]  ;;  %v367_v55 = vld [vmem:[#allocation2 + $0x728] sm:$0xff] }
  0xbc   :  { %5056 = vmatpush1.bf16.msra.mxu0 %v5055_v61  ;;  %v403_v56 = vld [vmem:[#allocation2 + $0x848] sm:$0xff]  ;;  %v369_v57 = vld [vmem:[#allocation2 + $0x738] sm:$0xff]  ;;  %v5091_v59 = vpack.c.bf16 %v330_v51, %v294_v50  ;;  %v5107_v60 = vpack.c.bf16 %v332_v54, %v296_v52  ;;  %v368_v2 = vld [vmem:[#allocation2 + $0x730] sm:$0xff] }
  0xbd   :  { %5072 = vmatpush1.bf16.msra.mxu1 %v5071_v62  ;;  %5058 = vmatprep.subr.bf16.mxu0 %v5057_v1  ;;  %v405_v58 = vld [vmem:[#allocation2 + $0x858] sm:$0xff]  ;;  %v5093_v61 = vpack.c.bf16 %v403_v56, %v367_v55  ;;  %v366_v62 = vld [vmem:[#allocation2 + $0x720] sm:$0xff]  ;;  %v404_v4 = vld [vmem:[#allocation2 + $0x850] sm:$0xff] }
  0xbe   :  { %5074 = vmatprep.subr.bf16.mxu1 %v5073_v5  ;;  %v402_v1 = vld [vmem:[#allocation2 + $0x840] sm:$0xff]  ;;  %v5109_v3 = vpack.c.bf16 %v405_v58, %v369_v57  ;;  %v155_v5 = vld [vmem:[#allocation2 + $0x88] sm:$0xff]  ;;  %v157_v7 = vld [vmem:[#allocation2 + $0x98] sm:$0xff]  ;;  %v5111_v10 = vpack.c.bf16 %v404_v4, %v368_v2 }
  0xbf   :  { %v191_v6 = vld [vmem:[#allocation2 + $0x1a8] sm:$0xff]  ;;  %v193_v8 = vld [vmem:[#allocation2 + $0x1b8] sm:$0xff]  ;;  %v5095_v9 = vpack.c.bf16 %v402_v1, %v366_v62  ;;  %v156_v14 = vld [vmem:[#allocation2 + $0x90] sm:$0xff] }
  0xc0   :  { %5060 = vmatpush1.bf16.msra.mxu0 %v5059_v11  ;;  %v5113_v11 = vpack.c.bf16 %v191_v6, %v155_v5  ;;  %v5129_v15 = vpack.c.bf16 %v193_v8, %v157_v7  ;;  %v192_v16 = vld [vmem:[#allocation2 + $0x1b0] sm:$0xff]  ;;  %v263_v18 = vld [vmem:[#allocation2 + $0x3e8] sm:$0xff]  ;;  %v229_v19 = vld [vmem:[#allocation2 + $0x2d8] sm:$0xff] }
  0xc1   :  { %5076 = vmatpush1.bf16.msra.mxu1 %v5075_v12  ;;  %5062 = vmatprep.subr.bf16.mxu0 %v5061_v13  ;;  %v154_v12 = vld [vmem:[#allocation2 + $0x80] sm:$0xff]  ;;  %v265_v20 = vld [vmem:[#allocation2 + $0x3f8] sm:$0xff]  ;;  %v5131_v22 = vpack.c.bf16 %v192_v16, %v156_v14  ;;  %v228_v26 = vld [vmem:[#allocation2 + $0x2d0] sm:$0xff] }
  0xc2   :  { %5078 = vmatprep.subr.bf16.mxu1 %v5077_v17  ;;  %v190_v13 = vld [vmem:[#allocation2 + $0x1a0] sm:$0xff]  ;;  %v227_v17 = vld [vmem:[#allocation2 + $0x2c8] sm:$0xff]  ;;  %v5133_v27 = vpack.c.bf16 %v265_v20, %v229_v19  ;;  %v264_v28 = vld [vmem:[#allocation2 + $0x3f0] sm:$0xff] }
  0xc3   :  { %v5115_v21 = vpack.c.bf16 %v190_v13, %v154_v12  ;;  %v335_v30 = vld [vmem:[#allocation2 + $0x628] sm:$0xff]  ;;  %v301_v31 = vld [vmem:[#allocation2 + $0x518] sm:$0xff]  ;;  %v5135_v34 = vpack.c.bf16 %v264_v28, %v228_v26  ;;  %v300_v38 = vld [vmem:[#allocation2 + $0x510] sm:$0xff] }
  0xc4   :  { %5064 = vmatpush1.bf16.msra.mxu0 %v5063_v23  ;;  %v5117_v23 = vpack.c.bf16 %v263_v18, %v227_v17  ;;  %v337_v32 = vld [vmem:[#allocation2 + $0x638] sm:$0xff]  ;;  %v336_v40 = vld [vmem:[#allocation2 + $0x630] sm:$0xff]  ;;  %v407_v42 = vld [vmem:[#allocation2 + $0x868] sm:$0xff] }
  0xc5   :  { %5080 = vmatpush1.bf16.msra.mxu1 %v5079_v24  ;;  %5082 = vmatprep.subr.bf16.mxu0 %v5081_v25  ;;  %v226_v24 = vld [vmem:[#allocation2 + $0x2c0] sm:$0xff]  ;;  %v5137_v39 = vpack.c.bf16 %v337_v32, %v301_v31  ;;  %v373_v43 = vld [vmem:[#allocation2 + $0x758] sm:$0xff]  ;;  %v5139_v46 = vpack.c.bf16 %v336_v40, %v300_v38  ;;  %v372_v50 = vld [vmem:[#allocation2 + $0x750] sm:$0xff] }
  0xc6   :  { %5098 = vmatprep.subr.bf16.mxu1 %v5097_v29  ;;  %v262_v25 = vld [vmem:[#allocation2 + $0x3e0] sm:$0xff]  ;;  %v299_v29 = vld [vmem:[#allocation2 + $0x508] sm:$0xff]  ;;  %v409_v44 = vld [vmem:[#allocation2 + $0x878] sm:$0xff] }
  0xc7   :  { %4887 = vmatmul.mubr.msk.f32.vlgmr.msra.gmra.mrb[4].mxu0 %vm616_vm0, %v6904_v63  ;;  %v5119_v33 = vpack.c.bf16 %v262_v25, %v226_v24  ;;  %v5141_v51 = vpack.c.bf16 %v409_v44, %v373_v43  ;;  %v408_v52 = vld [vmem:[#allocation2 + $0x870] sm:$0xff]  ;;  %v195_v54 = vld [vmem:[#allocation2 + $0x1c8] sm:$0xff]  ;;  %v161_v55 = vld [vmem:[#allocation2 + $0xb8] sm:$0xff] }
  0xc8   :  { %4888 = vmatmul.mubr.msk.f32.vlgmr.msra.gmra.mrb[4].mxu1 %vm616_vm0, %v6904_v63  ;;  %5084 = vmatpush1.bf16.msra.mxu0 %v5083_v35  ;;  %v5121_v35 = vpack.c.bf16 %v335_v30, %v299_v29  ;;  %v197_v56 = vld [vmem:[#allocation2 + $0x1d8] sm:$0xff]  ;;  %v5143_v58 = vpack.c.bf16 %v408_v52, %v372_v50  ;;  %v160_v62 = vld [vmem:[#allocation2 + $0xb0] sm:$0xff]  ;;  %v267_v4 = vld [vmem:[#allocation2 + $0x408] sm:$0xff] }
  0xc9   :  { %5100 = vmatpush1.bf16.msra.mxu1 %v5099_v36  ;;  %5086 = vmatprep.subr.bf16.mxu0 %v5085_v37  ;;  %v298_v36 = vld [vmem:[#allocation2 + $0x500] sm:$0xff]  ;;  %v5161_v1 = vpack.c.bf16 %v197_v56, %v161_v55  ;;  %v196_v2 = vld [vmem:[#allocation2 + $0x1d0] sm:$0xff]  ;;  %v233_v5 = vld [vmem:[#allocation2 + $0x2f8] sm:$0xff] }
  0xca   :  { %5102 = vmatprep.subr.bf16.mxu1 %v5101_v41  ;;  %1110 = vmatprep.mubr.f32.mxu0 %v6733_v0  ;;  %v334_v37 = vld [vmem:[#allocation2 + $0x620] sm:$0xff]  ;;  %v371_v41 = vld [vmem:[#allocation2 + $0x748] sm:$0xff]  ;;  %v269_v6 = vld [vmem:[#allocation2 + $0x418] sm:$0xff]  ;;  %v5163_v8 = vpack.c.bf16 %v196_v2, %v160_v62 }
  0xcb   :  { %1181 = vmatprep.mubr.f32.mxu1 %v6733_v0  ;;  %v5123_v45 = vpack.c.bf16 %v334_v37, %v298_v36  ;;  %v232_v12 = vld [vmem:[#allocation2 + $0x2f0] sm:$0xff]  ;;  %v5165_v13 = vpack.c.bf16 %v269_v6, %v233_v5  ;;  %v339_v16 = vld [vmem:[#allocation2 + $0x648] sm:$0xff]  ;;  %v305_v17 = vld [vmem:[#allocation2 + $0x538] sm:$0xff] }
  0xcc   :  { %5088 = vmatpush1.bf16.msra.mxu0 %v5087_v47  ;;  %v5125_v47 = vpack.c.bf16 %v407_v42, %v371_v41  ;;  %v268_v14 = vld [vmem:[#allocation2 + $0x410] sm:$0xff]  ;;  %v341_v18 = vld [vmem:[#allocation2 + $0x658] sm:$0xff]  ;;  %v411_v28 = vld [vmem:[#allocation2 + $0x888] sm:$0xff] }
  0xcd   :  { %5104 = vmatpush1.bf16.msra.mxu1 %v5103_v48  ;;  %5090 = vmatprep.subr.bf16.mxu0 %v5089_v49  ;;  %v370_v48 = vld [vmem:[#allocation2 + $0x740] sm:$0xff]  ;;  %v5167_v20 = vpack.c.bf16 %v268_v14, %v232_v12  ;;  %v304_v24 = vld [vmem:[#allocation2 + $0x530] sm:$0xff]  ;;  %v5169_v25 = vpack.c.bf16 %v341_v18, %v305_v17  ;;  %v377_v29 = vld [vmem:[#allocation2 + $0x778] sm:$0xff] }
  0xce   :  { %5106 = vmatprep.subr.bf16.mxu1 %v5105_v53  ;;  %v406_v49 = vld [vmem:[#allocation2 + $0x860] sm:$0xff]  ;;  %v159_v53 = vld [vmem:[#allocation2 + $0xa8] sm:$0xff]  ;;  %v340_v26 = vld [vmem:[#allocation2 + $0x650] sm:$0xff] }
  0xcf   :  { %v5127_v57 = vpack.c.bf16 %v406_v49, %v370_v48  ;;  %v413_v30 = vld [vmem:[#allocation2 + $0x898] sm:$0xff]  ;;  %v5171_v32 = vpack.c.bf16 %v340_v26, %v304_v24  ;;  %v376_v36 = vld [vmem:[#allocation2 + $0x770] sm:$0xff]  ;;  %v199_v40 = vld [vmem:[#allocation2 + $0x1e8] sm:$0xff] }
  0xd0   :  { %5092 = vmatpush1.bf16.msra.mxu0 %v5091_v59  ;;  %v5145_v59 = vpack.c.bf16 %v195_v54, %v159_v53  ;;  %v5173_v37 = vpack.c.bf16 %v413_v30, %v377_v29  ;;  %v412_v38 = vld [vmem:[#allocation2 + $0x890] sm:$0xff]  ;;  %v165_v41 = vld [vmem:[#allocation2 + $0xd8] sm:$0xff]  ;;  %v271_v52 = vld [vmem:[#allocation2 + $0x428] sm:$0xff] }
  0xd1   :  { %5108 = vmatpush1.bf16.msra.mxu1 %v5107_v60  ;;  %5094 = vmatprep.subr.bf16.mxu0 %v5093_v61  ;;  %v158_v60 = vld [vmem:[#allocation2 + $0xa0] sm:$0xff]  ;;  %v201_v42 = vld [vmem:[#allocation2 + $0x1f8] sm:$0xff]  ;;  %v5175_v44 = vpack.c.bf16 %v412_v38, %v376_v36  ;;  %v164_v48 = vld [vmem:[#allocation2 + $0xd0] sm:$0xff] }
  0xd2   :  { %5110 = vmatprep.subr.bf16.mxu1 %v5109_v3  ;;  %v194_v61 = vld [vmem:[#allocation2 + $0x1c0] sm:$0xff]  ;;  %v231_v3 = vld [vmem:[#allocation2 + $0x2e8] sm:$0xff]  ;;  %v5193_v49 = vpack.c.bf16 %v201_v42, %v165_v41  ;;  %v200_v50 = vld [vmem:[#allocation2 + $0x1f0] sm:$0xff] }
  0xd3   :  { %v5147_v7 = vpack.c.bf16 %v194_v61, %v158_v60  ;;  %v237_v53 = vld [vmem:[#allocation2 + $0x318] sm:$0xff]  ;;  %v5195_v56 = vpack.c.bf16 %v200_v50, %v164_v48  ;;  %v236_v60 = vld [vmem:[#allocation2 + $0x310] sm:$0xff]  ;;  %v343_v2 = vld [vmem:[#allocation2 + $0x668] sm:$0xff] }
  0xd4   :  { %5096 = vmatpush1.bf16.msra.mxu0 %v5095_v9  ;;  %v5149_v9 = vpack.c.bf16 %v267_v4, %v231_v3  ;;  %v273_v54 = vld [vmem:[#allocation2 + $0x438] sm:$0xff]  ;;  %v272_v62 = vld [vmem:[#allocation2 + $0x430] sm:$0xff]  ;;  %v415_v14 = vld [vmem:[#allocation2 + $0x8a8] sm:$0xff] }
  0xd5   :  { %5112 = vmatpush1.bf16.msra.mxu1 %v5111_v10  ;;  %5114 = vmatprep.subr.bf16.mxu0 %v5113_v11  ;;  %v230_v10 = vld [vmem:[#allocation2 + $0x2e0] sm:$0xff]  ;;  %v5197_v61 = vpack.c.bf16 %v273_v54, %v237_v53  ;;  %v309_v3 = vld [vmem:[#allocation2 + $0x558] sm:$0xff]  ;;  %v5199_v6 = vpack.c.bf16 %v272_v62, %v236_v60  ;;  %v344_v12 = vld [vmem:[#allocation2 + $0x670] sm:$0xff] }
  0xd6   :  { %5130 = vmatprep.subr.bf16.mxu1 %v5129_v15  ;;  %v266_v11 = vld [vmem:[#allocation2 + $0x400] sm:$0xff]  ;;  %v303_v15 = vld [vmem:[#allocation2 + $0x528] sm:$0xff]  ;;  %v345_v4 = vld [vmem:[#allocation2 + $0x678] sm:$0xff] }
  0xd7   :  { %4889 = vmatmul.mubr.msk.f32.vlgmr.msra.gmra.mrb[6].mxu0 %vm616_vm0, %v6904_v63  ;;  %v5151_v19 = vpack.c.bf16 %v266_v11, %v230_v10  ;;  %v308_v10 = vld [vmem:[#allocation2 + $0x550] sm:$0xff]  ;;  %v5201_v11 = vpack.c.bf16 %v345_v4, %v309_v3  ;;  %v203_v26 = vld [vmem:[#allocation2 + $0x208] sm:$0xff] }
  0xd8   :  { %4890 = vmatmul.mubr.msk.f32.vlgmr.msra.gmra.mrb[6].mxu1 %vm616_vm0, %v6904_v63  ;;  %5116 = vmatpush1.bf16.msra.mxu0 %v5115_v21  ;;  %v5153_v21 = vpack.c.bf16 %v339_v16, %v303_v15  ;;  %v381_v15 = vld [vmem:[#allocation2 + $0x798] sm:$0xff]  ;;  %v5203_v18 = vpack.c.bf16 %v344_v12, %v308_v10  ;;  %v416_v24 = vld [vmem:[#allocation2 + $0x8b0] sm:$0xff]  ;;  %v275_v38 = vld [vmem:[#allocation2 + $0x448] sm:$0xff] }
  0xd9   :  { %5132 = vmatpush1.bf16.msra.mxu1 %v5131_v22  ;;  %5118 = vmatprep.subr.bf16.mxu0 %v5117_v23  ;;  %v302_v22 = vld [vmem:[#allocation2 + $0x520] sm:$0xff]  ;;  %v417_v16 = vld [vmem:[#allocation2 + $0x8b8] sm:$0xff]  ;;  %v204_v36 = vld [vmem:[#allocation2 + $0x210] sm:$0xff] }
  0xda   :  { %5134 = vmatprep.subr.bf16.mxu1 %v5133_v27  ;;  %1252 = vmatprep.mubr.f32.mxu0 %v6733_v0  ;;  %v338_v23 = vld [vmem:[#allocation2 + $0x640] sm:$0xff]  ;;  %v375_v27 = vld [vmem:[#allocation2 + $0x768] sm:$0xff]  ;;  %v276_v48 = vld [vmem:[#allocation2 + $0x450] sm:$0xff] }
  0xdb   :  { %1323 = vmatprep.mubr.f32.mxu1 %v6733_v0  ;;  %v5155_v31 = vpack.c.bf16 %v338_v23, %v302_v22  ;;  %v380_v22 = vld [vmem:[#allocation2 + $0x790] sm:$0xff]  ;;  %v5205_v23 = vpack.c.bf16 %v417_v16, %v381_v15  ;;  %v347_v50 = vld [vmem:[#allocation2 + $0x688] sm:$0xff] }
  0xdc   :  { %5120 = vmatpush1.bf16.msra.mxu0 %v5119_v33  ;;  %v5157_v33 = vpack.c.bf16 %v411_v28, %v375_v27  ;;  %v169_v27 = vld [vmem:[#allocation2 + $0xf8] sm:$0xff]  ;;  %v5207_v30 = vpack.c.bf16 %v416_v24, %v380_v22  ;;  %v348_v60 = vld [vmem:[#allocation2 + $0x690] sm:$0xff]  ;;  %v419_v62 = vld [vmem:[#allocation2 + $0x8c8] sm:$0xff] }
  0xdd   :  { %5136 = vmatpush1.bf16.msra.mxu1 %v5135_v34  ;;  %5122 = vmatprep.subr.bf16.mxu0 %v5121_v35  ;;  %v374_v34 = vld [vmem:[#allocation2 + $0x760] sm:$0xff]  ;;  %v205_v28 = vld [vmem:[#allocation2 + $0x218] sm:$0xff]  ;;  %v420_v10 = vld [vmem:[#allocation2 + $0x8d0] sm:$0xff] }
  0xde   :  { %5138 = vmatprep.subr.bf16.mxu1 %v5137_v39  ;;  %v410_v35 = vld [vmem:[#allocation2 + $0x880] sm:$0xff]  ;;  %v163_v39 = vld [vmem:[#allocation2 + $0xc8] sm:$0xff]  ;;  %v208_v22 = vld [vmem:[#allocation2 + $0x230] sm:$0xff] }
  0xdf   :  { %v5159_v43 = vpack.c.bf16 %v410_v35, %v374_v34  ;;  %v168_v34 = vld [vmem:[#allocation2 + $0xf0] sm:$0xff]  ;;  %v5225_v35 = vpack.c.bf16 %v205_v28, %v169_v27  ;;  %v207_v12 = vld [vmem:[#allocation2 + $0x228] sm:$0xff] }
  0xe0   :  { %5124 = vmatpush1.bf16.msra.mxu0 %v5123_v45  ;;  %v5177_v45 = vpack.c.bf16 %v199_v40, %v163_v39  ;;  %v241_v39 = vld [vmem:[#allocation2 + $0x338] sm:$0xff]  ;;  %v5227_v42 = vpack.c.bf16 %v204_v36, %v168_v34  ;;  %v279_v24 = vld [vmem:[#allocation2 + $0x468] sm:$0xff]  ;;  %v280_v34 = vld [vmem:[#allocation2 + $0x470] sm:$0xff] }
  0xe1   :  { %5140 = vmatpush1.bf16.msra.mxu1 %v5139_v46  ;;  %5126 = vmatprep.subr.bf16.mxu0 %v5125_v47  ;;  %v162_v46 = vld [vmem:[#allocation2 + $0xc0] sm:$0xff]  ;;  %v277_v40 = vld [vmem:[#allocation2 + $0x458] sm:$0xff]  ;;  %v351_v36 = vld [vmem:[#allocation2 + $0x6a8] sm:$0xff] }
  0xe2   :  { %5142 = vmatprep.subr.bf16.mxu1 %v5141_v51  ;;  %v198_v47 = vld [vmem:[#allocation2 + $0x1e0] sm:$0xff]  ;;  %v235_v51 = vld [vmem:[#allocation2 + $0x308] sm:$0xff] }
  0xe3   :  { %v5179_v55 = vpack.c.bf16 %v198_v47, %v162_v46  ;;  %v240_v46 = vld [vmem:[#allocation2 + $0x330] sm:$0xff]  ;;  %v5229_v47 = vpack.c.bf16 %v277_v40, %v241_v39 }
  0xe4   :  { %5128 = vmatpush1.bf16.msra.mxu0 %v5127_v57  ;;  %v5181_v57 = vpack.c.bf16 %v271_v52, %v235_v51  ;;  %v313_v51 = vld [vmem:[#allocation2 + $0x578] sm:$0xff]  ;;  %v5231_v54 = vpack.c.bf16 %v276_v48, %v240_v46  ;;  %v352_v46 = vld [vmem:[#allocation2 + $0x6b0] sm:$0xff]  ;;  %v423_v48 = vld [vmem:[#allocation2 + $0x8e8] sm:$0xff] }
  0xe5   :  { %5144 = vmatpush1.bf16.msra.mxu1 %v5143_v58  ;;  %5146 = vmatprep.subr.bf16.mxu0 %v5145_v59  ;;  %v234_v58 = vld [vmem:[#allocation2 + $0x300] sm:$0xff]  ;;  %v349_v52 = vld [vmem:[#allocation2 + $0x698] sm:$0xff] }
  0xe6   :  { %5162 = vmatprep.subr.bf16.mxu1 %v5161_v1  ;;  %v270_v59 = vld [vmem:[#allocation2 + $0x420] sm:$0xff]  ;;  %v307_v1 = vld [vmem:[#allocation2 + $0x548] sm:$0xff] }
  0xe7   :  { %4891 = vmatmul.mubr.msk.f32.vlgmr.msra.gmra.mrb[8].mxu0 %vm616_vm0, %v6904_v63  ;;  %v5183_v5 = vpack.c.bf16 %v270_v59, %v234_v58  ;;  %v312_v58 = vld [vmem:[#allocation2 + $0x570] sm:$0xff]  ;;  %v5233_v59 = vpack.c.bf16 %v349_v52, %v313_v51 }
  0xe8   :  { %4892 = vmatmul.mubr.msk.f32.vlgmr.msra.gmra.mrb[8].mxu1 %vm616_vm0, %v6904_v63  ;;  %5148 = vmatpush1.bf16.msra.mxu0 %v5147_v7  ;;  %v5185_v7 = vpack.c.bf16 %v343_v2, %v307_v1  ;;  %v385_v1 = vld [vmem:[#allocation2 + $0x7b8] sm:$0xff]  ;;  %v5235_v4 = vpack.c.bf16 %v348_v60, %v312_v58  ;;  %v6532_v60 = vld [vmem:[%s7261_s0] sm:$0xff] }
  0xe9   :  { %5164 = vmatpush1.bf16.msra.mxu1 %v5163_v8  ;;  %5150 = vmatprep.subr.bf16.mxu0 %v5149_v9  ;;  %v306_v8 = vld [vmem:[#allocation2 + $0x540] sm:$0xff]  ;;  %v421_v2 = vld [vmem:[#allocation2 + $0x8d8] sm:$0xff] }
  0xea   :  { %5166 = vmatprep.subr.bf16.mxu1 %v5165_v13  ;;  %1394 = vmatprep.mubr.f32.mxu0 %v6733_v0  ;;  %v342_v9 = vld [vmem:[#allocation2 + $0x660] sm:$0xff]  ;;  %v379_v13 = vld [vmem:[#allocation2 + $0x788] sm:$0xff] }
  0xeb   :  { %1465 = vmatprep.mubr.f32.mxu1 %v6733_v0  ;;  %v5187_v17 = vpack.c.bf16 %v342_v9, %v306_v8  ;;  %v384_v8 = vld [vmem:[#allocation2 + $0x7b0] sm:$0xff]  ;;  %v5237_v9 = vpack.c.bf16 %v421_v2, %v385_v1  ;;  %v1964_v1 = vld [vmem:[#allocation6 + $0x18] sm:$0xff] }
  0xec   :  { %5152 = vmatpush1.bf16.msra.mxu0 %v5151_v19  ;;  %v5189_v19 = vpack.c.bf16 %v415_v14, %v379_v13  ;;  %v173_v13 = vld [vmem:[#allocation2 + $0x118] sm:$0xff]  ;;  %v5239_v16 = vpack.c.bf16 %v420_v10, %v384_v8  ;;  %v1978_v10 = vld [vmem:[#allocation6 + $0x88] sm:$0xff] }
  0xed   :  { %5168 = vmatpush1.bf16.msra.mxu1 %v5167_v20  ;;  %5154 = vmatprep.subr.bf16.mxu0 %v5153_v21  ;;  %v378_v20 = vld [vmem:[#allocation2 + $0x780] sm:$0xff]  ;;  %v209_v14 = vld [vmem:[#allocation2 + $0x238] sm:$0xff] }
  0xee   :  { %5170 = vmatprep.subr.bf16.mxu1 %v5169_v25  ;;  %v414_v21 = vld [vmem:[#allocation2 + $0x8a0] sm:$0xff]  ;;  %v167_v25 = vld [vmem:[#allocation2 + $0xe8] sm:$0xff]  ;;  %v1963_v8 = vld [vmem:[#allocation6 + $0x10] sm:$0xff] }
  0xef   :  { %v5191_v29 = vpack.c.bf16 %v414_v21, %v378_v20  ;;  %v172_v20 = vld [vmem:[#allocation2 + $0x110] sm:$0xff]  ;;  %v5257_v21 = vpack.c.bf16 %v209_v14, %v173_v13  ;;  %v1980_v13 = vld [vmem:[#allocation6 + $0x98] sm:$0xff] }
  0xf0   :  { %5156 = vmatpush1.bf16.msra.mxu0 %v5155_v31  ;;  %v5209_v31 = vpack.c.bf16 %v203_v26, %v167_v25  ;;  %v245_v25 = vld [vmem:[#allocation2 + $0x358] sm:$0xff]  ;;  %v5259_v28 = vpack.c.bf16 %v208_v22, %v172_v20 }
  0xf1   :  { %5172 = vmatpush1.bf16.msra.mxu1 %v5171_v32  ;;  %5158 = vmatprep.subr.bf16.mxu0 %v5157_v33  ;;  %v166_v32 = vld [vmem:[#allocation2 + $0xe0] sm:$0xff]  ;;  %v281_v26 = vld [vmem:[#allocation2 + $0x478] sm:$0xff] }
  0xf2   :  { %5174 = vmatprep.subr.bf16.mxu1 %v5173_v37  ;;  %v202_v33 = vld [vmem:[#allocation2 + $0x200] sm:$0xff]  ;;  %v239_v37 = vld [vmem:[#allocation2 + $0x328] sm:$0xff] }
  0xf3   :  { %v5211_v41 = vpack.c.bf16 %v202_v33, %v166_v32  ;;  %v244_v32 = vld [vmem:[#allocation2 + $0x350] sm:$0xff]  ;;  %v5261_v33 = vpack.c.bf16 %v281_v26, %v245_v25  ;;  %v1988_v14 = vld [vmem:[#allocation6 + $0xd8] sm:$0xff] }
  0xf4   :  { %5160 = vmatpush1.bf16.msra.mxu0 %v5159_v43  ;;  %v5213_v43 = vpack.c.bf16 %v275_v38, %v239_v37  ;;  %v317_v37 = vld [vmem:[#allocation2 + $0x598] sm:$0xff]  ;;  %v5263_v40 = vpack.c.bf16 %v280_v34, %v244_v32 }
  0xf5   :  { %5176 = vmatpush1.bf16.msra.mxu1 %v5175_v44  ;;  %5178 = vmatprep.subr.bf16.mxu0 %v5177_v45  ;;  %v238_v44 = vld [vmem:[#allocation2 + $0x320] sm:$0xff]  ;;  %v353_v38 = vld [vmem:[#allocation2 + $0x6b8] sm:$0xff] }
  0xf6   :  { %5194 = vmatprep.subr.bf16.mxu1 %v5193_v49  ;;  %v274_v45 = vld [vmem:[#allocation2 + $0x440] sm:$0xff]  ;;  %v311_v49 = vld [vmem:[#allocation2 + $0x568] sm:$0xff]  ;;  %v1995_v32 = vld [vmem:[#allocation6 + $0x110] sm:$0xff] }
  0xf7   :  { %4893 = vmatmul.mubr.msk.f32.vlgmr.msra.gmra.mrb[10].mxu0 %vm616_vm0, %v6904_v63  ;;  %v5215_v53 = vpack.c.bf16 %v274_v45, %v238_v44  ;;  %v316_v44 = vld [vmem:[#allocation2 + $0x590] sm:$0xff]  ;;  %v5265_v45 = vpack.c.bf16 %v353_v38, %v317_v37  ;;  %v1996_v25 = vld [vmem:[#allocation6 + $0x118] sm:$0xff] }
  0xf8   :  { %4894 = vmatmul.mubr.msk.f32.vlgmr.msra.gmra.mrb[10].mxu1 %vm616_vm0, %v6904_v63  ;;  %5180 = vmatpush1.bf16.msra.mxu0 %v5179_v55  ;;  %v5217_v55 = vpack.c.bf16 %v347_v50, %v311_v49  ;;  %v389_v49 = vld [vmem:[#allocation2 + $0x7d8] sm:$0xff]  ;;  %v5267_v51 = vpack.c.bf16 %v352_v46, %v316_v44 }
  0xf9   :  { %5196 = vmatpush1.bf16.msra.mxu1 %v5195_v56  ;;  %5182 = vmatprep.subr.bf16.mxu0 %v5181_v57  ;;  %v310_v56 = vld [vmem:[#allocation2 + $0x560] sm:$0xff]  ;;  %v425_v50 = vld [vmem:[#allocation2 + $0x8f8] sm:$0xff] }
  0xfa   :  { %5198 = vmatprep.subr.bf16.mxu1 %v5197_v61  ;;  %1536 = vmatprep.mubr.f32.mxu0 %v6733_v0  ;;  %v346_v57 = vld [vmem:[#allocation2 + $0x680] sm:$0xff]  ;;  %v383_v61 = vld [vmem:[#allocation2 + $0x7a8] sm:$0xff]  ;;  %v2011_v44 = vld [vmem:[#allocation6 + $0x190] sm:$0xff] }
  0xfb   :  { %1607 = vmatprep.mubr.f32.mxu1 %v6733_v0  ;;  %v5219_v3 = vpack.c.bf16 %v346_v57, %v310_v56  ;;  %v388_v56 = vld [vmem:[#allocation2 + $0x7d0] sm:$0xff]  ;;  %v2012_v37 = vld [vmem:[#allocation6 + $0x198] sm:$0xff] }
  0xfc   :  { %5184 = vmatpush1.bf16.msra.mxu0 %v5183_v5  ;;  %v5221_v5 = vpack.c.bf16 %v419_v62, %v383_v61  ;;  %v424_v57 = vld [vmem:[#allocation2 + $0x8f0] sm:$0xff] }
  0xfd   :  { %5200 = vmatpush1.bf16.msra.mxu1 %v5199_v6  ;;  %5186 = vmatprep.subr.bf16.mxu0 %v5185_v7  ;;  %v382_v6 = vld [vmem:[#allocation2 + $0x7a0] sm:$0xff]  ;;  %v1962_v61 = vld [vmem:[#allocation6 + $0x8] sm:$0xff] }
  0xfe   :  { %5202 = vmatprep.subr.bf16.mxu1 %v5201_v11  ;;  %v418_v7 = vld [vmem:[#allocation2 + $0x8c0] sm:$0xff]  ;;  %v171_v11 = vld [vmem:[#allocation2 + $0x108] sm:$0xff] }
  0xff   :  { %v5223_v15 = vpack.c.bf16 %v418_v7, %v382_v6  ;;  %v1970_v62 = vld [vmem:[#allocation6 + $0x48] sm:$0xff] }
 0x100   :  { %5188 = vmatpush1.bf16.msra.mxu0 %v5187_v17  ;;  %v5241_v17 = vpack.c.bf16 %v207_v12, %v171_v11  ;;  %v5273_v2 = vpack.c.bf16 %v1970_v62, %v1962_v61  ;;  %v1986_v12 = vld [vmem:[#allocation6 + $0xc8] sm:$0xff]  ;;  %v2052_v61 = vld [vmem:[#allocation6 + $0x2d8] sm:$0xff] }
 0x101   :  { %5204 = vmatpush1.bf16.msra.mxu1 %v5203_v18  ;;  %5190 = vmatprep.subr.bf16.mxu0 %v5189_v19  ;;  %v170_v18 = vld [vmem:[#allocation2 + $0x100] sm:$0xff] }
 0x102   :  { %5206 = vmatprep.subr.bf16.mxu1 %v5205_v23  ;;  %v206_v19 = vld [vmem:[#allocation2 + $0x220] sm:$0xff]  ;;  %v243_v23 = vld [vmem:[#allocation2 + $0x348] sm:$0xff] }
 0x103   :  { %v5243_v27 = vpack.c.bf16 %v206_v19, %v170_v18  ;;  %v1985_v18 = vld [vmem:[#allocation6 + $0xc0] sm:$0xff]  ;;  %v1979_v19 = vld [vmem:[#allocation6 + $0x90] sm:$0xff] }
 0x104   :  { %5192 = vmatpush1.bf16.msra.mxu0 %v5191_v29  ;;  %v5245_v29 = vpack.c.bf16 %v279_v24, %v243_v23  ;;  %v1994_v23 = vld [vmem:[#allocation6 + $0x108] sm:$0xff] }
 0x105   :  { %5208 = vmatpush1.bf16.msra.mxu1 %v5207_v30  ;;  %5210 = vmatprep.subr.bf16.mxu0 %v5209_v31  ;;  %v242_v30 = vld [vmem:[#allocation2 + $0x340] sm:$0xff]  ;;  %v2002_v24 = vld [vmem:[#allocation6 + $0x148] sm:$0xff] }
 0x106   :  { %5226 = vmatprep.subr.bf16.mxu1 %v5225_v35  ;;  %v278_v31 = vld [vmem:[#allocation2 + $0x460] sm:$0xff]  ;;  %v315_v35 = vld [vmem:[#allocation2 + $0x588] sm:$0xff]  ;;  %v5281_v26 = vpack.c.bf16 %v2002_v24, %v1994_v23 }
 0x107   :  { %4895 = vmatmul.mubr.msk.f32.vlgmr.msra.gmra.mrb[12].mxu0 %vm616_vm0, %v6904_v63  ;;  %v5247_v39 = vpack.c.bf16 %v278_v31, %v242_v30  ;;  %v2084_v24 = vld [vmem:[#allocation6 + $0x3d8] sm:$0xff] }
 0x108   :  { %4896 = vmatmul.mubr.msk.f32.vlgmr.msra.gmra.mrb[12].mxu1 %vm616_vm0, %v6904_v63  ;;  %5212 = vmatpush1.bf16.msra.mxu0 %v5211_v41  ;;  %v5249_v41 = vpack.c.bf16 %v351_v36, %v315_v35  ;;  %v2010_v35 = vld [vmem:[#allocation6 + $0x188] sm:$0xff] }
 0x109   :  { %5228 = vmatpush1.bf16.msra.mxu1 %v5227_v42  ;;  %5214 = vmatprep.subr.bf16.mxu0 %v5213_v43  ;;  %v314_v42 = vld [vmem:[#allocation2 + $0x580] sm:$0xff]  ;;  %v2018_v36 = vld [vmem:[#allocation6 + $0x1c8] sm:$0xff] }
 0x10a   :  { %5230 = vmatprep.subr.bf16.mxu1 %v5229_v47  ;;  %1678 = vmatprep.mubr.f32.mxu0 %v6733_v0  ;;  %v350_v43 = vld [vmem:[#allocation2 + $0x6a0] sm:$0xff]  ;;  %v387_v47 = vld [vmem:[#allocation2 + $0x7c8] sm:$0xff]  ;;  %v5285_v38 = vpack.c.bf16 %v2018_v36, %v2010_v35 }
 0x10b   :  { %1749 = vmatprep.mubr.f32.mxu1 %v6733_v0  ;;  %v5253_v52 = vpack.c.bf16 %v423_v48, %v387_v47  ;;  %v2026_v47 = vld [vmem:[#allocation6 + $0x208] sm:$0xff]  ;;  %v2100_v35 = vld [vmem:[#allocation6 + $0x458] sm:$0xff] }
 0x10c   :  { %5216 = vmatpush1.bf16.msra.mxu0 %v5215_v53  ;;  %v386_v53 = vld [vmem:[#allocation2 + $0x7c0] sm:$0xff]  ;;  %v2034_v48 = vld [vmem:[#allocation6 + $0x248] sm:$0xff] }
 0x10d   :  { %5232 = vmatpush1.bf16.msra.mxu1 %v5231_v54  ;;  %5218 = vmatprep.subr.bf16.mxu0 %v5217_v55  ;;  %v422_v54 = vld [vmem:[#allocation2 + $0x8e0] sm:$0xff]  ;;  %v5269_v55 = vpack.c.bf16 %v425_v50, %v389_v49  ;;  %v5289_v50 = vpack.c.bf16 %v2034_v48, %v2026_v47 }
 0x10e   :  { %5234 = vmatprep.subr.bf16.mxu1 %v5233_v59  ;;  %v5255_v58 = vpack.c.bf16 %v422_v54, %v386_v53  ;;  %v5271_v59 = vpack.c.bf16 %v424_v57, %v388_v56  ;;  %v2028_v49 = vld [vmem:[#allocation6 + $0x218] sm:$0xff]  ;;  %v2035_v56 = vld [vmem:[#allocation6 + $0x250] sm:$0xff]  ;;  %v2042_v57 = vld [vmem:[#allocation6 + $0x288] sm:$0xff] }
 0x10f   :  { %v2108_v47 = vld [vmem:[#allocation6 + $0x498] sm:$0xff] }
 0x110   :  { %5220 = vmatpush1.bf16.msra.mxu0 %v5219_v3  ;;  %v1972_v3 = vld [vmem:[#allocation6 + $0x58] sm:$0xff] }
 0x111   :  { %5236 = vmatpush1.bf16.msra.mxu1 %v5235_v4  ;;  %5222 = vmatprep.subr.bf16.mxu0 %v5221_v5  ;;  %v1961_v4 = vld [vmem:[#allocation6] sm:$0xff]  ;;  %v5561_v6 = vpack.c.bf16 %v1972_v3, %v1964_v1  ;;  %v2116_v48 = vld [vmem:[#allocation6 + $0x4d8] sm:$0xff] }
 0x112   :  { %5238 = vmatprep.subr.bf16.mxu1 %v5237_v9  ;;  %v1969_v5 = vld [vmem:[#allocation6 + $0x40] sm:$0xff]  ;;  %v1971_v9 = vld [vmem:[#allocation6 + $0x50] sm:$0xff] }
 0x113   :  { %v5275_v7 = vpack.c.bf16 %v1969_v5, %v1961_v4  ;;  %v5563_v11 = vpack.c.bf16 %v1971_v9, %v1963_v8  ;;  %v2049_v3 = vld [vmem:[#allocation6 + $0x2c0] sm:$0xff]  ;;  %v2043_v4 = vld [vmem:[#allocation6 + $0x290] sm:$0xff]  ;;  %v2058_v8 = vld [vmem:[#allocation6 + $0x308] sm:$0xff] }
 0x114   :  { %5224 = vmatpush1.bf16.msra.mxu0 %v5223_v15  ;;  %v5277_v15 = vpack.c.bf16 %v1986_v12, %v1978_v10  ;;  %v2066_v9 = vld [vmem:[#allocation6 + $0x348] sm:$0xff]  ;;  %v2060_v10 = vld [vmem:[#allocation6 + $0x318] sm:$0xff] }
 0x115   :  { %5240 = vmatpush1.bf16.msra.mxu1 %v5239_v16  ;;  %5242 = vmatprep.subr.bf16.mxu0 %v5241_v17  ;;  %v5565_v16 = vpack.c.bf16 %v1988_v14, %v1980_v13  ;;  %v1977_v17 = vld [vmem:[#allocation6 + $0x80] sm:$0xff]  ;;  %v2068_v12 = vld [vmem:[#allocation6 + $0x358] sm:$0xff] }
 0x116   :  { %5258 = vmatprep.subr.bf16.mxu1 %v5257_v21  ;;  %v5279_v20 = vpack.c.bf16 %v1985_v18, %v1977_v17  ;;  %v1987_v21 = vld [vmem:[#allocation6 + $0xd0] sm:$0xff]  ;;  %v2057_v13 = vld [vmem:[#allocation6 + $0x300] sm:$0xff] }
 0x117   :  { %4897 = vmatmul.mubr.msk.f32.vlgmr.msra.gmra.mrb[14].mxu0 %vm616_vm0, %v6904_v63  ;;  %v5567_v22 = vpack.c.bf16 %v1987_v21, %v1979_v19  ;;  %v2065_v14 = vld [vmem:[#allocation6 + $0x340] sm:$0xff]  ;;  %v2059_v17 = vld [vmem:[#allocation6 + $0x310] sm:$0xff]  ;;  %v2082_v21 = vld [vmem:[#allocation6 + $0x3c8] sm:$0xff] }
 0x118   :  { %4898 = vmatmul.mubr.msk.f32.vlgmr.msra.gmra.mrb[14].mxu1 %vm616_vm0, %v6904_v63  ;;  %5244 = vmatpush1.bf16.msra.mxu0 %v5243_v27  ;;  %v5251_v63 = vpack.c.bf16 %v350_v43, %v314_v42  ;;  %v2004_v27 = vld [vmem:[#allocation6 + $0x158] sm:$0xff]  ;;  %v2067_v18 = vld [vmem:[#allocation6 + $0x350] sm:$0xff] }
 0x119   :  { %5260 = vmatpush1.bf16.msra.mxu1 %v5259_v28  ;;  %5246 = vmatprep.subr.bf16.mxu0 %v5245_v29  ;;  %v1993_v28 = vld [vmem:[#allocation6 + $0x100] sm:$0xff]  ;;  %v5569_v30 = vpack.c.bf16 %v2004_v27, %v1996_v25  ;;  %v5587_v19 = vpack.c.bf16 %v2067_v18, %v2059_v17  ;;  %v2154_v17 = vld [vmem:[#allocation6 + $0x608] sm:$0xff] }
 0x11a   :  { %5262 = vmatprep.subr.bf16.mxu1 %v5261_v33  ;;  %1820 = vmatprep.mubr.f32.mxu0 %v6733_v0  ;;  %v2001_v29 = vld [vmem:[#allocation6 + $0x140] sm:$0xff]  ;;  %v2003_v33 = vld [vmem:[#allocation6 + $0x150] sm:$0xff]  ;;  %v2162_v18 = vld [vmem:[#allocation6 + $0x648] sm:$0xff] }
 0x11b   :  { %1891 = vmatprep.mubr.f32.mxu1 %v6733_v0  ;;  %v5283_v31 = vpack.c.bf16 %v2001_v29, %v1993_v28  ;;  %v5571_v34 = vpack.c.bf16 %v2003_v33, %v1995_v32  ;;  %v2073_v25 = vld [vmem:[#allocation6 + $0x380] sm:$0xff]  ;;  %v2075_v29 = vld [vmem:[#allocation6 + $0x390] sm:$0xff]  ;;  %v2098_v33 = vld [vmem:[#allocation6 + $0x448] sm:$0xff] }
 0x11c   :  { %5248 = vmatpush1.bf16.msra.mxu0 %v5247_v39  ;;  %v2020_v39 = vld [vmem:[#allocation6 + $0x1d8] sm:$0xff] }
 0x11d   :  { %5264 = vmatpush1.bf16.msra.mxu1 %v5263_v40  ;;  %5250 = vmatprep.subr.bf16.mxu0 %v5249_v41  ;;  %v2009_v40 = vld [vmem:[#allocation6 + $0x180] sm:$0xff]  ;;  %v5573_v42 = vpack.c.bf16 %v2020_v39, %v2012_v37 }
 0x11e   :  { %5266 = vmatprep.subr.bf16.mxu1 %v5265_v45  ;;  %v2017_v41 = vld [vmem:[#allocation6 + $0x1c0] sm:$0xff]  ;;  %v2019_v45 = vld [vmem:[#allocation6 + $0x1d0] sm:$0xff] }
 0x11f   :  { %v5287_v43 = vpack.c.bf16 %v2017_v41, %v2009_v40  ;;  %v5575_v46 = vpack.c.bf16 %v2019_v45, %v2011_v44  ;;  %v2097_v39 = vld [vmem:[#allocation6 + $0x440] sm:$0xff]  ;;  %v2091_v40 = vld [vmem:[#allocation6 + $0x410] sm:$0xff]  ;;  %v2114_v44 = vld [vmem:[#allocation6 + $0x4c8] sm:$0xff] }
 0x120   :  { %5252 = vmatpush1.bf16.msra.mxu0 %v5251_v63  ;;  %v2036_v63 = vld [vmem:[#allocation6 + $0x258] sm:$0xff] }
 0x121   :  { %5268 = vmatpush1.bf16.msra.mxu1 %v5267_v51  ;;  %5254 = vmatprep.subr.bf16.mxu0 %v5253_v52  ;;  %v2025_v51 = vld [vmem:[#allocation6 + $0x200] sm:$0xff]  ;;  %v5577_v53 = vpack.c.bf16 %v2036_v63, %v2028_v49 }
 0x122   :  { %5270 = vmatprep.subr.bf16.mxu1 %v5269_v55  ;;  %v2033_v52 = vld [vmem:[#allocation6 + $0x240] sm:$0xff]  ;;  %v2027_v55 = vld [vmem:[#allocation6 + $0x210] sm:$0xff] }
 0x123   :  { %v5291_v54 = vpack.c.bf16 %v2033_v52, %v2025_v51  ;;  %v2105_v49 = vld [vmem:[#allocation6 + $0x480] sm:$0xff]  ;;  %v2107_v51 = vld [vmem:[#allocation6 + $0x490] sm:$0xff] }
 0x124   :  { %5256 = vmatpush1.bf16.msra.mxu0 %v5255_v58  ;;  %v5579_v58 = vpack.c.bf16 %v2035_v56, %v2027_v55  ;;  %v2113_v63 = vld [vmem:[#allocation6 + $0x4c0] sm:$0xff]  ;;  %v2115_v52 = vld [vmem:[#allocation6 + $0x4d0] sm:$0xff]  ;;  %v2122_v55 = vld [vmem:[#allocation6 + $0x508] sm:$0xff] }
 0x125   :  { %5272 = vmatpush1.bf16.msra.mxu1 %v5271_v59  ;;  %5274 = vmatprep.subr.bf16.mxu0 %v5273_v2  ;;  %v2050_v59 = vld [vmem:[#allocation6 + $0x2c8] sm:$0xff]  ;;  %v2041_v2 = vld [vmem:[#allocation6 + $0x280] sm:$0xff] }
 0x126   :  { %5562 = vmatprep.subr.bf16.mxu1 %v5561_v6  ;;  %v5293_v62 = vpack.c.bf16 %v2050_v59, %v2042_v57  ;;  %v5295_v5 = vpack.c.bf16 %v2049_v3, %v2041_v2  ;;  %v2051_v6 = vld [vmem:[#allocation6 + $0x2d0] sm:$0xff]  ;;  %v2130_v56 = vld [vmem:[#allocation6 + $0x548] sm:$0xff]  ;;  %v2124_v57 = vld [vmem:[#allocation6 + $0x518] sm:$0xff] }
 0x127   :  { %4899 = vmatmul.mubr.msk.f32.vlgmr.msra.gmra.mrb[16].mxu0 %vm616_vm0, %v6532_v60  ;;  %v2132_v59 = vld [vmem:[#allocation6 + $0x558] sm:$0xff]  ;;  %v2123_v2 = vld [vmem:[#allocation6 + $0x510] sm:$0xff] }
 0x128   :  { %4900 = vmatmul.mubr.msk.f32.vlgmr.msra.gmra.mrb[16].mxu1 %vm616_vm0, %v6532_v60  ;;  %5276 = vmatpush1.bf16.msra.mxu0 %v5275_v7  ;;  %v2044_v60 = vld [vmem:[#allocation6 + $0x298] sm:$0xff]  ;;  %v5583_v7 = vpack.c.bf16 %v2051_v6, %v2043_v4  ;;  %v2131_v3 = vld [vmem:[#allocation6 + $0x550] sm:$0xff]  ;;  %v2146_v6 = vld [vmem:[#allocation6 + $0x5c8] sm:$0xff] }
 0x129   :  { %5564 = vmatpush1.bf16.msra.mxu1 %v5563_v11  ;;  %5278 = vmatprep.subr.bf16.mxu0 %v5277_v15  ;;  %v5581_v1 = vpack.c.bf16 %v2052_v61, %v2044_v60  ;;  %v5297_v11 = vpack.c.bf16 %v2066_v9, %v2058_v8  ;;  %v5585_v15 = vpack.c.bf16 %v2068_v12, %v2060_v10  ;;  %v2121_v60 = vld [vmem:[#allocation6 + $0x500] sm:$0xff]  ;;  %v2148_v9 = vld [vmem:[#allocation6 + $0x5d8] sm:$0xff] }
 0x12a   :  { %5566 = vmatprep.subr.bf16.mxu1 %v5565_v16  ;;  %v5299_v16 = vpack.c.bf16 %v2065_v14, %v2057_v13  ;;  %v2129_v61 = vld [vmem:[#allocation6 + $0x540] sm:$0xff]  ;;  %v5603_v4 = vpack.c.bf16 %v2131_v3, %v2123_v2  ;;  %v2139_v14 = vld [vmem:[#allocation6 + $0x590] sm:$0xff]  ;;  %v2218_v3 = vld [vmem:[#allocation6 + $0x808] sm:$0xff] }
 0x12b   :  { %v2137_v10 = vld [vmem:[#allocation6 + $0x580] sm:$0xff] }
 0x12c   :  { %5280 = vmatpush1.bf16.msra.mxu0 %v5279_v20  ;;  %v2074_v20 = vld [vmem:[#allocation6 + $0x388] sm:$0xff] }
 0x12d   :  { %5568 = vmatpush1.bf16.msra.mxu1 %v5567_v22  ;;  %5282 = vmatprep.subr.bf16.mxu0 %v5281_v26  ;;  %v2076_v22 = vld [vmem:[#allocation6 + $0x398] sm:$0xff]  ;;  %v5301_v23 = vpack.c.bf16 %v2082_v21, %v2074_v20  ;;  %v2081_v26 = vld [vmem:[#allocation6 + $0x3c0] sm:$0xff]  ;;  %v5321_v20 = vpack.c.bf16 %v2162_v18, %v2154_v17 }
 0x12e   :  { %5570 = vmatprep.subr.bf16.mxu1 %v5569_v30  ;;  %v5589_v27 = vpack.c.bf16 %v2084_v24, %v2076_v22  ;;  %v5303_v28 = vpack.c.bf16 %v2081_v26, %v2073_v25  ;;  %v2083_v30 = vld [vmem:[#allocation6 + $0x3d0] sm:$0xff]  ;;  %v2164_v21 = vld [vmem:[#allocation6 + $0x658] sm:$0xff]  ;;  %v2153_v22 = vld [vmem:[#allocation6 + $0x600] sm:$0xff] }
 0x12f   :  { %v5591_v32 = vpack.c.bf16 %v2083_v30, %v2075_v29  ;;  %v2155_v26 = vld [vmem:[#allocation6 + $0x610] sm:$0xff]  ;;  %v2178_v30 = vld [vmem:[#allocation6 + $0x6c8] sm:$0xff] }
 0x130   :  { %5284 = vmatpush1.bf16.msra.mxu0 %v5283_v31  ;;  %v2090_v31 = vld [vmem:[#allocation6 + $0x408] sm:$0xff] }
 0x131   :  { %5572 = vmatpush1.bf16.msra.mxu1 %v5571_v34  ;;  %5286 = vmatprep.subr.bf16.mxu0 %v5285_v38  ;;  %v2092_v34 = vld [vmem:[#allocation6 + $0x418] sm:$0xff]  ;;  %v5305_v36 = vpack.c.bf16 %v2098_v33, %v2090_v31  ;;  %v2089_v38 = vld [vmem:[#allocation6 + $0x400] sm:$0xff] }
 0x132   :  { %5574 = vmatprep.subr.bf16.mxu1 %v5573_v42  ;;  %v5593_v37 = vpack.c.bf16 %v2100_v35, %v2092_v34  ;;  %v5307_v41 = vpack.c.bf16 %v2097_v39, %v2089_v38  ;;  %v2099_v42 = vld [vmem:[#allocation6 + $0x450] sm:$0xff]  ;;  %v2172_v31 = vld [vmem:[#allocation6 + $0x698] sm:$0xff]  ;;  %v2169_v35 = vld [vmem:[#allocation6 + $0x680] sm:$0xff] }
 0x133   :  { %v5595_v45 = vpack.c.bf16 %v2099_v42, %v2091_v40  ;;  %v2179_v39 = vld [vmem:[#allocation6 + $0x6d0] sm:$0xff]  ;;  %v2194_v42 = vld [vmem:[#allocation6 + $0x748] sm:$0xff] }
 0x134   :  { %5288 = vmatpush1.bf16.msra.mxu0 %v5287_v43  ;;  %v2106_v43 = vld [vmem:[#allocation6 + $0x488] sm:$0xff] }
 0x135   :  { %5576 = vmatpush1.bf16.msra.mxu1 %v5575_v46  ;;  %5290 = vmatprep.subr.bf16.mxu0 %v5289_v50  ;;  %v5309_v46 = vpack.c.bf16 %v2114_v44, %v2106_v43  ;;  %v5597_v50 = vpack.c.bf16 %v2116_v48, %v2108_v47  ;;  %v2188_v43 = vld [vmem:[#allocation6 + $0x718] sm:$0xff]  ;;  %v2193_v47 = vld [vmem:[#allocation6 + $0x740] sm:$0xff] }
 0x136   :  { %5578 = vmatprep.subr.bf16.mxu1 %v5577_v53  ;;  %v5311_v53 = vpack.c.bf16 %v2113_v63, %v2105_v49  ;;  %v2195_v63 = vld [vmem:[#allocation6 + $0x750] sm:$0xff] }
 0x138   :  { %5292 = vmatpush1.bf16.msra.mxu0 %v5291_v54  ;;  %v5599_v54 = vpack.c.bf16 %v2115_v52, %v2107_v51  ;;  %v2202_v52 = vld [vmem:[#allocation6 + $0x788] sm:$0xff] }
 0x139   :  { %5580 = vmatpush1.bf16.msra.mxu1 %v5579_v58  ;;  %5294 = vmatprep.subr.bf16.mxu0 %v5293_v62  ;;  %v5313_v58 = vpack.c.bf16 %v2130_v56, %v2122_v55  ;;  %v5601_v62 = vpack.c.bf16 %v2132_v59, %v2124_v57  ;;  %v436_v55 = vlaneseq  ;;  %v2212_v57 = vld [vmem:[#allocation6 + $0x7d8] sm:$0xff]  ;;  %v2209_v59 = vld [vmem:[#allocation6 + $0x7c0] sm:$0xff] }
 0x13a   :  { %5582 = vmatprep.subr.bf16.mxu1 %v5581_v1  ;;  %v5315_v1 = vpack.c.bf16 %v2129_v61, %v2121_v60 }
 0x13c   :  { %5296 = vmatpush1.bf16.msra.mxu0 %v5295_v5  ;;  %v2138_v5 = vld [vmem:[#allocation6 + $0x588] sm:$0xff] }
 0x13d   :  { %5584 = vmatpush1.bf16.msra.mxu1 %v5583_v7  ;;  %5298 = vmatprep.subr.bf16.mxu0 %v5297_v11  ;;  %v2140_v7 = vld [vmem:[#allocation6 + $0x598] sm:$0xff]  ;;  %v5317_v8 = vpack.c.bf16 %v2146_v6, %v2138_v5  ;;  %v2145_v11 = vld [vmem:[#allocation6 + $0x5c0] sm:$0xff]  ;;  %v437_v6 = vshrl.u32 %v436_v55, 7 }
 0x13e   :  { %5586 = vmatprep.subr.bf16.mxu1 %v5585_v15  ;;  %v5605_v12 = vpack.c.bf16 %v2148_v9, %v2140_v7  ;;  %v5319_v13 = vpack.c.bf16 %v2145_v11, %v2137_v10  ;;  %v2147_v15 = vld [vmem:[#allocation6 + $0x5d0] sm:$0xff]  ;;  %v2220_v5 = vld [vmem:[#allocation6 + $0x818] sm:$0xff] }
 0x13f   :  { %v6959_v10 = vsub.s32 2, %v437_v6  ;;  %v426_v11 = vld [vmem:[#allocation4] sm:$0xff]  ;;  %v6962_v18 = vsub.s32 4, %v437_v6 }
 0x140   :  { %5300 = vmatpush1.bf16.msra.mxu0 %v5299_v16  ;;  %v5607_v16 = vpack.c.bf16 %v2147_v15, %v2139_v14 }
 0x141   :  { %5588 = vmatpush1.bf16.msra.mxu1 %v5587_v19  ;;  %5302 = vmatprep.subr.bf16.mxu0 %v5301_v23  ;;  %v2156_v19 = vld [vmem:[#allocation6 + $0x618] sm:$0xff]  ;;  %v2161_v23 = vld [vmem:[#allocation6 + $0x640] sm:$0xff] }
 0x142   :  { %5590 = vmatprep.subr.bf16.mxu1 %v5589_v27  ;;  %v5609_v24 = vpack.c.bf16 %v2164_v21, %v2156_v19  ;;  %v5323_v25 = vpack.c.bf16 %v2161_v23, %v2153_v22  ;;  %v2163_v27 = vld [vmem:[#allocation6 + $0x650] sm:$0xff]  ;;  %v6964_v19 = vsub.s32 5, %v437_v6  ;;  %v6968_v21 = vsub.s32 7, %v437_v6 }
 0x143   :  { %v5611_v29 = vpack.c.bf16 %v2163_v27, %v2155_v26  ;;  %v455_v22 = vrot.slane %v426_v11, %v6962_v18 }
 0x144   :  { %5304 = vmatpush1.bf16.msra.mxu0 %v5303_v28  ;;  %v2170_v28 = vld [vmem:[#allocation6 + $0x688] sm:$0xff]  ;;  %v459_v23 = vrot.slane %v426_v11, %v6964_v19 }
 0x145   :  { %5592 = vmatpush1.bf16.msra.mxu1 %v5591_v32  ;;  %5306 = vmatprep.subr.bf16.mxu0 %v5305_v36  ;;  %v2180_v32 = vld [vmem:[#allocation6 + $0x6d8] sm:$0xff]  ;;  %v5325_v33 = vpack.c.bf16 %v2178_v30, %v2170_v28  ;;  %v2177_v36 = vld [vmem:[#allocation6 + $0x6c0] sm:$0xff] }
 0x146   :  { %5594 = vmatprep.subr.bf16.mxu1 %v5593_v37  ;;  %v5613_v34 = vpack.c.bf16 %v2180_v32, %v2172_v31  ;;  %v2171_v37 = vld [vmem:[#allocation6 + $0x690] sm:$0xff]  ;;  %v5327_v38 = vpack.c.bf16 %v2177_v36, %v2169_v35  ;;  %v6978_v35 = vsub.s32 1, %v437_v6  ;;  %v427_v36 = vld [vmem:[#allocation4 + $0x8] sm:$0xff] }
 0x147   :  { %v5615_v40 = vpack.c.bf16 %v2179_v39, %v2171_v37  ;;  %v6982_v39 = vsub.s32 3, %v437_v6 }
 0x148   :  { %5308 = vmatpush1.bf16.msra.mxu0 %v5307_v41  ;;  %v2186_v41 = vld [vmem:[#allocation6 + $0x708] sm:$0xff] }
 0x149   :  { %5596 = vmatpush1.bf16.msra.mxu1 %v5595_v45  ;;  %5310 = vmatprep.subr.bf16.mxu0 %v5309_v46  ;;  %v5329_v44 = vpack.c.bf16 %v2194_v42, %v2186_v41  ;;  %v2196_v45 = vld [vmem:[#allocation6 + $0x758] sm:$0xff]  ;;  %v2185_v46 = vld [vmem:[#allocation6 + $0x700] sm:$0xff]  ;;  %v479_v41 = vrot.slane %v427_v36, %v6959_v10  ;;  %v475_v42 = vrot.slane %v427_v36, %v6978_v35 }
 0x14a   :  { %5598 = vmatprep.subr.bf16.mxu1 %v5597_v50  ;;  %v5617_v48 = vpack.c.bf16 %v2196_v45, %v2188_v43  ;;  %v5331_v49 = vpack.c.bf16 %v2193_v47, %v2185_v46  ;;  %v2187_v50 = vld [vmem:[#allocation6 + $0x710] sm:$0xff]  ;;  %v483_v43 = vrot.slane %v427_v36, %v6982_v39 }
 0x14b   :  { %v5619_v51 = vpack.c.bf16 %v2195_v63, %v2187_v50 }
 0x14c   :  { %5312 = vmatpush1.bf16.msra.mxu0 %v5311_v53  ;;  %v2210_v53 = vld [vmem:[#allocation6 + $0x7c8] sm:$0xff] }
 0x14d   :  { %5600 = vmatpush1.bf16.msra.mxu1 %v5599_v54  ;;  %5314 = vmatprep.subr.bf16.mxu0 %v5313_v58  ;;  %v2204_v54 = vld [vmem:[#allocation6 + $0x798] sm:$0xff]  ;;  %v5333_v56 = vpack.c.bf16 %v2210_v53, %v2202_v52  ;;  %v2201_v58 = vld [vmem:[#allocation6 + $0x780] sm:$0xff] }
 0x14e   :  { %5602 = vmatprep.subr.bf16.mxu1 %v5601_v62  ;;  %v5621_v60 = vpack.c.bf16 %v2212_v57, %v2204_v54  ;;  %v5335_v61 = vpack.c.bf16 %v2209_v59, %v2201_v58  ;;  %v2203_v62 = vld [vmem:[#allocation6 + $0x790] sm:$0xff] }
 0x150   :  { %5316 = vmatpush1.bf16.msra.mxu0 %v5315_v1  ;;  %v2211_v1 = vld [vmem:[#allocation6 + $0x7d0] sm:$0xff] }
 0x151   :  { %5604 = vmatpush1.bf16.msra.mxu1 %v5603_v4  ;;  %5318 = vmatprep.subr.bf16.mxu0 %v5317_v8  ;;  %v5623_v2 = vpack.c.bf16 %v2211_v1, %v2203_v62  ;;  %v2226_v4 = vld [vmem:[#allocation6 + $0x848] sm:$0xff]  ;;  %v2228_v8 = vld [vmem:[#allocation6 + $0x858] sm:$0xff]  ;;  %v451_v62 = vrot.slane %v426_v11, %v6982_v39  ;;  %v487_v1 = vrot.slane %v427_v36, %v6962_v18 }
 0x152   :  { %5606 = vmatprep.subr.bf16.mxu1 %v5605_v12  ;;  %v5337_v7 = vpack.c.bf16 %v2226_v4, %v2218_v3  ;;  %v5625_v9 = vpack.c.bf16 %v2228_v8, %v2220_v5  ;;  %v447_v12 = vrot.slane %v426_v11, %v6959_v10  ;;  %v491_v3 = vrot.slane %v427_v36, %v6964_v19 }
 0x153   :  { %v499_v5 = vrot.slane %v427_v36, %v6968_v21 }
 0x154   :  { %5320 = vmatpush1.bf16.msra.mxu0 %v5319_v13 }
 0x155   :  { %5608 = vmatpush1.bf16.msra.mxu1 %v5607_v16  ;;  %5322 = vmatprep.subr.bf16.mxu0 %v5321_v20  ;;  %v6966_v20 = vsub.s32 6, %v437_v6 }
 0x156   :  { %5610 = vmatprep.subr.bf16.mxu1 %v5609_v24 }
 0x157   :  { %v463_v24 = vrot.slane %v426_v11, %v6966_v20 }
 0x158   :  { %5324 = vmatpush1.bf16.msra.mxu0 %v5323_v25  ;;  %v467_v25 = vrot.slane %v426_v11, %v6968_v21 }
 0x159   :  { %5612 = vmatpush1.bf16.msra.mxu1 %v5611_v29  ;;  %5326 = vmatprep.subr.bf16.mxu0 %v5325_v33 }
 0x15a   :  { %5614 = vmatprep.subr.bf16.mxu1 %v5613_v34  ;;  %v6976_v34 = vsub.s32 0, %v437_v6 }
 0x15c   :  { %5328 = vmatpush1.bf16.msra.mxu0 %v5327_v38  ;;  %v439_v37 = vrot.slane %v426_v11, %v6976_v34  ;;  %v443_v38 = vrot.slane %v426_v11, %v6978_v35 }
 0x15d   :  { %5616 = vmatpush1.bf16.msra.mxu1 %v5615_v40  ;;  %5330 = vmatprep.subr.bf16.mxu0 %v5329_v44  ;;  %v471_v40 = vrot.slane %v427_v36, %v6976_v34 }
 0x15e   :  { %5618 = vmatprep.subr.bf16.mxu1 %v5617_v48 }
 0x160   :  { %5332 = vmatpush1.bf16.msra.mxu0 %v5331_v49 }
 0x161   :  { %5620 = vmatpush1.bf16.msra.mxu1 %v5619_v51  ;;  %5334 = vmatprep.subr.bf16.mxu0 %v5333_v56 }
 0x162   :  { %5622 = vmatprep.subr.bf16.mxu1 %v5621_v60 }
 0x164   :  { %5336 = vmatpush1.bf16.msra.mxu0 %v5335_v61 }
 0x165   :  { %5624 = vmatpush1.bf16.msra.mxu1 %v5623_v2  ;;  %5338 = vmatprep.subr.bf16.mxu0 %v5337_v7  ;;  %v495_v2 = vrot.slane %v427_v36, %v6966_v20 }
 0x166   :  { %5626 = vmatprep.subr.bf16.mxu1 %v5625_v9 }
 0x17a   :  { %v686_v13 = vpop.f32.mrb[0].mxu0 }
 0x17b   :  { %v688_v14 = vpop.f32.mrb[1].mxu0  ;;  %v757_v15 = vpop.f32.mrb[0].mxu1  ;;  %v687_v44 = vadd.f32 %v686_v13, %v439_v37  ;;  %v428_v37 = vld [vmem:[#allocation4 + $0x10] sm:$0xff] }
 0x17c   :  { %v758_v16 = vadd.f32 %v757_v15, %v447_v12  ;;  %v759_v17 = vpop.f32.mrb[1].mxu1  ;;  %v689_v45 = vadd.f32 %v688_v14, %v443_v38  ;;  %v503_v38 = vrot.slane %v428_v37, %v6976_v34 }
 0x17d   :  { %v1898_v53 = vmax.f32 %v687_v44, 0.0  ;;  %v760_v4 = vadd.f32 %v759_v17, %v451_v62  ;;  %v511_v62 = vrot.slane %v428_v37, %v6959_v10 }
 0x17e   :  { %v1899_v54 = vmax.f32 %v689_v45, 0.0  ;;  %v1900_v57 = vmax.f32 %v758_v16, 0.0 }
 0x17f   :  { %v1901_v15 = vmax.f32 %v760_v4, 0.0 }
 0x18a   :  { %v828_v26 = vpop.f32.mrb[2].mxu0 }
 0x18b   :  { %v829_v27 = vadd.f32 %v828_v26, %v455_v22  ;;  %v830_v28 = vpop.f32.mrb[3].mxu0  ;;  %v899_v29 = vpop.f32.mrb[2].mxu1 }
 0x18c   :  { %v831_v30 = vadd.f32 %v830_v28, %v459_v23  ;;  %v900_v31 = vadd.f32 %v899_v29, %v463_v24  ;;  %v901_v32 = vpop.f32.mrb[3].mxu1 }
 0x18d   :  { %v6974_v33 = vadd.f32 %v901_v32, %v467_v25  ;;  %v1902_v11 = vmax.f32 %v829_v27, 0.0 }
 0x18e   :  { %v1903_v23 = vmax.f32 %v831_v30, 0.0  ;;  %v1904_v26 = vmax.f32 %v900_v31, 0.0 }
 0x18f   :  { %v1905_v44 = vmax.f32 %v6974_v33, 0.0 }
 0x19a   :  { %v970_v46 = vpop.f32.mrb[4].mxu0 }
 0x19b   :  { %v971_v47 = vadd.f32 %v970_v46, %v471_v40  ;;  %v1041_v48 = vpop.f32.mrb[4].mxu1  ;;  %v972_v49 = vpop.f32.mrb[5].mxu0  ;;  %v507_v40 = vrot.slane %v428_v37, %v6978_v35 }
 0x19c   :  { %v1042_v50 = vadd.f32 %v1041_v48, %v479_v41  ;;  %v973_v63 = vadd.f32 %v972_v49, %v475_v42  ;;  %v1043_v51 = vpop.f32.mrb[5].mxu1 }
 0x19d   :  { %v1044_v52 = vadd.f32 %v1043_v51, %v483_v43  ;;  %v1906_v46 = vmax.f32 %v971_v47, 0.0  ;;  %v527_v51 = vrot.slane %v428_v37, %v6966_v20  ;;  %v429_v47 = vld [vmem:[#allocation4 + $0x18] sm:$0xff] }
 0x19e   :  { %v1908_v55 = vmax.f32 %v1042_v50, 0.0  ;;  %v1907_v56 = vmax.f32 %v973_v63, 0.0  ;;  %v519_v63 = vrot.slane %v428_v37, %v6962_v18  ;;  %v547_v4 = vrot.slane %v429_v47, %v6982_v39 }
 0x19f   :  { %v1909_v58 = vmax.f32 %v1044_v52, 0.0  ;;  %v531_v52 = vrot.slane %v428_v37, %v6968_v21 }
 0x1a0   :  { %v6988_v59 = vmax.f32 %v1899_v54, %v1908_v55  ;;  %v6990_v60 = vmax.f32 %v1898_v53, %v1907_v56 }
 0x1a1   :  { %v6992_v61 = vmax.f32 %v1900_v57, %v1909_v58 }
 0x1aa   :  { %v1112_v6 = vpop.f32.mrb[6].mxu0 }
 0x1ab   :  { %v1113_v7 = vadd.f32 %v1112_v6, %v487_v1  ;;  %v1183_v8 = vpop.f32.mrb[6].mxu1  ;;  %v1114_v9 = vpop.f32.mrb[7].mxu0  ;;  %v535_v1 = vrot.slane %v429_v47, %v6976_v34 }
 0x1ac   :  { %v1184_v12 = vadd.f32 %v1183_v8, %v495_v2  ;;  %v1115_v13 = vadd.f32 %v1114_v9, %v491_v3  ;;  %v1185_v14 = vpop.f32.mrb[7].mxu1  ;;  %v543_v2 = vrot.slane %v429_v47, %v6959_v10  ;;  %v539_v3 = vrot.slane %v429_v47, %v6978_v35 }
 0x1ad   :  { %v1910_v16 = vmax.f32 %v1113_v7, 0.0  ;;  %v1186_v22 = vadd.f32 %v1185_v14, %v499_v5 }
 0x1ae   :  { %v1912_v24 = vmax.f32 %v1184_v12, 0.0  ;;  %v1911_v25 = vmax.f32 %v1115_v13, 0.0 }
 0x1af   :  { %v6999_v28 = vmax.f32 %v1901_v15, %v1910_v16  ;;  %v1913_v17 = vmax.f32 %v1186_v22, 0.0 }
 0x1b0   :  { %v7001_v29 = vmax.f32 %v1903_v23, %v1912_v24  ;;  %v7003_v32 = vmax.f32 %v1902_v11, %v1911_v25  ;;  %v515_v24 = vrot.slane %v428_v37, %v6982_v39  ;;  %v523_v25 = vrot.slane %v428_v37, %v6964_v19 }
 0x1b1   :  { %v7005_v36 = vmax.f32 %v1904_v26, %v1913_v17  ;;  %v551_v26 = vrot.slane %v429_v47, %v6962_v18  ;;  %v559_v17 = vrot.slane %v429_v47, %v6966_v20 }
 0x1ba   :  { %v1254_v41 = vpop.f32.mrb[8].mxu0 }
 0x1bb   :  { %v1255_v27 = vadd.f32 %v1254_v41, %v503_v38  ;;  %v1256_v30 = vpop.f32.mrb[9].mxu0  ;;  %v1325_v42 = vpop.f32.mrb[8].mxu1  ;;  %v555_v38 = vrot.slane %v429_v47, %v6964_v19  ;;  %v563_v41 = vrot.slane %v429_v47, %v6968_v21 }
 0x1bc   :  { %v1257_v43 = vadd.f32 %v1256_v30, %v507_v40  ;;  %v1327_v31 = vpop.f32.mrb[9].mxu1  ;;  %v1326_v6 = vadd.f32 %v1325_v42, %v511_v62 }
 0x1bd   :  { %v1914_v45 = vmax.f32 %v1255_v27, 0.0  ;;  %v1328_v40 = vadd.f32 %v1327_v31, %v515_v24  ;;  %v2219_v31 = vld [vmem:[#allocation6 + $0x810] sm:$0xff] }
 0x1be   :  { %v1915_v48 = vmax.f32 %v1257_v43, 0.0  ;;  %v1916_v16 = vmax.f32 %v1326_v6, 0.0  ;;  %v2242_v6 = vld [vmem:[#allocation6 + $0x8c8] sm:$0xff] }
 0x1bf   :  { %v7010_v49 = vmax.f32 %v1905_v44, %v1914_v45 }
 0x1c0   :  { %v7012_v50 = vmax.f32 %v1906_v46, %v1915_v48  ;;  %v1917_v48 = vmax.f32 %v1328_v40, 0.0 }
 0x1ca   :  { %v1396_v53 = vpop.f32.mrb[10].mxu0 }
 0x1cb   :  { %v1397_v54 = vadd.f32 %v1396_v53, %v519_v63  ;;  %v1398_v55 = vpop.f32.mrb[11].mxu0  ;;  %v1467_v56 = vpop.f32.mrb[10].mxu1 }
 0x1cc   :  { %v1468_v57 = vadd.f32 %v1467_v56, %v527_v51  ;;  %v1469_v58 = vpop.f32.mrb[11].mxu1  ;;  %v1399_v27 = vadd.f32 %v1398_v55, %v523_v25  ;;  %v2217_v51 = vld [vmem:[#allocation6 + $0x800] sm:$0xff]  ;;  %v2235_v25 = vld [vmem:[#allocation6 + $0x890] sm:$0xff] }
 0x1cd   :  { %v7017_v33 = vadd.f32 %v1469_v58, %v531_v52  ;;  %v2225_v52 = vld [vmem:[#allocation6 + $0x840] sm:$0xff]  ;;  %v1918_v53 = vmax.f32 %v1397_v54, 0.0 }
 0x1ce   :  { %v1919_v56 = vmax.f32 %v1399_v27, 0.0  ;;  %v1920_v47 = vmax.f32 %v1468_v57, 0.0  ;;  %v2252_v27 = vld [vmem:[#allocation6 + $0x918] sm:$0xff] }
 0x1da   :  { %v1538_v5 = vpop.f32.mrb[12].mxu0 }
 0x1db   :  { %v7024_v7 = vadd.f32 %v1538_v5, %v535_v1  ;;  %v1609_v8 = vpop.f32.mrb[12].mxu1  ;;  %v1540_v9 = vpop.f32.mrb[13].mxu0  ;;  %v2227_v1 = vld [vmem:[#allocation6 + $0x850] sm:$0xff] }
 0x1dc   :  { %v7026_v12 = vadd.f32 %v1609_v8, %v543_v2  ;;  %v7028_v13 = vadd.f32 %v1540_v9, %v539_v3  ;;  %v1611_v14 = vpop.f32.mrb[13].mxu1  ;;  %v2234_v3 = vld [vmem:[#allocation6 + $0x888] sm:$0xff]  ;;  %v2236_v8 = vld [vmem:[#allocation6 + $0x898] sm:$0xff]  ;;  %v5627_v54 = vpack.c.bf16 %v2227_v1, %v2219_v31  ;;  %v2267_v31 = vld [vmem:[#allocation6 + $0x990] sm:$0xff] }
 0x1dd   :  { %v1612_v15 = vadd.f32 %v1611_v14, %v547_v4  ;;  %v2244_v9 = vld [vmem:[#allocation6 + $0x8d8] sm:$0xff] }
 0x1de   :  { %v5629_v40 = vpack.c.bf16 %v2244_v9, %v2236_v8  ;;  %v2284_v9 = vld [vmem:[#allocation6 + $0xa18] sm:$0xff] }
 0x1df   :  { %v1925_v22 = vmax.f32 %v1612_v15, 0.0 }
 0x1e1   :  { %v1943_v11 = vmax.f32 %v1916_v16, %v1925_v22  ;;  %v5339_v16 = vpack.c.bf16 %v2225_v52, %v2217_v51  ;;  %v2233_v22 = vld [vmem:[#allocation6 + $0x880] sm:$0xff]  ;;  %v2268_v51 = vld [vmem:[#allocation6 + $0x998] sm:$0xff] }
 0x1e2   :  { %v2276_v52 = vld [vmem:[#allocation6 + $0x9d8] sm:$0xff] }
 0x1e3   :  { %v7031_v23 = vmax.f32 %v6990_v60, %v1943_v11  ;;  %v2241_v11 = vld [vmem:[#allocation6 + $0x8c0] sm:$0xff]  ;;  %v5637_v8 = vpack.c.bf16 %v2276_v52, %v2268_v51  ;;  %v2300_v52 = vld [vmem:[#allocation6 + $0xa98] sm:$0xff] }
 0x1ea   :  { %v1680_v30 = vpop.f32.mrb[14].mxu0 }
 0x1eb   :  { %v1681_v42 = vadd.f32 %v1680_v30, %v551_v26  ;;  %v1751_v43 = vpop.f32.mrb[14].mxu1  ;;  %v1682_v44 = vpop.f32.mrb[15].mxu0  ;;  %v2243_v26 = vld [vmem:[#allocation6 + $0x8d0] sm:$0xff]  ;;  %v2260_v30 = vld [vmem:[#allocation6 + $0x958] sm:$0xff] }
 0x1ec   :  { %v1752_v60 = vadd.f32 %v1751_v43, %v559_v17  ;;  %v1683_v45 = vadd.f32 %v1682_v44, %v555_v38  ;;  %v1753_v46 = vpop.f32.mrb[15].mxu1  ;;  %v2250_v17 = vld [vmem:[#allocation6 + $0x908] sm:$0xff]  ;;  %v2257_v43 = vld [vmem:[#allocation6 + $0x940] sm:$0xff] }
 0x1ed   :  { %v1926_v63 = vmax.f32 %v1681_v42, 0.0  ;;  %v1754_v37 = vadd.f32 %v1753_v46, %v563_v41  ;;  %v2258_v41 = vld [vmem:[#allocation6 + $0x948] sm:$0xff]  ;;  %v5631_v42 = vpack.c.bf16 %v2243_v26, %v2235_v25  ;;  %v2259_v46 = vld [vmem:[#allocation6 + $0x950] sm:$0xff] }
 0x1ee   :  { %v1928_v58 = vmax.f32 %v1752_v60, 0.0  ;;  %v1927_v62 = vmax.f32 %v1683_v45, 0.0  ;;  %v5345_v44 = vpack.c.bf16 %v2258_v41, %v2250_v17  ;;  %v5633_v60 = vpack.c.bf16 %v2260_v30, %v2252_v27  ;;  %v2251_v45 = vld [vmem:[#allocation6 + $0x910] sm:$0xff]  ;;  %v2281_v41 = vld [vmem:[#allocation6 + $0xa00] sm:$0xff] }
 0x1ef   :  { %v1944_v55 = vmax.f32 %v1917_v48, %v1926_v63  ;;  %v1929_v2 = vmax.f32 %v1754_v37, 0.0  ;;  %v2266_v48 = vld [vmem:[#allocation6 + $0x988] sm:$0xff]  ;;  %v1921_v27 = vmax.f32 %v7017_v33, 0.0  ;;  %v1924_v33 = vmax.f32 %v7026_v12, 0.0 }
 0x1f0   :  { %v1946_v4 = vmax.f32 %v1919_v56, %v1928_v58  ;;  %v1945_v5 = vmax.f32 %v1918_v53, %v1927_v62  ;;  %v2274_v37 = vld [vmem:[#allocation6 + $0x9c8] sm:$0xff]  ;;  %v2265_v58 = vld [vmem:[#allocation6 + $0x980] sm:$0xff] }
 0x1f1   :  { %v7040_v14 = vmax.f32 %v6988_v59, %v1944_v55  ;;  %v1947_v15 = vmax.f32 %v1920_v47, %v1929_v2  ;;  %v5341_v59 = vpack.c.bf16 %v2242_v6, %v2234_v3  ;;  %v2273_v62 = vld [vmem:[#allocation6 + $0x9c0] sm:$0xff]  ;;  %v5635_v55 = vpack.c.bf16 %v2259_v46, %v2251_v45  ;;  %v2275_v2 = vld [vmem:[#allocation6 + $0x9d0] sm:$0xff]  ;;  %v2282_v3 = vld [vmem:[#allocation6 + $0xa08] sm:$0xff] }
 0x1f2   :  { %v7043_v24 = vmax.f32 %v6999_v28, %v1946_v4  ;;  %v7046_v57 = vmax.f32 %v6992_v61, %v1945_v5  ;;  %v430_v61 = vld [vmem:[#allocation4 + $0x20] sm:$0xf]  ;;  %v5343_v28 = vpack.c.bf16 %v2241_v11, %v2233_v22  ;;  %v2290_v4 = vld [vmem:[#allocation6 + $0xa48] sm:$0xff]  ;;  %v5349_v6 = vpack.c.bf16 %v2274_v37, %v2266_v48 }
 0x1f3   :  { %v7049_v38 = vmax.f32 %v7003_v32, %v1947_v15  ;;  %3219 = vmatprep.mubr.f32.mxu0 %v7040_v14  ;;  %3574 = vmatprep.mubr.f32.mxu1 %v7040_v14  ;;  %v2249_v32 = vld [vmem:[#allocation6 + $0x900] sm:$0xff]  ;;  %v567_v63 = vrot.slane %v430_v61, %v6976_v34  ;;  %v575_v53 = vrot.slane %v430_v61, %v6959_v10  ;;  %v2292_v15 = vld [vmem:[#allocation6 + $0xa58] sm:$0xff]  ;;  %v2298_v48 = vld [vmem:[#allocation6 + $0xa88] sm:$0xff] }
 0x1f4   :  { %3220 = vmatmul.mubr.f32.vlgmr.msra.gmra.mrb[18].mxu0 %v7031_v23  ;;  %3575 = vmatmul.mubr.f32.vlgmr.msra.gmra.mrb[18].mxu1 %v7031_v23  ;;  %v571_v56 = vrot.slane %v430_v61, %v6978_v35  ;;  %v579_v1 = vrot.slane %v430_v61, %v6982_v39  ;;  %v5347_v47 = vpack.c.bf16 %v2257_v43, %v2249_v32  ;;  %v2283_v32 = vld [vmem:[#allocation6 + $0xa10] sm:$0xff] }
 0x1f5   :  { %5340 = vmatpush1.bf16.msra.mxu0 %v5339_v16  ;;  %5628 = vmatpush1.bf16.msra.mxu1 %v5627_v54  ;;  %v5351_v11 = vpack.c.bf16 %v2273_v62, %v2265_v58  ;;  %v2291_v43 = vld [vmem:[#allocation6 + $0xa50] sm:$0xff] }
 0x1f6   :  { %3290 = vmatprep.mubr.f32.mxu0 %v7043_v24  ;;  %3645 = vmatprep.mubr.f32.mxu1 %v7043_v24 }
 0x1f7   :  { %5342 = vmatprep.subr.bf16.mxu0 %v5341_v59  ;;  %5630 = vmatprep.subr.bf16.mxu1 %v5629_v40  ;;  %v5639_v59 = vpack.c.bf16 %v2275_v2, %v2267_v31  ;;  %v5353_v40 = vpack.c.bf16 %v2290_v4, %v2282_v3  ;;  %v5643_v31 = vpack.c.bf16 %v2291_v43, %v2283_v32  ;;  %v2299_v4 = vld [vmem:[#allocation6 + $0xa90] sm:$0xff] }
 0x1f8   :  { %v2331_v32 = vld [vmem:[#allocation6 + $0xb90] sm:$0xff] }
 0x1f9   :  { %5344 = vmatpush1.bf16.msra.mxu0 %v5343_v28  ;;  %5632 = vmatpush1.bf16.msra.mxu1 %v5631_v42  ;;  %v5641_v28 = vpack.c.bf16 %v2292_v15, %v2284_v9  ;;  %v2289_v42 = vld [vmem:[#allocation6 + $0xa40] sm:$0xff]  ;;  %v2316_v9 = vld [vmem:[#allocation6 + $0xb18] sm:$0xff]  ;;  %v2339_v43 = vld [vmem:[#allocation6 + $0xbd0] sm:$0xff] }
 0x1fa   :  { %v1822_v5 = vpop.f32.mrb[16].mxu0  ;;  %5346 = vmatprep.subr.bf16.mxu0 %v5345_v44  ;;  %5634 = vmatprep.subr.bf16.mxu1 %v5633_v60  ;;  %v1922_v44 = vmax.f32 %v7024_v7, 0.0  ;;  %v1923_v60 = vmax.f32 %v7028_v13, 0.0  ;;  %v5355_v62 = vpack.c.bf16 %v2289_v42, %v2281_v41  ;;  %v2324_v15 = vld [vmem:[#allocation6 + $0xb58] sm:$0xff] }
 0x1fb   :  { %v1823_v16 = vadd.f32 %v1822_v5, %v567_v63  ;;  %v1893_v54 = vpop.f32.mrb[16].mxu1  ;;  %v1824_v22 = vpop.f32.mrb[17].mxu0  ;;  %v2306_v63 = vld [vmem:[#allocation6 + $0xac8] sm:$0xff]  ;;  %v2307_v5 = vld [vmem:[#allocation6 + $0xad0] sm:$0xff] }
 0x1fc   :  { %v1894_v25 = vadd.f32 %v1893_v54, %v575_v53  ;;  %v1825_v26 = vadd.f32 %v1824_v22, %v571_v56  ;;  %v1895_v17 = vpop.f32.mrb[17].mxu1  ;;  %v2308_v53 = vld [vmem:[#allocation6 + $0xad8] sm:$0xff]  ;;  %v2313_v54 = vld [vmem:[#allocation6 + $0xb00] sm:$0xff] }
 0x1fd   :  { %v1930_v30 = vmax.f32 %v1823_v16, 0.0  ;;  %v1896_v61 = vadd.f32 %v1895_v17, %v579_v1  ;;  %5348 = vmatpush1.bf16.msra.mxu0 %v5347_v47  ;;  %5636 = vmatpush1.bf16.msra.mxu1 %v5635_v55  ;;  %v5357_v1 = vpack.c.bf16 %v2306_v63, %v2298_v48  ;;  %v2297_v47 = vld [vmem:[#allocation6 + $0xa80] sm:$0xff]  ;;  %v5645_v3 = vpack.c.bf16 %v2308_v53, %v2300_v52  ;;  %v2330_v17 = vld [vmem:[#allocation6 + $0xb88] sm:$0xff]  ;;  %v2347_v53 = vld [vmem:[#allocation6 + $0xc10] sm:$0xff] }
 0x1fe   :  { %v1932_v45 = vmax.f32 %v1894_v25, 0.0  ;;  %v1931_v46 = vmax.f32 %v1825_v26, 0.0  ;;  %5350 = vmatprep.subr.bf16.mxu0 %v5349_v6  ;;  %5638 = vmatprep.subr.bf16.mxu1 %v5637_v8  ;;  %v2305_v55 = vld [vmem:[#allocation6 + $0xac0] sm:$0xff]  ;;  %v2314_v6 = vld [vmem:[#allocation6 + $0xb08] sm:$0xff]  ;;  %v2315_v25 = vld [vmem:[#allocation6 + $0xb10] sm:$0xff]  ;;  %v5655_v63 = vpack.c.bf16 %v2339_v43, %v2331_v32 }
 0x1ff   :  { %v1948_v37 = vmax.f32 %v1921_v27, %v1930_v30  ;;  %v1933_v51 = vmax.f32 %v1896_v61, 0.0  ;;  %v2322_v8 = vld [vmem:[#allocation6 + $0xb48] sm:$0xff]  ;;  %v5359_v16 = vpack.c.bf16 %v2305_v55, %v2297_v47  ;;  %v2321_v22 = vld [vmem:[#allocation6 + $0xb40] sm:$0xff]  ;;  %v2323_v26 = vld [vmem:[#allocation6 + $0xb50] sm:$0xff] }
 0x200   :  { %v1950_v56 = vmax.f32 %v1923_v60, %v1932_v45  ;;  %v1949_v58 = vmax.f32 %v1922_v44, %v1931_v46  ;;  %v5363_v41 = vpack.c.bf16 %v2321_v22, %v2313_v54  ;;  %v5651_v27 = vpack.c.bf16 %v2323_v26, %v2315_v25  ;;  %v2329_v30 = vld [vmem:[#allocation6 + $0xb80] sm:$0xff]  ;;  %v2346_v44 = vld [vmem:[#allocation6 + $0xc08] sm:$0xff]  ;;  %v2348_v45 = vld [vmem:[#allocation6 + $0xc18] sm:$0xff] }
 0x201   :  { %v7066_v7 = vmax.f32 %v7001_v29, %v1948_v37  ;;  %v1951_v13 = vmax.f32 %v1924_v33, %v1933_v51  ;;  %5352 = vmatpush1.bf16.msra.mxu0 %v5351_v11  ;;  %5640 = vmatpush1.bf16.msra.mxu1 %v5639_v59  ;;  %v5649_v11 = vpack.c.bf16 %v2324_v15, %v2316_v9  ;;  %v2338_v59 = vld [vmem:[#allocation6 + $0xbc8] sm:$0xff]  ;;  %v2337_v61 = vld [vmem:[#allocation6 + $0xbc0] sm:$0xff]  ;;  %v2356_v46 = vld [vmem:[#allocation6 + $0xc58] sm:$0xff] }
 0x202   :  { %v7069_v2 = vmax.f32 %v7010_v49, %v1950_v56  ;;  %v7072_v12 = vmax.f32 %v7005_v36, %v1949_v58  ;;  %5354 = vmatprep.subr.bf16.mxu0 %v5353_v40  ;;  %5642 = vmatprep.subr.bf16.mxu1 %v5641_v28  ;;  %v5647_v49 = vpack.c.bf16 %v2307_v5, %v2299_v4  ;;  %v2332_v40 = vld [vmem:[#allocation6 + $0xb98] sm:$0xff]  ;;  %v2354_v60 = vld [vmem:[#allocation6 + $0xc48] sm:$0xff]  ;;  %v2345_v33 = vld [vmem:[#allocation6 + $0xc00] sm:$0xff] }
 0x203   :  { %v7075_v29 = vmax.f32 %v7012_v50, %v1951_v13  ;;  %v5361_v36 = vpack.c.bf16 %v2322_v8, %v2314_v6  ;;  %v2340_v50 = vld [vmem:[#allocation6 + $0xbd8] sm:$0xff]  ;;  %v5365_v28 = vpack.c.bf16 %v2338_v59, %v2330_v17  ;;  %v5367_v48 = vpack.c.bf16 %v2337_v61, %v2329_v30  ;;  %v2353_v37 = vld [vmem:[#allocation6 + $0xc40] sm:$0xff]  ;;  %v2355_v56 = vld [vmem:[#allocation6 + $0xc50] sm:$0xff] }
 0x204   :  { %v5653_v42 = vpack.c.bf16 %v2340_v50, %v2332_v40  ;;  %v5369_v51 = vpack.c.bf16 %v2354_v60, %v2346_v44  ;;  %v5657_v52 = vpack.c.bf16 %v2356_v46, %v2348_v45  ;;  %v2362_v58 = vld [vmem:[#allocation6 + $0xc88] sm:$0xff]  ;;  %v2372_v13 = vld [vmem:[#allocation6 + $0xcd8] sm:$0xff]  ;;  %v5659_v47 = vpack.c.bf16 %v2355_v56, %v2347_v53  ;;  %v2361_v55 = vld [vmem:[#allocation6 + $0xc80] sm:$0xff] }
 0x205   :  { %5356 = vmatpush1.bf16.msra.mxu0 %v5355_v62  ;;  %5644 = vmatpush1.bf16.msra.mxu1 %v5643_v31  ;;  %v2370_v62 = vld [vmem:[#allocation6 + $0xcc8] sm:$0xff]  ;;  %v2364_v31 = vld [vmem:[#allocation6 + $0xc98] sm:$0xff]  ;;  %v2363_v6 = vld [vmem:[#allocation6 + $0xc90] sm:$0xff] }
 0x206   :  { %5358 = vmatprep.subr.bf16.mxu0 %v5357_v1  ;;  %5646 = vmatprep.subr.bf16.mxu1 %v5645_v3  ;;  %v5371_v1 = vpack.c.bf16 %v2353_v37, %v2345_v33  ;;  %v2369_v3 = vld [vmem:[#allocation6 + $0xcc0] sm:$0xff]  ;;  %v5373_v4 = vpack.c.bf16 %v2370_v62, %v2362_v58  ;;  %v5661_v5 = vpack.c.bf16 %v2372_v13, %v2364_v31  ;;  %v2371_v8 = vld [vmem:[#allocation6 + $0xcd0] sm:$0xff]  ;;  %v2378_v9 = vld [vmem:[#allocation6 + $0xd08] sm:$0xff] }
 0x207   :  { %v2386_v15 = vld [vmem:[#allocation6 + $0xd48] sm:$0xff]  ;;  %v5375_v54 = vpack.c.bf16 %v2369_v3, %v2361_v55  ;;  %v5663_v22 = vpack.c.bf16 %v2371_v8, %v2363_v6  ;;  %v2379_v17 = vld [vmem:[#allocation6 + $0xd10] sm:$0xff] }
 0x208   :  { %v5377_v25 = vpack.c.bf16 %v2386_v15, %v2378_v9  ;;  %v2387_v59 = vld [vmem:[#allocation6 + $0xd50] sm:$0xff]  ;;  %v2394_v40 = vld [vmem:[#allocation6 + $0xd88] sm:$0xff] }
 0x209   :  { %5360 = vmatpush1.bf16.msra.mxu0 %v5359_v16  ;;  %5648 = vmatpush1.bf16.msra.mxu1 %v5647_v49  ;;  %v2380_v16 = vld [vmem:[#allocation6 + $0xd18] sm:$0xff]  ;;  %v2402_v50 = vld [vmem:[#allocation6 + $0xdc8] sm:$0xff]  ;;  %v5667_v61 = vpack.c.bf16 %v2387_v59, %v2379_v17  ;;  %v2395_v44 = vld [vmem:[#allocation6 + $0xd90] sm:$0xff] }
 0x20a   :  { %5362 = vmatprep.subr.bf16.mxu0 %v5361_v36  ;;  %5650 = vmatprep.subr.bf16.mxu1 %v5649_v11  ;;  %v2388_v49 = vld [vmem:[#allocation6 + $0xd58] sm:$0xff]  ;;  %v2377_v36 = vld [vmem:[#allocation6 + $0xd00] sm:$0xff]  ;;  %v5381_v32 = vpack.c.bf16 %v2402_v50, %v2394_v40  ;;  %v2403_v60 = vld [vmem:[#allocation6 + $0xdd0] sm:$0xff] }
 0x20b   :  { %v2385_v11 = vld [vmem:[#allocation6 + $0xd40] sm:$0xff]  ;;  %v5665_v26 = vpack.c.bf16 %v2388_v49, %v2380_v16  ;;  %v2410_v45 = vld [vmem:[#allocation6 + $0xe08] sm:$0xff]  ;;  %v5671_v37 = vpack.c.bf16 %v2403_v60, %v2395_v44  ;;  %v2411_v58 = vld [vmem:[#allocation6 + $0xe10] sm:$0xff] }
 0x20c   :  { %v5379_v30 = vpack.c.bf16 %v2385_v11, %v2377_v36  ;;  %v2418_v46 = vld [vmem:[#allocation6 + $0xe48] sm:$0xff]  ;;  %v2419_v62 = vld [vmem:[#allocation6 + $0xe50] sm:$0xff] }
 0x20d   :  { %5364 = vmatpush1.bf16.msra.mxu0 %v5363_v41  ;;  %5652 = vmatpush1.bf16.msra.mxu1 %v5651_v27  ;;  %v2396_v41 = vld [vmem:[#allocation6 + $0xd98] sm:$0xff]  ;;  %v5385_v53 = vpack.c.bf16 %v2418_v46, %v2410_v45  ;;  %v2426_v31 = vld [vmem:[#allocation6 + $0xe88] sm:$0xff]  ;;  %v5675_v3 = vpack.c.bf16 %v2419_v62, %v2411_v58  ;;  %v2427_v9 = vld [vmem:[#allocation6 + $0xe90] sm:$0xff] }
 0x20e   :  { %5366 = vmatprep.subr.bf16.mxu0 %v5365_v28  ;;  %5654 = vmatprep.subr.bf16.mxu1 %v5653_v42  ;;  %v2404_v27 = vld [vmem:[#allocation6 + $0xdd8] sm:$0xff]  ;;  %v2393_v28 = vld [vmem:[#allocation6 + $0xd80] sm:$0xff]  ;;  %v2434_v13 = vld [vmem:[#allocation6 + $0xec8] sm:$0xff] }
 0x20f   :  { %v2401_v42 = vld [vmem:[#allocation6 + $0xdc0] sm:$0xff]  ;;  %v5669_v43 = vpack.c.bf16 %v2404_v27, %v2396_v41  ;;  %v5389_v6 = vpack.c.bf16 %v2434_v13, %v2426_v31  ;;  %v2435_v15 = vld [vmem:[#allocation6 + $0xed0] sm:$0xff]  ;;  %v2442_v16 = vld [vmem:[#allocation6 + $0xf08] sm:$0xff] }
 0x210   :  { %v5383_v33 = vpack.c.bf16 %v2401_v42, %v2393_v28  ;;  %v2450_v49 = vld [vmem:[#allocation6 + $0xf48] sm:$0xff]  ;;  %v5679_v11 = vpack.c.bf16 %v2435_v15, %v2427_v9  ;;  %v2443_v40 = vld [vmem:[#allocation6 + $0xf10] sm:$0xff]  ;;  %v2473_v58 = vld [vmem:[#allocation6 + $0x1000] sm:$0xff] }
 0x211   :  { %5368 = vmatpush1.bf16.msra.mxu0 %v5367_v48  ;;  %5656 = vmatpush1.bf16.msra.mxu1 %v5655_v63  ;;  %v2412_v48 = vld [vmem:[#allocation6 + $0xe18] sm:$0xff]  ;;  %v5393_v17 = vpack.c.bf16 %v2450_v49, %v2442_v16  ;;  %v2451_v50 = vld [vmem:[#allocation6 + $0xf50] sm:$0xff]  ;;  %v2458_v41 = vld [vmem:[#allocation6 + $0xf88] sm:$0xff] }
 0x212   :  { %5370 = vmatprep.subr.bf16.mxu0 %v5369_v51  ;;  %5658 = vmatprep.subr.bf16.mxu1 %v5657_v52  ;;  %v2420_v63 = vld [vmem:[#allocation6 + $0xe58] sm:$0xff]  ;;  %v2409_v51 = vld [vmem:[#allocation6 + $0xe00] sm:$0xff]  ;;  %v2466_v27 = vld [vmem:[#allocation6 + $0xfc8] sm:$0xff]  ;;  %v5683_v42 = vpack.c.bf16 %v2451_v50, %v2443_v40 }
 0x213   :  { %v2417_v52 = vld [vmem:[#allocation6 + $0xe40] sm:$0xff]  ;;  %v5673_v56 = vpack.c.bf16 %v2420_v63, %v2412_v48  ;;  %v5397_v44 = vpack.c.bf16 %v2466_v27, %v2458_v41  ;;  %v2459_v45 = vld [vmem:[#allocation6 + $0xf90] sm:$0xff]  ;;  %v2474_v48 = vld [vmem:[#allocation6 + $0x1008] sm:$0xff] }
 0x214   :  { %v5387_v55 = vpack.c.bf16 %v2417_v52, %v2409_v51  ;;  %v2467_v46 = vld [vmem:[#allocation6 + $0xfd0] sm:$0xff]  ;;  %v2482_v63 = vld [vmem:[#allocation6 + $0x1048] sm:$0xff]  ;;  %v2481_v62 = vld [vmem:[#allocation6 + $0x1040] sm:$0xff] }
 0x215   :  { %5372 = vmatpush1.bf16.msra.mxu0 %v5371_v1  ;;  %5660 = vmatpush1.bf16.msra.mxu1 %v5659_v47  ;;  %v2428_v1 = vld [vmem:[#allocation6 + $0xe98] sm:$0xff]  ;;  %v5687_v52 = vpack.c.bf16 %v2467_v46, %v2459_v45  ;;  %v2475_v31 = vld [vmem:[#allocation6 + $0x1010] sm:$0xff]  ;;  %v2513_v40 = vld [vmem:[#allocation6 + $0x1140] sm:$0xff] }
 0x216   :  { %5374 = vmatprep.subr.bf16.mxu0 %v5373_v4  ;;  %5662 = vmatprep.subr.bf16.mxu1 %v5661_v5  ;;  %v2436_v47 = vld [vmem:[#allocation6 + $0xed8] sm:$0xff]  ;;  %v2425_v4 = vld [vmem:[#allocation6 + $0xe80] sm:$0xff]  ;;  %v2483_v13 = vld [vmem:[#allocation6 + $0x1050] sm:$0xff] }
 0x217   :  { %v2433_v5 = vld [vmem:[#allocation6 + $0xec0] sm:$0xff]  ;;  %v5677_v8 = vpack.c.bf16 %v2436_v47, %v2428_v1  ;;  %v2490_v1 = vld [vmem:[#allocation6 + $0x1088] sm:$0xff]  ;;  %v2491_v9 = vld [vmem:[#allocation6 + $0x1090] sm:$0xff] }
 0x218   :  { %v5391_v36 = vpack.c.bf16 %v2433_v5, %v2425_v4  ;;  %v2498_v47 = vld [vmem:[#allocation6 + $0x10c8] sm:$0xff]  ;;  %v5403_v4 = vpack.c.bf16 %v2481_v62, %v2473_v58  ;;  %v5691_v5 = vpack.c.bf16 %v2483_v13, %v2475_v31  ;;  %v2499_v49 = vld [vmem:[#allocation6 + $0x10d0] sm:$0xff]  ;;  %v2529_v45 = vld [vmem:[#allocation6 + $0x11c0] sm:$0xff] }
 0x219   :  { %5376 = vmatpush1.bf16.msra.mxu0 %v5375_v54  ;;  %5664 = vmatpush1.bf16.msra.mxu1 %v5663_v22  ;;  %v2444_v54 = vld [vmem:[#allocation6 + $0xf18] sm:$0xff]  ;;  %v5405_v15 = vpack.c.bf16 %v2498_v47, %v2490_v1  ;;  %v2507_v50 = vld [vmem:[#allocation6 + $0x1110] sm:$0xff]  ;;  %v2537_v62 = vld [vmem:[#allocation6 + $0x1200] sm:$0xff] }
 0x21a   :  { %5378 = vmatprep.subr.bf16.mxu0 %v5377_v25  ;;  %5666 = vmatprep.subr.bf16.mxu1 %v5665_v26  ;;  %v2452_v22 = vld [vmem:[#allocation6 + $0xf58] sm:$0xff]  ;;  %v2441_v25 = vld [vmem:[#allocation6 + $0xf00] sm:$0xff]  ;;  %v2515_v27 = vld [vmem:[#allocation6 + $0x1150] sm:$0xff] }
 0x21b   :  { %v2449_v26 = vld [vmem:[#allocation6 + $0xf40] sm:$0xff]  ;;  %v5681_v59 = vpack.c.bf16 %v2452_v22, %v2444_v54  ;;  %v2506_v54 = vld [vmem:[#allocation6 + $0x1108] sm:$0xff]  ;;  %v2523_v46 = vld [vmem:[#allocation6 + $0x1190] sm:$0xff] }
 0x21c   :  { %v5395_v28 = vpack.c.bf16 %v2449_v26, %v2441_v25  ;;  %v2514_v22 = vld [vmem:[#allocation6 + $0x1148] sm:$0xff]  ;;  %v5695_v26 = vpack.c.bf16 %v2499_v49, %v2491_v9  ;;  %v2545_v31 = vld [vmem:[#allocation6 + $0x1240] sm:$0xff]  ;;  %v2539_v13 = vld [vmem:[#allocation6 + $0x1210] sm:$0xff] }
 0x21d   :  { %5380 = vmatpush1.bf16.msra.mxu0 %v5379_v30  ;;  %5668 = vmatpush1.bf16.msra.mxu1 %v5667_v61  ;;  %v2460_v30 = vld [vmem:[#allocation6 + $0xf98] sm:$0xff]  ;;  %v2547_v47 = vld [vmem:[#allocation6 + $0x1250] sm:$0xff] }
 0x21e   :  { %5382 = vmatprep.subr.bf16.mxu0 %v5381_v32  ;;  %5670 = vmatprep.subr.bf16.mxu1 %v5669_v43  ;;  %v2468_v61 = vld [vmem:[#allocation6 + $0xfd8] sm:$0xff]  ;;  %v2457_v32 = vld [vmem:[#allocation6 + $0xf80] sm:$0xff]  ;;  %v2555_v49 = vld [vmem:[#allocation6 + $0x1290] sm:$0xff] }
 0x21f   :  { %v2465_v43 = vld [vmem:[#allocation6 + $0xfc0] sm:$0xff]  ;;  %v5685_v60 = vpack.c.bf16 %v2468_v61, %v2460_v30  ;;  %v2522_v30 = vld [vmem:[#allocation6 + $0x1188] sm:$0xff] }
 0x220   :  { %v5399_v51 = vpack.c.bf16 %v2465_v43, %v2457_v32  ;;  %v2530_v61 = vld [vmem:[#allocation6 + $0x11c8] sm:$0xff]  ;;  %v5699_v43 = vpack.c.bf16 %v2515_v27, %v2507_v50  ;;  %v2569_v50 = vld [vmem:[#allocation6 + $0x1300] sm:$0xff]  ;;  %v2571_v27 = vld [vmem:[#allocation6 + $0x1310] sm:$0xff] }
 0x221   :  { %5384 = vmatpush1.bf16.msra.mxu0 %v5383_v33  ;;  %5672 = vmatpush1.bf16.msra.mxu1 %v5671_v37  ;;  %v2476_v33 = vld [vmem:[#allocation6 + $0x1018] sm:$0xff] }
 0x222   :  { %5386 = vmatprep.subr.bf16.mxu0 %v5385_v53  ;;  %5674 = vmatprep.subr.bf16.mxu1 %v5673_v56  ;;  %v2484_v37 = vld [vmem:[#allocation6 + $0x1058] sm:$0xff]  ;;  %v5401_v53 = vpack.c.bf16 %v2482_v63, %v2474_v48  ;;  %v2531_v63 = vld [vmem:[#allocation6 + $0x11d0] sm:$0xff] }
 0x223   :  { %v5689_v56 = vpack.c.bf16 %v2484_v37, %v2476_v33  ;;  %v2538_v33 = vld [vmem:[#allocation6 + $0x1208] sm:$0xff] }
 0x224   :  { %v2546_v37 = vld [vmem:[#allocation6 + $0x1248] sm:$0xff] }
 0x225   :  { %5388 = vmatpush1.bf16.msra.mxu0 %v5387_v55  ;;  %5676 = vmatpush1.bf16.msra.mxu1 %v5675_v3  ;;  %v2492_v55 = vld [vmem:[#allocation6 + $0x1098] sm:$0xff]  ;;  %v5417_v58 = vpack.c.bf16 %v2546_v37, %v2538_v33  ;;  %v2595_v37 = vld [vmem:[#allocation6 + $0x13d0] sm:$0xff] }
 0x226   :  { %5390 = vmatprep.subr.bf16.mxu0 %v5389_v6  ;;  %5678 = vmatprep.subr.bf16.mxu1 %v5677_v8  ;;  %v2500_v3 = vld [vmem:[#allocation6 + $0x10d8] sm:$0xff]  ;;  %v2489_v6 = vld [vmem:[#allocation6 + $0x1080] sm:$0xff] }
 0x227   :  { %v2497_v8 = vld [vmem:[#allocation6 + $0x10c0] sm:$0xff]  ;;  %v5693_v16 = vpack.c.bf16 %v2500_v3, %v2492_v55  ;;  %v2554_v55 = vld [vmem:[#allocation6 + $0x1288] sm:$0xff] }
 0x228   :  { %v5407_v25 = vpack.c.bf16 %v2497_v8, %v2489_v6  ;;  %v2562_v3 = vld [vmem:[#allocation6 + $0x12c8] sm:$0xff]  ;;  %v5419_v6 = vpack.c.bf16 %v2545_v31, %v2537_v62  ;;  %v5707_v8 = vpack.c.bf16 %v2547_v47, %v2539_v13  ;;  %v2601_v13 = vld [vmem:[#allocation6 + $0x1400] sm:$0xff]  ;;  %v2603_v47 = vld [vmem:[#allocation6 + $0x1410] sm:$0xff] }
 0x229   :  { %5392 = vmatpush1.bf16.msra.mxu0 %v5391_v36  ;;  %5680 = vmatpush1.bf16.msra.mxu1 %v5679_v11  ;;  %v2508_v36 = vld [vmem:[#allocation6 + $0x1118] sm:$0xff]  ;;  %v5421_v9 = vpack.c.bf16 %v2562_v3, %v2554_v55  ;;  %v2611_v3 = vld [vmem:[#allocation6 + $0x1450] sm:$0xff] }
 0x22a   :  { %5394 = vmatprep.subr.bf16.mxu0 %v5393_v17  ;;  %5682 = vmatprep.subr.bf16.mxu1 %v5681_v59  ;;  %v2516_v11 = vld [vmem:[#allocation6 + $0x1158] sm:$0xff]  ;;  %v5409_v17 = vpack.c.bf16 %v2514_v22, %v2506_v54  ;;  %v2505_v59 = vld [vmem:[#allocation6 + $0x1100] sm:$0xff]  ;;  %v2563_v22 = vld [vmem:[#allocation6 + $0x12d0] sm:$0xff] }
 0x22b   :  { %v5697_v41 = vpack.c.bf16 %v2516_v11, %v2508_v36  ;;  %v5411_v32 = vpack.c.bf16 %v2513_v40, %v2505_v59  ;;  %v2570_v36 = vld [vmem:[#allocation6 + $0x1308] sm:$0xff]  ;;  %v5711_v59 = vpack.c.bf16 %v2563_v22, %v2555_v49  ;;  %v2617_v49 = vld [vmem:[#allocation6 + $0x1480] sm:$0xff]  ;;  %v2619_v22 = vld [vmem:[#allocation6 + $0x1490] sm:$0xff] }
 0x22c   :  { %v2578_v11 = vld [vmem:[#allocation6 + $0x1348] sm:$0xff] }
 0x22d   :  { %5396 = vmatpush1.bf16.msra.mxu0 %v5395_v28  ;;  %5684 = vmatpush1.bf16.msra.mxu1 %v5683_v42  ;;  %v2524_v28 = vld [vmem:[#allocation6 + $0x1198] sm:$0xff]  ;;  %v5425_v40 = vpack.c.bf16 %v2578_v11, %v2570_v36  ;;  %v2627_v11 = vld [vmem:[#allocation6 + $0x14d0] sm:$0xff] }
 0x22e   :  { %5398 = vmatprep.subr.bf16.mxu0 %v5397_v44  ;;  %5686 = vmatprep.subr.bf16.mxu1 %v5685_v60  ;;  %v2532_v42 = vld [vmem:[#allocation6 + $0x11d8] sm:$0xff]  ;;  %v5413_v44 = vpack.c.bf16 %v2530_v61, %v2522_v30  ;;  %v2521_v60 = vld [vmem:[#allocation6 + $0x1180] sm:$0xff]  ;;  %v2579_v61 = vld [vmem:[#allocation6 + $0x1350] sm:$0xff] }
 0x22f   :  { %v5701_v48 = vpack.c.bf16 %v2532_v42, %v2524_v28  ;;  %v2586_v28 = vld [vmem:[#allocation6 + $0x1388] sm:$0xff] }
 0x230   :  { %v2594_v42 = vld [vmem:[#allocation6 + $0x13c8] sm:$0xff] }
 0x231   :  { %5400 = vmatpush1.bf16.msra.mxu0 %v5399_v51  ;;  %5688 = vmatpush1.bf16.msra.mxu1 %v5687_v52  ;;  %v2540_v51 = vld [vmem:[#allocation6 + $0x1218] sm:$0xff] }
 0x232   :  { %5402 = vmatprep.subr.bf16.mxu0 %v5401_v53  ;;  %5690 = vmatprep.subr.bf16.mxu1 %v5689_v56  ;;  %v2548_v52 = vld [vmem:[#allocation6 + $0x1258] sm:$0xff]  ;;  %v5415_v53 = vpack.c.bf16 %v2529_v45, %v2521_v60  ;;  %v5703_v56 = vpack.c.bf16 %v2531_v63, %v2523_v46  ;;  %v5715_v60 = vpack.c.bf16 %v2579_v61, %v2571_v27  ;;  %v2585_v46 = vld [vmem:[#allocation6 + $0x1380] sm:$0xff]  ;;  %v2587_v63 = vld [vmem:[#allocation6 + $0x1390] sm:$0xff] }
 0x233   :  { %v5705_v1 = vpack.c.bf16 %v2548_v52, %v2540_v51  ;;  %v5429_v45 = vpack.c.bf16 %v2594_v42, %v2586_v28  ;;  %v2602_v51 = vld [vmem:[#allocation6 + $0x1408] sm:$0xff]  ;;  %v5719_v62 = vpack.c.bf16 %v2595_v37, %v2587_v63  ;;  %v2633_v27 = vld [vmem:[#allocation6 + $0x1500] sm:$0xff]  ;;  %v2635_v61 = vld [vmem:[#allocation6 + $0x1510] sm:$0xff] }
 0x234   :  { %3291 = vmatmul.mubr.f32.vlgmr.msra.gmra.mrb[18].mxu0 %v7046_v57  ;;  %3646 = vmatmul.mubr.f32.vlgmr.msra.gmra.mrb[18].mxu1 %v7046_v57  ;;  %v2610_v52 = vld [vmem:[#allocation6 + $0x1448] sm:$0xff]  ;;  %v2643_v42 = vld [vmem:[#allocation6 + $0x1550] sm:$0xff]  ;;  %v2649_v63 = vld [vmem:[#allocation6 + $0x1580] sm:$0xff] }
 0x235   :  { %5404 = vmatpush1.bf16.msra.mxu0 %v5403_v4  ;;  %3361 = vmatprep.mubr.f32.mxu0 %v7066_v7  ;;  %v2556_v4 = vld [vmem:[#allocation6 + $0x1298] sm:$0xff]  ;;  %v5433_v31 = vpack.c.bf16 %v2610_v52, %v2602_v51  ;;  %v2651_v37 = vld [vmem:[#allocation6 + $0x1590] sm:$0xff] }
 0x236   :  { %5692 = vmatpush1.bf16.msra.mxu1 %v5691_v5  ;;  %3716 = vmatprep.mubr.f32.mxu1 %v7066_v7  ;;  %v2564_v5 = vld [vmem:[#allocation6 + $0x12d8] sm:$0xff]  ;;  %v2659_v52 = vld [vmem:[#allocation6 + $0x15d0] sm:$0xff] }
 0x237   :  { %5406 = vmatprep.subr.bf16.mxu0 %v5405_v15  ;;  %5694 = vmatprep.subr.bf16.mxu1 %v5693_v16  ;;  %v2553_v15 = vld [vmem:[#allocation6 + $0x1280] sm:$0xff]  ;;  %v5709_v54 = vpack.c.bf16 %v2564_v5, %v2556_v4  ;;  %v2618_v4 = vld [vmem:[#allocation6 + $0x1488] sm:$0xff] }
 0x238   :  { %v2561_v16 = vld [vmem:[#allocation6 + $0x12c0] sm:$0xff]  ;;  %v2626_v5 = vld [vmem:[#allocation6 + $0x14c8] sm:$0xff] }
 0x239   :  { %5408 = vmatpush1.bf16.msra.mxu0 %v5407_v25  ;;  %v2572_v25 = vld [vmem:[#allocation6 + $0x1318] sm:$0xff] }
 0x23a   :  { %5696 = vmatpush1.bf16.msra.mxu1 %v5695_v26  ;;  %5410 = vmatprep.subr.bf16.mxu0 %v5409_v17  ;;  %v2580_v26 = vld [vmem:[#allocation6 + $0x1358] sm:$0xff]  ;;  %v5423_v17 = vpack.c.bf16 %v2561_v16, %v2553_v15  ;;  %v5723_v15 = vpack.c.bf16 %v2611_v3, %v2603_v47  ;;  %v5437_v16 = vpack.c.bf16 %v2626_v5, %v2618_v4  ;;  %v2665_v47 = vld [vmem:[#allocation6 + $0x1600] sm:$0xff]  ;;  %v2667_v3 = vld [vmem:[#allocation6 + $0x1610] sm:$0xff] }
 0x23b   :  { %5698 = vmatprep.subr.bf16.mxu1 %v5697_v41  ;;  %v2577_v41 = vld [vmem:[#allocation6 + $0x1340] sm:$0xff]  ;;  %v5713_v30 = vpack.c.bf16 %v2580_v26, %v2572_v25  ;;  %v2634_v25 = vld [vmem:[#allocation6 + $0x1508] sm:$0xff]  ;;  %v2675_v5 = vld [vmem:[#allocation6 + $0x1650] sm:$0xff] }
 0x23c   :  { %v2642_v26 = vld [vmem:[#allocation6 + $0x1548] sm:$0xff] }
 0x23d   :  { %5412 = vmatpush1.bf16.msra.mxu0 %v5411_v32  ;;  %v2588_v32 = vld [vmem:[#allocation6 + $0x1398] sm:$0xff] }
 0x23e   :  { %5700 = vmatpush1.bf16.msra.mxu1 %v5699_v43  ;;  %5414 = vmatprep.subr.bf16.mxu0 %v5413_v44  ;;  %v2596_v43 = vld [vmem:[#allocation6 + $0x13d8] sm:$0xff]  ;;  %v5427_v44 = vpack.c.bf16 %v2577_v41, %v2569_v50  ;;  %v5727_v50 = vpack.c.bf16 %v2627_v11, %v2619_v22  ;;  %v5441_v41 = vpack.c.bf16 %v2642_v26, %v2634_v25  ;;  %v2681_v22 = vld [vmem:[#allocation6 + $0x1680] sm:$0xff]  ;;  %v2683_v11 = vld [vmem:[#allocation6 + $0x1690] sm:$0xff] }
 0x23f   :  { %5702 = vmatprep.subr.bf16.mxu1 %v5701_v48  ;;  %v2593_v48 = vld [vmem:[#allocation6 + $0x13c0] sm:$0xff]  ;;  %v5717_v33 = vpack.c.bf16 %v2596_v43, %v2588_v32  ;;  %v2650_v32 = vld [vmem:[#allocation6 + $0x1588] sm:$0xff]  ;;  %v2691_v26 = vld [vmem:[#allocation6 + $0x16d0] sm:$0xff] }
 0x240   :  { %v2658_v43 = vld [vmem:[#allocation6 + $0x15c8] sm:$0xff] }
 0x241   :  { %5416 = vmatpush1.bf16.msra.mxu0 %v5415_v53  ;;  %v2604_v53 = vld [vmem:[#allocation6 + $0x1418] sm:$0xff] }
 0x242   :  { %5704 = vmatpush1.bf16.msra.mxu1 %v5703_v56  ;;  %5418 = vmatprep.subr.bf16.mxu0 %v5417_v58  ;;  %v2612_v56 = vld [vmem:[#allocation6 + $0x1458] sm:$0xff]  ;;  %v5431_v58 = vpack.c.bf16 %v2593_v48, %v2585_v46  ;;  %v5731_v46 = vpack.c.bf16 %v2643_v42, %v2635_v61  ;;  %v5445_v48 = vpack.c.bf16 %v2658_v43, %v2650_v32  ;;  %v2697_v61 = vld [vmem:[#allocation6 + $0x1700] sm:$0xff]  ;;  %v2699_v42 = vld [vmem:[#allocation6 + $0x1710] sm:$0xff] }
 0x243   :  { %5706 = vmatprep.subr.bf16.mxu1 %v5705_v1  ;;  %v2609_v1 = vld [vmem:[#allocation6 + $0x1440] sm:$0xff]  ;;  %v5721_v55 = vpack.c.bf16 %v2612_v56, %v2604_v53  ;;  %v2666_v53 = vld [vmem:[#allocation6 + $0x1608] sm:$0xff]  ;;  %v2707_v43 = vld [vmem:[#allocation6 + $0x1750] sm:$0xff] }
 0x244   :  { %v2674_v56 = vld [vmem:[#allocation6 + $0x1648] sm:$0xff] }
 0x245   :  { %5420 = vmatpush1.bf16.msra.mxu0 %v5419_v6  ;;  %v2620_v6 = vld [vmem:[#allocation6 + $0x1498] sm:$0xff] }
 0x246   :  { %5708 = vmatpush1.bf16.msra.mxu1 %v5707_v8  ;;  %5422 = vmatprep.subr.bf16.mxu0 %v5421_v9  ;;  %v2628_v8 = vld [vmem:[#allocation6 + $0x14d8] sm:$0xff]  ;;  %v5435_v9 = vpack.c.bf16 %v2609_v1, %v2601_v13  ;;  %v5735_v13 = vpack.c.bf16 %v2659_v52, %v2651_v37  ;;  %v5449_v1 = vpack.c.bf16 %v2674_v56, %v2666_v53  ;;  %v2713_v37 = vld [vmem:[#allocation6 + $0x1780] sm:$0xff]  ;;  %v2715_v52 = vld [vmem:[#allocation6 + $0x1790] sm:$0xff] }
 0x247   :  { %5710 = vmatprep.subr.bf16.mxu1 %v5709_v54  ;;  %v2625_v54 = vld [vmem:[#allocation6 + $0x14c0] sm:$0xff]  ;;  %v5725_v36 = vpack.c.bf16 %v2628_v8, %v2620_v6  ;;  %v2682_v6 = vld [vmem:[#allocation6 + $0x1688] sm:$0xff]  ;;  %v2723_v56 = vld [vmem:[#allocation6 + $0x17d0] sm:$0xff] }
 0x248   :  { %v2690_v8 = vld [vmem:[#allocation6 + $0x16c8] sm:$0xff] }
 0x249   :  { %5424 = vmatpush1.bf16.msra.mxu0 %v5423_v17  ;;  %v2636_v17 = vld [vmem:[#allocation6 + $0x1518] sm:$0xff] }
 0x24a   :  { %5712 = vmatpush1.bf16.msra.mxu1 %v5711_v59  ;;  %5426 = vmatprep.subr.bf16.mxu0 %v5425_v40  ;;  %v2644_v59 = vld [vmem:[#allocation6 + $0x1558] sm:$0xff]  ;;  %v5439_v40 = vpack.c.bf16 %v2625_v54, %v2617_v49  ;;  %v5739_v49 = vpack.c.bf16 %v2675_v5, %v2667_v3  ;;  %v5453_v54 = vpack.c.bf16 %v2690_v8, %v2682_v6  ;;  %v2729_v3 = vld [vmem:[#allocation6 + $0x1800] sm:$0xff]  ;;  %v2731_v6 = vld [vmem:[#allocation6 + $0x1810] sm:$0xff] }
 0x24b   :  { %5714 = vmatprep.subr.bf16.mxu1 %v5713_v30  ;;  %v2641_v30 = vld [vmem:[#allocation6 + $0x1540] sm:$0xff]  ;;  %v5729_v28 = vpack.c.bf16 %v2644_v59, %v2636_v17  ;;  %v2698_v17 = vld [vmem:[#allocation6 + $0x1708] sm:$0xff]  ;;  %v2739_v8 = vld [vmem:[#allocation6 + $0x1850] sm:$0xff] }
 0x24c   :  { %v2706_v59 = vld [vmem:[#allocation6 + $0x1748] sm:$0xff] }
 0x24d   :  { %5428 = vmatpush1.bf16.msra.mxu0 %v5427_v44  ;;  %v2652_v44 = vld [vmem:[#allocation6 + $0x1598] sm:$0xff] }
 0x24e   :  { %5716 = vmatpush1.bf16.msra.mxu1 %v5715_v60  ;;  %5430 = vmatprep.subr.bf16.mxu0 %v5429_v45  ;;  %v2660_v60 = vld [vmem:[#allocation6 + $0x15d8] sm:$0xff]  ;;  %v5443_v45 = vpack.c.bf16 %v2641_v30, %v2633_v27  ;;  %v5743_v27 = vpack.c.bf16 %v2691_v26, %v2683_v11  ;;  %v5457_v30 = vpack.c.bf16 %v2706_v59, %v2698_v17  ;;  %v2753_v11 = vld [vmem:[#allocation6 + $0x18c0] sm:$0xff]  ;;  %v2755_v17 = vld [vmem:[#allocation6 + $0x18d0] sm:$0xff] }
 0x24f   :  { %5718 = vmatprep.subr.bf16.mxu1 %v5717_v33  ;;  %v2657_v33 = vld [vmem:[#allocation6 + $0x15c0] sm:$0xff]  ;;  %v5733_v51 = vpack.c.bf16 %v2660_v60, %v2652_v44  ;;  %v2714_v44 = vld [vmem:[#allocation6 + $0x1788] sm:$0xff] }
 0x250   :  { %v2722_v60 = vld [vmem:[#allocation6 + $0x17c8] sm:$0xff] }
 0x251   :  { %5432 = vmatpush1.bf16.msra.mxu0 %v5431_v58  ;;  %v2668_v58 = vld [vmem:[#allocation6 + $0x1618] sm:$0xff]  ;;  %v2762_v59 = vld [vmem:[#allocation6 + $0x1908] sm:$0xff] }
 0x252   :  { %5720 = vmatpush1.bf16.msra.mxu1 %v5719_v62  ;;  %5434 = vmatprep.subr.bf16.mxu0 %v5433_v31  ;;  %v2676_v62 = vld [vmem:[#allocation6 + $0x1658] sm:$0xff]  ;;  %v5447_v31 = vpack.c.bf16 %v2657_v33, %v2649_v63  ;;  %v5747_v63 = vpack.c.bf16 %v2707_v43, %v2699_v42  ;;  %v5461_v33 = vpack.c.bf16 %v2722_v60, %v2714_v44  ;;  %v2761_v42 = vld [vmem:[#allocation6 + $0x1900] sm:$0xff]  ;;  %v2763_v43 = vld [vmem:[#allocation6 + $0x1910] sm:$0xff] }
 0x253   :  { %5722 = vmatprep.subr.bf16.mxu1 %v5721_v55  ;;  %v2673_v55 = vld [vmem:[#allocation6 + $0x1640] sm:$0xff]  ;;  %v5737_v4 = vpack.c.bf16 %v2676_v62, %v2668_v58  ;;  %v2730_v58 = vld [vmem:[#allocation6 + $0x1808] sm:$0xff]  ;;  %v2771_v60 = vld [vmem:[#allocation6 + $0x1950] sm:$0xff] }
 0x254   :  { %v2738_v62 = vld [vmem:[#allocation6 + $0x1848] sm:$0xff] }
 0x255   :  { %5436 = vmatpush1.bf16.msra.mxu0 %v5435_v9  ;;  %v2684_v9 = vld [vmem:[#allocation6 + $0x1698] sm:$0xff] }
 0x256   :  { %5724 = vmatpush1.bf16.msra.mxu1 %v5723_v15  ;;  %5438 = vmatprep.subr.bf16.mxu0 %v5437_v16  ;;  %v2692_v15 = vld [vmem:[#allocation6 + $0x16d8] sm:$0xff]  ;;  %v5451_v16 = vpack.c.bf16 %v2673_v55, %v2665_v47  ;;  %v5751_v47 = vpack.c.bf16 %v2723_v56, %v2715_v52  ;;  %v5465_v55 = vpack.c.bf16 %v2738_v62, %v2730_v58  ;;  %v2777_v52 = vld [vmem:[#allocation6 + $0x1980] sm:$0xff]  ;;  %v2779_v56 = vld [vmem:[#allocation6 + $0x1990] sm:$0xff] }
 0x257   :  { %5726 = vmatprep.subr.bf16.mxu1 %v5725_v36  ;;  %v2689_v36 = vld [vmem:[#allocation6 + $0x16c0] sm:$0xff]  ;;  %v5741_v25 = vpack.c.bf16 %v2692_v15, %v2684_v9  ;;  %v2746_v9 = vld [vmem:[#allocation6 + $0x1888] sm:$0xff]  ;;  %v2787_v62 = vld [vmem:[#allocation6 + $0x19d0] sm:$0xff] }
 0x258   :  { %v2754_v15 = vld [vmem:[#allocation6 + $0x18c8] sm:$0xff] }
 0x259   :  { %5440 = vmatpush1.bf16.msra.mxu0 %v5439_v40  ;;  %v2700_v40 = vld [vmem:[#allocation6 + $0x1718] sm:$0xff]  ;;  %v5469_v26 = vpack.c.bf16 %v2754_v15, %v2746_v9  ;;  %v2803_v15 = vld [vmem:[#allocation6 + $0x1a50] sm:$0xff] }
 0x25a   :  { %5728 = vmatpush1.bf16.msra.mxu1 %v5727_v50  ;;  %5442 = vmatprep.subr.bf16.mxu0 %v5441_v41  ;;  %v2708_v50 = vld [vmem:[#allocation6 + $0x1758] sm:$0xff]  ;;  %v5455_v41 = vpack.c.bf16 %v2689_v36, %v2681_v22  ;;  %v5755_v22 = vpack.c.bf16 %v2739_v8, %v2731_v6  ;;  %v2745_v36 = vld [vmem:[#allocation6 + $0x1880] sm:$0xff]  ;;  %v2795_v8 = vld [vmem:[#allocation6 + $0x1a10] sm:$0xff] }
 0x25b   :  { %5730 = vmatprep.subr.bf16.mxu1 %v5729_v28  ;;  %v2705_v28 = vld [vmem:[#allocation6 + $0x1740] sm:$0xff]  ;;  %v5745_v32 = vpack.c.bf16 %v2708_v50, %v2700_v40  ;;  %v2770_v40 = vld [vmem:[#allocation6 + $0x1948] sm:$0xff] }
 0x25c   :  { %v2801_v6 = vld [vmem:[#allocation6 + $0x1a40] sm:$0xff] }
 0x25d   :  { %5444 = vmatpush1.bf16.msra.mxu0 %v5443_v45  ;;  %v2716_v45 = vld [vmem:[#allocation6 + $0x1798] sm:$0xff] }
 0x25e   :  { %5732 = vmatpush1.bf16.msra.mxu1 %v5731_v46  ;;  %5446 = vmatprep.subr.bf16.mxu0 %v5445_v48  ;;  %v2724_v46 = vld [vmem:[#allocation6 + $0x17d8] sm:$0xff]  ;;  %v5459_v48 = vpack.c.bf16 %v2705_v28, %v2697_v61  ;;  %v5473_v28 = vpack.c.bf16 %v2770_v40, %v2762_v59  ;;  %v2811_v59 = vld [vmem:[#allocation6 + $0x1a90] sm:$0xff] }
 0x25f   :  { %5734 = vmatprep.subr.bf16.mxu1 %v5733_v51  ;;  %v2721_v51 = vld [vmem:[#allocation6 + $0x17c0] sm:$0xff]  ;;  %v5749_v53 = vpack.c.bf16 %v2724_v46, %v2716_v45  ;;  %v2778_v45 = vld [vmem:[#allocation6 + $0x1988] sm:$0xff] }
 0x260   :  { %v2786_v46 = vld [vmem:[#allocation6 + $0x19c8] sm:$0xff] }
 0x261   :  { %5448 = vmatpush1.bf16.msra.mxu0 %v5447_v31  ;;  %v2732_v31 = vld [vmem:[#allocation6 + $0x1818] sm:$0xff] }
 0x262   :  { %5736 = vmatpush1.bf16.msra.mxu1 %v5735_v13  ;;  %5450 = vmatprep.subr.bf16.mxu0 %v5449_v1  ;;  %v2740_v13 = vld [vmem:[#allocation6 + $0x1858] sm:$0xff]  ;;  %v5463_v1 = vpack.c.bf16 %v2721_v51, %v2713_v37  ;;  %v5763_v37 = vpack.c.bf16 %v2771_v60, %v2763_v43  ;;  %v5477_v51 = vpack.c.bf16 %v2786_v46, %v2778_v45  ;;  %v2825_v43 = vld [vmem:[#allocation6 + $0x1b00] sm:$0xff]  ;;  %v2827_v60 = vld [vmem:[#allocation6 + $0x1b10] sm:$0xff] }
 0x263   :  { %5738 = vmatprep.subr.bf16.mxu1 %v5737_v4  ;;  %v2737_v4 = vld [vmem:[#allocation6 + $0x1840] sm:$0xff]  ;;  %v5753_v5 = vpack.c.bf16 %v2740_v13, %v2732_v31  ;;  %v2794_v31 = vld [vmem:[#allocation6 + $0x1a08] sm:$0xff]  ;;  %v2835_v46 = vld [vmem:[#allocation6 + $0x1b50] sm:$0xff] }
 0x264   :  { %v2802_v13 = vld [vmem:[#allocation6 + $0x1a48] sm:$0xff] }
 0x265   :  { %5452 = vmatpush1.bf16.msra.mxu0 %v5451_v16  ;;  %v5467_v16 = vpack.c.bf16 %v2737_v4, %v2729_v3  ;;  %v5767_v3 = vpack.c.bf16 %v2787_v62, %v2779_v56  ;;  %v5481_v4 = vpack.c.bf16 %v2802_v13, %v2794_v31  ;;  %v2841_v56 = vld [vmem:[#allocation6 + $0x1b80] sm:$0xff]  ;;  %v2843_v62 = vld [vmem:[#allocation6 + $0x1b90] sm:$0xff] }
 0x266   :  { %5740 = vmatpush1.bf16.msra.mxu1 %v5739_v49  ;;  %5454 = vmatprep.subr.bf16.mxu0 %v5453_v54  ;;  %v2748_v49 = vld [vmem:[#allocation6 + $0x1898] sm:$0xff]  ;;  %v2851_v13 = vld [vmem:[#allocation6 + $0x1bd0] sm:$0xff] }
 0x267   :  { %5742 = vmatprep.subr.bf16.mxu1 %v5741_v25  ;;  %v2756_v54 = vld [vmem:[#allocation6 + $0x18d8] sm:$0xff]  ;;  %v2747_v25 = vld [vmem:[#allocation6 + $0x1890] sm:$0xff] }
 0x268   :  { %v5757_v50 = vpack.c.bf16 %v2756_v54, %v2748_v49  ;;  %v5759_v61 = vpack.c.bf16 %v2755_v17, %v2747_v25  ;;  %v2818_v49 = vld [vmem:[#allocation6 + $0x1ac8] sm:$0xff]  ;;  %v2812_v54 = vld [vmem:[#allocation6 + $0x1a98] sm:$0xff]  ;;  %v2817_v17 = vld [vmem:[#allocation6 + $0x1ac0] sm:$0xff] }
 0x269   :  { %5456 = vmatpush1.bf16.msra.mxu0 %v5455_v41  ;;  %v2764_v41 = vld [vmem:[#allocation6 + $0x1918] sm:$0xff] }
 0x26a   :  { %5744 = vmatpush1.bf16.msra.mxu1 %v5743_v27  ;;  %5458 = vmatprep.subr.bf16.mxu0 %v5457_v30  ;;  %v2772_v27 = vld [vmem:[#allocation6 + $0x1958] sm:$0xff]  ;;  %v5471_v30 = vpack.c.bf16 %v2753_v11, %v2745_v36  ;;  %v5771_v11 = vpack.c.bf16 %v2803_v15, %v2795_v8  ;;  %v2857_v8 = vld [vmem:[#allocation6 + $0x1c00] sm:$0xff]  ;;  %v2859_v15 = vld [vmem:[#allocation6 + $0x1c10] sm:$0xff] }
 0x26b   :  { %5746 = vmatprep.subr.bf16.mxu1 %v5745_v32  ;;  %v2769_v32 = vld [vmem:[#allocation6 + $0x1940] sm:$0xff]  ;;  %v5761_v44 = vpack.c.bf16 %v2772_v27, %v2764_v41  ;;  %v2826_v41 = vld [vmem:[#allocation6 + $0x1b08] sm:$0xff] }
 0x26c   :  { %v2834_v27 = vld [vmem:[#allocation6 + $0x1b48] sm:$0xff] }
 0x26d   :  { %5460 = vmatpush1.bf16.msra.mxu0 %v5459_v48  ;;  %v2780_v48 = vld [vmem:[#allocation6 + $0x1998] sm:$0xff] }
 0x26e   :  { %5748 = vmatpush1.bf16.msra.mxu1 %v5747_v63  ;;  %5462 = vmatprep.subr.bf16.mxu0 %v5461_v33  ;;  %v2788_v63 = vld [vmem:[#allocation6 + $0x19d8] sm:$0xff]  ;;  %v5475_v33 = vpack.c.bf16 %v2769_v32, %v2761_v42  ;;  %v5489_v32 = vpack.c.bf16 %v2834_v27, %v2826_v41  ;;  %v2883_v27 = vld [vmem:[#allocation6 + $0x1cd0] sm:$0xff] }
 0x26f   :  { %5750 = vmatprep.subr.bf16.mxu1 %v5749_v53  ;;  %v2785_v53 = vld [vmem:[#allocation6 + $0x19c0] sm:$0xff]  ;;  %v5765_v58 = vpack.c.bf16 %v2788_v63, %v2780_v48  ;;  %v2842_v48 = vld [vmem:[#allocation6 + $0x1b88] sm:$0xff] }
 0x270   :  { %v2850_v63 = vld [vmem:[#allocation6 + $0x1bc8] sm:$0xff] }
 0x271   :  { %5464 = vmatpush1.bf16.msra.mxu0 %v5463_v1  ;;  %v2796_v1 = vld [vmem:[#allocation6 + $0x1a18] sm:$0xff] }
 0x272   :  { %5752 = vmatpush1.bf16.msra.mxu1 %v5751_v47  ;;  %5466 = vmatprep.subr.bf16.mxu0 %v5465_v55  ;;  %v2804_v47 = vld [vmem:[#allocation6 + $0x1a58] sm:$0xff]  ;;  %v5479_v55 = vpack.c.bf16 %v2785_v53, %v2777_v52  ;;  %v5779_v52 = vpack.c.bf16 %v2835_v46, %v2827_v60  ;;  %v5493_v53 = vpack.c.bf16 %v2850_v63, %v2842_v48  ;;  %v2889_v60 = vld [vmem:[#allocation6 + $0x1d00] sm:$0xff]  ;;  %v2891_v46 = vld [vmem:[#allocation6 + $0x1d10] sm:$0xff] }
 0x273   :  { %5754 = vmatprep.subr.bf16.mxu1 %v5753_v5  ;;  %v2793_v5 = vld [vmem:[#allocation6 + $0x1a00] sm:$0xff]  ;;  %v5769_v9 = vpack.c.bf16 %v2804_v47, %v2796_v1  ;;  %v2858_v1 = vld [vmem:[#allocation6 + $0x1c08] sm:$0xff]  ;;  %v2899_v63 = vld [vmem:[#allocation6 + $0x1d50] sm:$0xff] }
 0x274   :  { %3362 = vmatmul.mubr.f32.vlgmr.msra.gmra.mrb[18].mxu0 %v7049_v38  ;;  %v5483_v36 = vpack.c.bf16 %v2801_v6, %v2793_v5  ;;  %v2866_v47 = vld [vmem:[#allocation6 + $0x1c48] sm:$0xff]  ;;  %v5783_v5 = vpack.c.bf16 %v2851_v13, %v2843_v62  ;;  %v2905_v62 = vld [vmem:[#allocation6 + $0x1d80] sm:$0xff]  ;;  %v2907_v13 = vld [vmem:[#allocation6 + $0x1d90] sm:$0xff] }
 0x275   :  { %3717 = vmatmul.mubr.f32.vlgmr.msra.gmra.mrb[18].mxu1 %v7049_v38  ;;  %5468 = vmatpush1.bf16.msra.mxu0 %v5467_v16  ;;  %v2810_v16 = vld [vmem:[#allocation6 + $0x1a88] sm:$0xff]  ;;  %v5497_v6 = vpack.c.bf16 %v2866_v47, %v2858_v1  ;;  %v2915_v47 = vld [vmem:[#allocation6 + $0x1dd0] sm:$0xff] }
 0x276   :  { %3432 = vmatprep.mubr.f32.mxu0 %v7069_v2  ;;  %5756 = vmatpush1.bf16.msra.mxu1 %v5755_v22  ;;  %v2820_v22 = vld [vmem:[#allocation6 + $0x1ad8] sm:$0xff]  ;;  %v5485_v25 = vpack.c.bf16 %v2818_v49, %v2810_v16  ;;  %v2867_v49 = vld [vmem:[#allocation6 + $0x1c50] sm:$0xff] }
 0x277   :  { %3787 = vmatprep.mubr.f32.mxu1 %v7069_v2  ;;  %5470 = vmatprep.subr.bf16.mxu0 %v5469_v26  ;;  %v2809_v26 = vld [vmem:[#allocation6 + $0x1a80] sm:$0xff]  ;;  %v5773_v40 = vpack.c.bf16 %v2820_v22, %v2812_v54  ;;  %v2874_v54 = vld [vmem:[#allocation6 + $0x1c88] sm:$0xff] }
 0x278   :  { %5758 = vmatprep.subr.bf16.mxu1 %v5757_v50  ;;  %v2819_v50 = vld [vmem:[#allocation6 + $0x1ad0] sm:$0xff]  ;;  %v2882_v22 = vld [vmem:[#allocation6 + $0x1cc8] sm:$0xff] }
 0x279   :  { %5472 = vmatpush1.bf16.msra.mxu0 %v5471_v30  ;;  %v2828_v30 = vld [vmem:[#allocation6 + $0x1b18] sm:$0xff]  ;;  %v5775_v42 = vpack.c.bf16 %v2819_v50, %v2811_v59  ;;  %v2873_v59 = vld [vmem:[#allocation6 + $0x1c80] sm:$0xff]  ;;  %v2875_v50 = vld [vmem:[#allocation6 + $0x1c90] sm:$0xff] }
 0x27a   :  { %5760 = vmatpush1.bf16.msra.mxu1 %v5759_v61  ;;  %5474 = vmatprep.subr.bf16.mxu0 %v5473_v28  ;;  %v2836_v61 = vld [vmem:[#allocation6 + $0x1b58] sm:$0xff]  ;;  %v5487_v28 = vpack.c.bf16 %v2817_v17, %v2809_v26  ;;  %v5787_v26 = vpack.c.bf16 %v2867_v49, %v2859_v15  ;;  %v5501_v17 = vpack.c.bf16 %v2882_v22, %v2874_v54  ;;  %v2921_v15 = vld [vmem:[#allocation6 + $0x1e00] sm:$0xff]  ;;  %v2923_v49 = vld [vmem:[#allocation6 + $0x1e10] sm:$0xff] }
 0x27b   :  { %5762 = vmatprep.subr.bf16.mxu1 %v5761_v44  ;;  %v2833_v44 = vld [vmem:[#allocation6 + $0x1b40] sm:$0xff]  ;;  %v5777_v45 = vpack.c.bf16 %v2836_v61, %v2828_v30  ;;  %v2890_v30 = vld [vmem:[#allocation6 + $0x1d08] sm:$0xff]  ;;  %v2931_v22 = vld [vmem:[#allocation6 + $0x1e50] sm:$0xff] }
 0x27c   :  { %v2898_v61 = vld [vmem:[#allocation6 + $0x1d48] sm:$0xff] }
 0x27d   :  { %5476 = vmatpush1.bf16.msra.mxu0 %v5475_v33  ;;  %v2844_v33 = vld [vmem:[#allocation6 + $0x1b98] sm:$0xff] }
 0x27e   :  { %5764 = vmatpush1.bf16.msra.mxu1 %v5763_v37  ;;  %5478 = vmatprep.subr.bf16.mxu0 %v5477_v51  ;;  %v2852_v37 = vld [vmem:[#allocation6 + $0x1bd8] sm:$0xff]  ;;  %v5491_v51 = vpack.c.bf16 %v2833_v44, %v2825_v43  ;;  %v5791_v43 = vpack.c.bf16 %v2883_v27, %v2875_v50  ;;  %v5505_v44 = vpack.c.bf16 %v2898_v61, %v2890_v30  ;;  %v2937_v50 = vld [vmem:[#allocation6 + $0x1e80] sm:$0xff]  ;;  %v2939_v27 = vld [vmem:[#allocation6 + $0x1e90] sm:$0xff] }
 0x27f   :  { %5766 = vmatprep.subr.bf16.mxu1 %v5765_v58  ;;  %v2849_v58 = vld [vmem:[#allocation6 + $0x1bc0] sm:$0xff]  ;;  %v5781_v31 = vpack.c.bf16 %v2852_v37, %v2844_v33  ;;  %v2906_v33 = vld [vmem:[#allocation6 + $0x1d88] sm:$0xff]  ;;  %v2947_v61 = vld [vmem:[#allocation6 + $0x1ed0] sm:$0xff] }
 0x280   :  { %v2914_v37 = vld [vmem:[#allocation6 + $0x1dc8] sm:$0xff] }
 0x281   :  { %5480 = vmatpush1.bf16.msra.mxu0 %v5479_v55  ;;  %v2860_v55 = vld [vmem:[#allocation6 + $0x1c18] sm:$0xff] }
 0x282   :  { %5768 = vmatpush1.bf16.msra.mxu1 %v5767_v3  ;;  %5482 = vmatprep.subr.bf16.mxu0 %v5481_v4  ;;  %v2868_v3 = vld [vmem:[#allocation6 + $0x1c58] sm:$0xff]  ;;  %v5495_v4 = vpack.c.bf16 %v2849_v58, %v2841_v56  ;;  %v5795_v56 = vpack.c.bf16 %v2899_v63, %v2891_v46  ;;  %v5509_v58 = vpack.c.bf16 %v2914_v37, %v2906_v33  ;;  %v2953_v46 = vld [vmem:[#allocation6 + $0x1f00] sm:$0xff]  ;;  %v2955_v63 = vld [vmem:[#allocation6 + $0x1f10] sm:$0xff] }
 0x283   :  { %5770 = vmatprep.subr.bf16.mxu1 %v5769_v9  ;;  %v2865_v9 = vld [vmem:[#allocation6 + $0x1c40] sm:$0xff]  ;;  %v5785_v16 = vpack.c.bf16 %v2868_v3, %v2860_v55  ;;  %v2922_v55 = vld [vmem:[#allocation6 + $0x1e08] sm:$0xff]  ;;  %v2963_v37 = vld [vmem:[#allocation6 + $0x1f50] sm:$0xff] }
 0x284   :  { %v2930_v3 = vld [vmem:[#allocation6 + $0x1e48] sm:$0xff] }
 0x285   :  { %5484 = vmatpush1.bf16.msra.mxu0 %v5483_v36  ;;  %v2876_v36 = vld [vmem:[#allocation6 + $0x1c98] sm:$0xff] }
 0x286   :  { %5772 = vmatpush1.bf16.msra.mxu1 %v5771_v11  ;;  %5486 = vmatprep.subr.bf16.mxu0 %v5485_v25  ;;  %v2884_v11 = vld [vmem:[#allocation6 + $0x1cd8] sm:$0xff]  ;;  %v5499_v25 = vpack.c.bf16 %v2865_v9, %v2857_v8  ;;  %v5799_v8 = vpack.c.bf16 %v2915_v47, %v2907_v13  ;;  %v5513_v9 = vpack.c.bf16 %v2930_v3, %v2922_v55  ;;  %v2969_v13 = vld [vmem:[#allocation6 + $0x1f80] sm:$0xff]  ;;  %v2971_v47 = vld [vmem:[#allocation6 + $0x1f90] sm:$0xff] }
 0x287   :  { %5774 = vmatprep.subr.bf16.mxu1 %v5773_v40  ;;  %v2881_v40 = vld [vmem:[#allocation6 + $0x1cc0] sm:$0xff]  ;;  %v5789_v41 = vpack.c.bf16 %v2884_v11, %v2876_v36  ;;  %v2938_v36 = vld [vmem:[#allocation6 + $0x1e88] sm:$0xff]  ;;  %v2979_v3 = vld [vmem:[#allocation6 + $0x1fd0] sm:$0xff] }
 0x288   :  { %v2946_v11 = vld [vmem:[#allocation6 + $0x1ec8] sm:$0xff] }
 0x289   :  { %5488 = vmatpush1.bf16.msra.mxu0 %v5487_v28  ;;  %v2892_v28 = vld [vmem:[#allocation6 + $0x1d18] sm:$0xff] }
 0x28a   :  { %5776 = vmatpush1.bf16.msra.mxu1 %v5775_v42  ;;  %5490 = vmatprep.subr.bf16.mxu0 %v5489_v32  ;;  %v2900_v42 = vld [vmem:[#allocation6 + $0x1d58] sm:$0xff]  ;;  %v5503_v32 = vpack.c.bf16 %v2881_v40, %v2873_v59  ;;  %v5803_v59 = vpack.c.bf16 %v2931_v22, %v2923_v49  ;;  %v5517_v40 = vpack.c.bf16 %v2946_v11, %v2938_v36  ;;  %v2985_v49 = vld [vmem:[#allocation6 + $0x2000] sm:$0xff]  ;;  %v2987_v22 = vld [vmem:[#allocation6 + $0x2010] sm:$0xff] }
 0x28b   :  { %5778 = vmatprep.subr.bf16.mxu1 %v5777_v45  ;;  %v2897_v45 = vld [vmem:[#allocation6 + $0x1d40] sm:$0xff]  ;;  %v5793_v48 = vpack.c.bf16 %v2900_v42, %v2892_v28  ;;  %v2954_v28 = vld [vmem:[#allocation6 + $0x1f08] sm:$0xff]  ;;  %v2995_v11 = vld [vmem:[#allocation6 + $0x2050] sm:$0xff] }
 0x28c   :  { %v2962_v42 = vld [vmem:[#allocation6 + $0x1f48] sm:$0xff] }
 0x28d   :  { %5492 = vmatpush1.bf16.msra.mxu0 %v5491_v51  ;;  %v2908_v51 = vld [vmem:[#allocation6 + $0x1d98] sm:$0xff] }
 0x28e   :  { %5780 = vmatpush1.bf16.msra.mxu1 %v5779_v52  ;;  %5494 = vmatprep.subr.bf16.mxu0 %v5493_v53  ;;  %v2916_v52 = vld [vmem:[#allocation6 + $0x1dd8] sm:$0xff]  ;;  %v5507_v53 = vpack.c.bf16 %v2897_v45, %v2889_v60  ;;  %v5807_v60 = vpack.c.bf16 %v2947_v61, %v2939_v27  ;;  %v5521_v45 = vpack.c.bf16 %v2962_v42, %v2954_v28  ;;  %v3001_v27 = vld [vmem:[#allocation6 + $0x2080] sm:$0xff]  ;;  %v3003_v61 = vld [vmem:[#allocation6 + $0x2090] sm:$0xff] }
 0x28f   :  { %5782 = vmatprep.subr.bf16.mxu1 %v5781_v31  ;;  %v2913_v31 = vld [vmem:[#allocation6 + $0x1dc0] sm:$0xff]  ;;  %v5797_v1 = vpack.c.bf16 %v2916_v52, %v2908_v51  ;;  %v2970_v51 = vld [vmem:[#allocation6 + $0x1f88] sm:$0xff]  ;;  %v3011_v42 = vld [vmem:[#allocation6 + $0x20d0] sm:$0xff] }
 0x290   :  { %v2978_v52 = vld [vmem:[#allocation6 + $0x1fc8] sm:$0xff] }
 0x291   :  { %5496 = vmatpush1.bf16.msra.mxu0 %v5495_v4  ;;  %v2924_v4 = vld [vmem:[#allocation6 + $0x1e18] sm:$0xff] }
 0x292   :  { %5784 = vmatpush1.bf16.msra.mxu1 %v5783_v5  ;;  %5498 = vmatprep.subr.bf16.mxu0 %v5497_v6  ;;  %v2932_v5 = vld [vmem:[#allocation6 + $0x1e58] sm:$0xff]  ;;  %v5511_v6 = vpack.c.bf16 %v2913_v31, %v2905_v62  ;;  %v5811_v62 = vpack.c.bf16 %v2963_v37, %v2955_v63  ;;  %v5525_v31 = vpack.c.bf16 %v2978_v52, %v2970_v51  ;;  %v3017_v63 = vld [vmem:[#allocation6 + $0x2100] sm:$0xff]  ;;  %v3019_v37 = vld [vmem:[#allocation6 + $0x2110] sm:$0xff] }
 0x293   :  { %5786 = vmatprep.subr.bf16.mxu1 %v5785_v16  ;;  %v2929_v16 = vld [vmem:[#allocation6 + $0x1e40] sm:$0xff]  ;;  %v5801_v54 = vpack.c.bf16 %v2932_v5, %v2924_v4  ;;  %v2986_v4 = vld [vmem:[#allocation6 + $0x2008] sm:$0xff]  ;;  %v3027_v52 = vld [vmem:[#allocation6 + $0x2150] sm:$0xff] }
 0x294   :  { %v2994_v5 = vld [vmem:[#allocation6 + $0x2048] sm:$0xff] }
 0x295   :  { %5500 = vmatpush1.bf16.msra.mxu0 %v5499_v25  ;;  %v2940_v25 = vld [vmem:[#allocation6 + $0x1e98] sm:$0xff] }
 0x296   :  { %5788 = vmatpush1.bf16.msra.mxu1 %v5787_v26  ;;  %5502 = vmatprep.subr.bf16.mxu0 %v5501_v17  ;;  %v2948_v26 = vld [vmem:[#allocation6 + $0x1ed8] sm:$0xff]  ;;  %v5515_v17 = vpack.c.bf16 %v2929_v16, %v2921_v15  ;;  %v5815_v15 = vpack.c.bf16 %v2979_v3, %v2971_v47  ;;  %v5529_v16 = vpack.c.bf16 %v2994_v5, %v2986_v4  ;;  %v3033_v47 = vld [vmem:[#allocation6 + $0x2180] sm:$0xff]  ;;  %v3035_v3 = vld [vmem:[#allocation6 + $0x2190] sm:$0xff] }
 0x297   :  { %5790 = vmatprep.subr.bf16.mxu1 %v5789_v41  ;;  %v2945_v41 = vld [vmem:[#allocation6 + $0x1ec0] sm:$0xff]  ;;  %v5805_v30 = vpack.c.bf16 %v2948_v26, %v2940_v25  ;;  %v3002_v25 = vld [vmem:[#allocation6 + $0x2088] sm:$0xff]  ;;  %v3043_v5 = vld [vmem:[#allocation6 + $0x21d0] sm:$0xff] }
 0x298   :  { %v3010_v26 = vld [vmem:[#allocation6 + $0x20c8] sm:$0xff] }
 0x299   :  { %5504 = vmatpush1.bf16.msra.mxu0 %v5503_v32  ;;  %v2956_v32 = vld [vmem:[#allocation6 + $0x1f18] sm:$0xff] }
 0x29a   :  { %5792 = vmatpush1.bf16.msra.mxu1 %v5791_v43  ;;  %5506 = vmatprep.subr.bf16.mxu0 %v5505_v44  ;;  %v2964_v43 = vld [vmem:[#allocation6 + $0x1f58] sm:$0xff]  ;;  %v5519_v44 = vpack.c.bf16 %v2945_v41, %v2937_v50  ;;  %v5819_v50 = vpack.c.bf16 %v2995_v11, %v2987_v22  ;;  %v5533_v41 = vpack.c.bf16 %v3010_v26, %v3002_v25  ;;  %v3049_v22 = vld [vmem:[#allocation6 + $0x2200] sm:$0xff]  ;;  %v3051_v11 = vld [vmem:[#allocation6 + $0x2210] sm:$0xff] }
 0x29b   :  { %5794 = vmatprep.subr.bf16.mxu1 %v5793_v48  ;;  %v2961_v48 = vld [vmem:[#allocation6 + $0x1f40] sm:$0xff]  ;;  %v5809_v33 = vpack.c.bf16 %v2964_v43, %v2956_v32  ;;  %v3018_v32 = vld [vmem:[#allocation6 + $0x2108] sm:$0xff]  ;;  %v3059_v26 = vld [vmem:[#allocation6 + $0x2250] sm:$0xff] }
 0x29c   :  { %v3026_v43 = vld [vmem:[#allocation6 + $0x2148] sm:$0xff] }
 0x29d   :  { %5508 = vmatpush1.bf16.msra.mxu0 %v5507_v53  ;;  %v2972_v53 = vld [vmem:[#allocation6 + $0x1f98] sm:$0xff] }
 0x29e   :  { %5796 = vmatpush1.bf16.msra.mxu1 %v5795_v56  ;;  %5510 = vmatprep.subr.bf16.mxu0 %v5509_v58  ;;  %v2980_v56 = vld [vmem:[#allocation6 + $0x1fd8] sm:$0xff]  ;;  %v5523_v58 = vpack.c.bf16 %v2961_v48, %v2953_v46  ;;  %v5823_v46 = vpack.c.bf16 %v3011_v42, %v3003_v61  ;;  %v5537_v48 = vpack.c.bf16 %v3026_v43, %v3018_v32  ;;  %v3065_v61 = vld [vmem:[#allocation6 + $0x2280] sm:$0xff]  ;;  %v3067_v42 = vld [vmem:[#allocation6 + $0x2290] sm:$0xff] }
 0x29f   :  { %5798 = vmatprep.subr.bf16.mxu1 %v5797_v1  ;;  %v2977_v1 = vld [vmem:[#allocation6 + $0x1fc0] sm:$0xff]  ;;  %v5813_v55 = vpack.c.bf16 %v2980_v56, %v2972_v53  ;;  %v3034_v53 = vld [vmem:[#allocation6 + $0x2188] sm:$0xff]  ;;  %v3075_v43 = vld [vmem:[#allocation6 + $0x22d0] sm:$0xff] }
 0x2a0   :  { %v3042_v56 = vld [vmem:[#allocation6 + $0x21c8] sm:$0xff] }
 0x2a1   :  { %5512 = vmatpush1.bf16.msra.mxu0 %v5511_v6  ;;  %v2988_v6 = vld [vmem:[#allocation6 + $0x2018] sm:$0xff] }
 0x2a2   :  { %5800 = vmatpush1.bf16.msra.mxu1 %v5799_v8  ;;  %5514 = vmatprep.subr.bf16.mxu0 %v5513_v9  ;;  %v2996_v8 = vld [vmem:[#allocation6 + $0x2058] sm:$0xff]  ;;  %v5527_v9 = vpack.c.bf16 %v2977_v1, %v2969_v13  ;;  %v5827_v13 = vpack.c.bf16 %v3027_v52, %v3019_v37  ;;  %v5541_v1 = vpack.c.bf16 %v3042_v56, %v3034_v53  ;;  %v3081_v37 = vld [vmem:[#allocation6 + $0x2300] sm:$0xff]  ;;  %v3083_v52 = vld [vmem:[#allocation6 + $0x2310] sm:$0xff] }
 0x2a3   :  { %5802 = vmatprep.subr.bf16.mxu1 %v5801_v54  ;;  %v2993_v54 = vld [vmem:[#allocation6 + $0x2040] sm:$0xff]  ;;  %v5817_v36 = vpack.c.bf16 %v2996_v8, %v2988_v6  ;;  %v3050_v6 = vld [vmem:[#allocation6 + $0x2208] sm:$0xff]  ;;  %v3091_v56 = vld [vmem:[#allocation6 + $0x2350] sm:$0xff] }
 0x2a4   :  { %v3058_v8 = vld [vmem:[#allocation6 + $0x2248] sm:$0xff] }
 0x2a5   :  { %5516 = vmatpush1.bf16.msra.mxu0 %v5515_v17  ;;  %v3004_v17 = vld [vmem:[#allocation6 + $0x2098] sm:$0xff] }
 0x2a6   :  { %5804 = vmatpush1.bf16.msra.mxu1 %v5803_v59  ;;  %5518 = vmatprep.subr.bf16.mxu0 %v5517_v40  ;;  %v3012_v59 = vld [vmem:[#allocation6 + $0x20d8] sm:$0xff]  ;;  %v5531_v40 = vpack.c.bf16 %v2993_v54, %v2985_v49  ;;  %v5831_v49 = vpack.c.bf16 %v3043_v5, %v3035_v3  ;;  %v5545_v54 = vpack.c.bf16 %v3058_v8, %v3050_v6  ;;  %v3097_v3 = vld [vmem:[#allocation6 + $0x2380] sm:$0xff]  ;;  %v3099_v5 = vld [vmem:[#allocation6 + $0x2390] sm:$0xff] }
 0x2a7   :  { %5806 = vmatprep.subr.bf16.mxu1 %v5805_v30  ;;  %v3009_v30 = vld [vmem:[#allocation6 + $0x20c0] sm:$0xff]  ;;  %v5821_v28 = vpack.c.bf16 %v3012_v59, %v3004_v17  ;;  %v3066_v17 = vld [vmem:[#allocation6 + $0x2288] sm:$0xff]  ;;  %v3107_v8 = vld [vmem:[#allocation6 + $0x23d0] sm:$0xff] }
 0x2a8   :  { %v3074_v59 = vld [vmem:[#allocation6 + $0x22c8] sm:$0xff] }
 0x2a9   :  { %5520 = vmatpush1.bf16.msra.mxu0 %v5519_v44  ;;  %v3020_v44 = vld [vmem:[#allocation6 + $0x2118] sm:$0xff] }
 0x2aa   :  { %5808 = vmatpush1.bf16.msra.mxu1 %v5807_v60  ;;  %5522 = vmatprep.subr.bf16.mxu0 %v5521_v45  ;;  %v3028_v60 = vld [vmem:[#allocation6 + $0x2158] sm:$0xff]  ;;  %v5535_v45 = vpack.c.bf16 %v3009_v30, %v3001_v27  ;;  %v5835_v27 = vpack.c.bf16 %v3059_v26, %v3051_v11  ;;  %v5549_v30 = vpack.c.bf16 %v3074_v59, %v3066_v17  ;;  %v1965_v11 = vld [vmem:[#allocation6 + $0x20] sm:$0xff]  ;;  %v1967_v17 = vld [vmem:[#allocation6 + $0x30] sm:$0xff] }
 0x2ab   :  { %5810 = vmatprep.subr.bf16.mxu1 %v5809_v33  ;;  %v3025_v33 = vld [vmem:[#allocation6 + $0x2140] sm:$0xff]  ;;  %v5825_v51 = vpack.c.bf16 %v3028_v60, %v3020_v44  ;;  %v3082_v44 = vld [vmem:[#allocation6 + $0x2308] sm:$0xff]  ;;  %v1975_v59 = vld [vmem:[#allocation6 + $0x70] sm:$0xff] }
 0x2ac   :  { %v3090_v60 = vld [vmem:[#allocation6 + $0x2348] sm:$0xff] }
 0x2ad   :  { %5524 = vmatpush1.bf16.msra.mxu0 %v5523_v58  ;;  %v3036_v58 = vld [vmem:[#allocation6 + $0x2198] sm:$0xff] }
 0x2ae   :  { %5812 = vmatpush1.bf16.msra.mxu1 %v5811_v62  ;;  %5526 = vmatprep.subr.bf16.mxu0 %v5525_v31  ;;  %v3044_v62 = vld [vmem:[#allocation6 + $0x21d8] sm:$0xff]  ;;  %v5539_v31 = vpack.c.bf16 %v3025_v33, %v3017_v63  ;;  %v5839_v63 = vpack.c.bf16 %v3075_v43, %v3067_v42  ;;  %v5553_v33 = vpack.c.bf16 %v3090_v60, %v3082_v44  ;;  %v1989_v42 = vld [vmem:[#allocation6 + $0xe0] sm:$0xff]  ;;  %v1991_v44 = vld [vmem:[#allocation6 + $0xf0] sm:$0xff] }
 0x2af   :  { %5814 = vmatprep.subr.bf16.mxu1 %v5813_v55  ;;  %v3041_v55 = vld [vmem:[#allocation6 + $0x21c0] sm:$0xff]  ;;  %v5829_v4 = vpack.c.bf16 %v3044_v62, %v3036_v58  ;;  %v3098_v58 = vld [vmem:[#allocation6 + $0x2388] sm:$0xff] }
 0x2b0   :  { %v3106_v62 = vld [vmem:[#allocation6 + $0x23c8] sm:$0xff] }
 0x2b1   :  { %5528 = vmatpush1.bf16.msra.mxu0 %v5527_v9  ;;  %v3052_v9 = vld [vmem:[#allocation6 + $0x2218] sm:$0xff]  ;;  %v1998_v60 = vld [vmem:[#allocation6 + $0x128] sm:$0xff] }
 0x2b2   :  { %5816 = vmatpush1.bf16.msra.mxu1 %v5815_v15  ;;  %5530 = vmatprep.subr.bf16.mxu0 %v5529_v16  ;;  %v3060_v15 = vld [vmem:[#allocation6 + $0x2258] sm:$0xff]  ;;  %v5543_v16 = vpack.c.bf16 %v3041_v55, %v3033_v47  ;;  %v5843_v47 = vpack.c.bf16 %v3091_v56, %v3083_v52  ;;  %v5557_v55 = vpack.c.bf16 %v3106_v62, %v3098_v58  ;;  %v1997_v52 = vld [vmem:[#allocation6 + $0x120] sm:$0xff]  ;;  %v1999_v56 = vld [vmem:[#allocation6 + $0x130] sm:$0xff] }
 0x2b3   :  { %5818 = vmatprep.subr.bf16.mxu1 %v5817_v36  ;;  %v3057_v36 = vld [vmem:[#allocation6 + $0x2240] sm:$0xff]  ;;  %v5833_v25 = vpack.c.bf16 %v3060_v15, %v3052_v9  ;;  %v1966_v9 = vld [vmem:[#allocation6 + $0x28] sm:$0xff]  ;;  %v2007_v62 = vld [vmem:[#allocation6 + $0x170] sm:$0xff] }
 0x2b4   :  { %3433 = vmatmul.mubr.f32.vlgmr.msra.gmra.mrb[18].mxu0 %v7072_v12  ;;  %v1974_v15 = vld [vmem:[#allocation6 + $0x68] sm:$0xff] }
 0x2b5   :  { %3788 = vmatmul.mubr.f32.vlgmr.msra.gmra.mrb[18].mxu1 %v7072_v12  ;;  %5532 = vmatpush1.bf16.msra.mxu0 %v5531_v40  ;;  %v3068_v40 = vld [vmem:[#allocation6 + $0x2298] sm:$0xff] }
 0x2b6   :  { %5820 = vmatpush1.bf16.msra.mxu1 %v5819_v50  ;;  %5534 = vmatprep.subr.bf16.mxu0 %v5533_v41  ;;  %v3076_v50 = vld [vmem:[#allocation6 + $0x22d8] sm:$0xff]  ;;  %v5547_v41 = vpack.c.bf16 %v3057_v36, %v3049_v22  ;;  %v5847_v22 = vpack.c.bf16 %v3107_v8, %v3099_v5  ;;  %v5849_v36 = vpack.c.bf16 %v1974_v15, %v1966_v9  ;;  %v2013_v5 = vld [vmem:[#allocation6 + $0x1a0] sm:$0xff]  ;;  %v2015_v8 = vld [vmem:[#allocation6 + $0x1b0] sm:$0xff] }
 0x2b7   :  { %5822 = vmatprep.subr.bf16.mxu1 %v5821_v28  ;;  %3503 = vmatprep.mubr.f32.mxu0 %v6733_v0  ;;  %v3073_v28 = vld [vmem:[#allocation6 + $0x22c0] sm:$0xff]  ;;  %v5837_v32 = vpack.c.bf16 %v3076_v50, %v3068_v40  ;;  %v1982_v40 = vld [vmem:[#allocation6 + $0xa8] sm:$0xff] }
 0x2b8   :  { %3858 = vmatprep.mubr.f32.mxu1 %v6733_v0  ;;  %v1990_v50 = vld [vmem:[#allocation6 + $0xe8] sm:$0xff] }
 0x2b9   :  { %5536 = vmatpush1.bf16.msra.mxu0 %v5535_v45  ;;  %v3084_v45 = vld [vmem:[#allocation6 + $0x2318] sm:$0xff]  ;;  %v5853_v43 = vpack.c.bf16 %v1990_v50, %v1982_v40  ;;  %v2030_v15 = vld [vmem:[#allocation6 + $0x228] sm:$0xff]  ;;  %v2039_v40 = vld [vmem:[#allocation6 + $0x270] sm:$0xff] }
 0x2ba   :  { %5824 = vmatpush1.bf16.msra.mxu1 %v5823_v46  ;;  %5538 = vmatprep.subr.bf16.mxu0 %v5537_v48  ;;  %v3092_v46 = vld [vmem:[#allocation6 + $0x2358] sm:$0xff]  ;;  %v5551_v48 = vpack.c.bf16 %v3073_v28, %v3065_v61  ;;  %v6139_v61 = vpack.c.bf16 %v1975_v59, %v1967_v17  ;;  %v1981_v28 = vld [vmem:[#allocation6 + $0xa0] sm:$0xff]  ;;  %v2031_v17 = vld [vmem:[#allocation6 + $0x230] sm:$0xff] }
 0x2bb   :  { %5826 = vmatprep.subr.bf16.mxu1 %v5825_v51  ;;  %v3089_v51 = vld [vmem:[#allocation6 + $0x2340] sm:$0xff]  ;;  %v5841_v53 = vpack.c.bf16 %v3092_v46, %v3084_v45  ;;  %v2006_v45 = vld [vmem:[#allocation6 + $0x168] sm:$0xff] }
 0x2bc   :  { %v2046_v50 = vld [vmem:[#allocation6 + $0x2a8] sm:$0xff] }
 0x2bd   :  { %5540 = vmatpush1.bf16.msra.mxu0 %v5539_v31  ;;  %v3100_v31 = vld [vmem:[#allocation6 + $0x2398] sm:$0xff] }
 0x2be   :  { %5828 = vmatpush1.bf16.msra.mxu1 %v5827_v13  ;;  %5542 = vmatprep.subr.bf16.mxu0 %v5541_v1  ;;  %v3108_v13 = vld [vmem:[#allocation6 + $0x23d8] sm:$0xff]  ;;  %v5555_v1 = vpack.c.bf16 %v3089_v51, %v3081_v37  ;;  %v5857_v51 = vpack.c.bf16 %v2006_v45, %v1998_v60  ;;  %v2055_v45 = vld [vmem:[#allocation6 + $0x2f0] sm:$0xff] }
 0x2bf   :  { %5830 = vmatprep.subr.bf16.mxu1 %v5829_v4  ;;  %v3105_v4 = vld [vmem:[#allocation6 + $0x23c0] sm:$0xff]  ;;  %v5845_v6 = vpack.c.bf16 %v3108_v13, %v3100_v31  ;;  %v2014_v31 = vld [vmem:[#allocation6 + $0x1a8] sm:$0xff] }
 0x2c0   :  { %v2022_v13 = vld [vmem:[#allocation6 + $0x1e8] sm:$0xff] }
 0x2c1   :  { %5544 = vmatpush1.bf16.msra.mxu0 %v5543_v16  ;;  %v1968_v16 = vld [vmem:[#allocation6 + $0x38] sm:$0xff] }
 0x2c2   :  { %5832 = vmatpush1.bf16.msra.mxu1 %v5831_v49  ;;  %5546 = vmatprep.subr.bf16.mxu0 %v5545_v54  ;;  %v1976_v49 = vld [vmem:[#allocation6 + $0x78] sm:$0xff]  ;;  %v5559_v54 = vpack.c.bf16 %v3105_v4, %v3097_v3  ;;  %v6147_v3 = vpack.c.bf16 %v2007_v62, %v1999_v56  ;;  %v5861_v4 = vpack.c.bf16 %v2022_v13, %v2014_v31  ;;  %v2069_v56 = vld [vmem:[#allocation6 + $0x360] sm:$0xff]  ;;  %v2071_v31 = vld [vmem:[#allocation6 + $0x370] sm:$0xff] }
 0x2c3   :  { %5834 = vmatprep.subr.bf16.mxu1 %v5833_v25  ;;  %v1973_v25 = vld [vmem:[#allocation6 + $0x60] sm:$0xff]  ;;  %v6137_v26 = vpack.c.bf16 %v1976_v49, %v1968_v16  ;;  %v2038_v16 = vld [vmem:[#allocation6 + $0x268] sm:$0xff]  ;;  %v2032_v49 = vld [vmem:[#allocation6 + $0x238] sm:$0xff] }
 0x2c4   :  { %v2078_v13 = vld [vmem:[#allocation6 + $0x3a8] sm:$0xff] }
 0x2c5   :  { %5548 = vmatpush1.bf16.msra.mxu0 %v5547_v41  ;;  %v5851_v41 = vpack.c.bf16 %v1973_v25, %v1965_v11  ;;  %v5865_v11 = vpack.c.bf16 %v2038_v16, %v2030_v15  ;;  %v2029_v25 = vld [vmem:[#allocation6 + $0x220] sm:$0xff]  ;;  %v2087_v15 = vld [vmem:[#allocation6 + $0x3f0] sm:$0xff]  ;;  %v2094_v16 = vld [vmem:[#allocation6 + $0x428] sm:$0xff] }
 0x2c6   :  { %5836 = vmatpush1.bf16.msra.mxu1 %v5835_v27  ;;  %5550 = vmatprep.subr.bf16.mxu0 %v5549_v30  ;;  %v1984_v27 = vld [vmem:[#allocation6 + $0xb8] sm:$0xff] }
 0x2c7   :  { %5838 = vmatprep.subr.bf16.mxu1 %v5837_v32  ;;  %v1992_v30 = vld [vmem:[#allocation6 + $0xf8] sm:$0xff]  ;;  %v1983_v32 = vld [vmem:[#allocation6 + $0xb0] sm:$0xff] }
 0x2c8   :  { %v6141_v46 = vpack.c.bf16 %v1992_v30, %v1984_v27  ;;  %v6143_v37 = vpack.c.bf16 %v1991_v44, %v1983_v32  ;;  %v2048_v27 = vld [vmem:[#allocation6 + $0x2b8] sm:$0xff]  ;;  %v2045_v32 = vld [vmem:[#allocation6 + $0x2a0] sm:$0xff]  ;;  %v2047_v44 = vld [vmem:[#allocation6 + $0x2b0] sm:$0xff] }
 0x2c9   :  { %5552 = vmatpush1.bf16.msra.mxu0 %v5551_v48  ;;  %v2000_v48 = vld [vmem:[#allocation6 + $0x138] sm:$0xff] }
 0x2ca   :  { %5840 = vmatpush1.bf16.msra.mxu1 %v5839_v63  ;;  %5554 = vmatprep.subr.bf16.mxu0 %v5553_v33  ;;  %v2008_v63 = vld [vmem:[#allocation6 + $0x178] sm:$0xff]  ;;  %v5855_v33 = vpack.c.bf16 %v1989_v42, %v1981_v28  ;;  %v6155_v28 = vpack.c.bf16 %v2039_v40, %v2031_v17  ;;  %v2101_v17 = vld [vmem:[#allocation6 + $0x460] sm:$0xff] }
 0x2cb   :  { %5842 = vmatprep.subr.bf16.mxu1 %v5841_v53  ;;  %v2005_v53 = vld [vmem:[#allocation6 + $0x160] sm:$0xff]  ;;  %v6145_v58 = vpack.c.bf16 %v2008_v63, %v2000_v48  ;;  %v2056_v30 = vld [vmem:[#allocation6 + $0x2f8] sm:$0xff]  ;;  %v2070_v48 = vld [vmem:[#allocation6 + $0x368] sm:$0xff] }
 0x2cc   :  { %v6157_v60 = vpack.c.bf16 %v2056_v30, %v2048_v27  ;;  %v2064_v63 = vld [vmem:[#allocation6 + $0x338] sm:$0xff]  ;;  %v2118_v27 = vld [vmem:[#allocation6 + $0x4e8] sm:$0xff] }
 0x2cd   :  { %5556 = vmatpush1.bf16.msra.mxu0 %v5555_v1  ;;  %v2016_v1 = vld [vmem:[#allocation6 + $0x1b8] sm:$0xff] }
 0x2ce   :  { %5844 = vmatpush1.bf16.msra.mxu1 %v5843_v47  ;;  %5558 = vmatprep.subr.bf16.mxu0 %v5557_v55  ;;  %v2024_v47 = vld [vmem:[#allocation6 + $0x1f8] sm:$0xff]  ;;  %v5859_v55 = vpack.c.bf16 %v2005_v53, %v1997_v52  ;;  %v2061_v53 = vld [vmem:[#allocation6 + $0x320] sm:$0xff] }
 0x2cf   :  { %5846 = vmatprep.subr.bf16.mxu1 %v5845_v6  ;;  %v2021_v6 = vld [vmem:[#allocation6 + $0x1e0] sm:$0xff]  ;;  %v6149_v9 = vpack.c.bf16 %v2024_v47, %v2016_v1  ;;  %v2086_v1 = vld [vmem:[#allocation6 + $0x3e8] sm:$0xff]  ;;  %v2080_v47 = vld [vmem:[#allocation6 + $0x3b8] sm:$0xff] }
 0x2d0   :  { %v2112_v30 = vld [vmem:[#allocation6 + $0x4b8] sm:$0xff] }
 0x2d1   :  { %5560 = vmatpush1.bf16.msra.mxu0 %v5559_v54  ;;  %v2040_v54 = vld [vmem:[#allocation6 + $0x278] sm:$0xff] }
 0x2d2   :  { %5848 = vmatpush1.bf16.msra.mxu1 %v5847_v22  ;;  %5850 = vmatprep.subr.bf16.mxu0 %v5849_v36  ;;  %v5863_v22 = vpack.c.bf16 %v2021_v6, %v2013_v5  ;;  %v6153_v59 = vpack.c.bf16 %v2040_v54, %v2032_v49  ;;  %v5877_v5 = vpack.c.bf16 %v2086_v1, %v2078_v13  ;;  %v2077_v6 = vld [vmem:[#allocation6 + $0x3a0] sm:$0xff]  ;;  %v2102_v49 = vld [vmem:[#allocation6 + $0x468] sm:$0xff]  ;;  %v2096_v54 = vld [vmem:[#allocation6 + $0x438] sm:$0xff] }
 0x2d3   :  { %6138 = vmatprep.subr.bf16.mxu1 %v6137_v26  ;;  %v2037_v26 = vld [vmem:[#allocation6 + $0x260] sm:$0xff]  ;;  %v2135_v13 = vld [vmem:[#allocation6 + $0x570] sm:$0xff]  ;;  %v2142_v1 = vld [vmem:[#allocation6 + $0x5a8] sm:$0xff] }
 0x2d4   :  { %3504 = vmatmul.mubr.f32.vlgmr.msra.gmra.mrb[18].mxu0 %v7075_v29 }
 0x2d5   :  { %3859 = vmatmul.mubr.f32.vlgmr.msra.gmra.mrb[18].mxu1 %v7075_v29  ;;  %5852 = vmatpush1.bf16.msra.mxu0 %v5851_v41  ;;  %v2054_v41 = vld [vmem:[#allocation6 + $0x2e8] sm:$0xff] }
 0x2d6   :  { %3929 = vmatprep.mubr.f32.mxu0 %v7040_v14  ;;  %6140 = vmatpush1.bf16.msra.mxu1 %v6139_v61  ;;  %v5867_v61 = vpack.c.bf16 %v2037_v26, %v2029_v25  ;;  %v5869_v42 = vpack.c.bf16 %v2054_v41, %v2046_v50  ;;  %v5881_v25 = vpack.c.bf16 %v2102_v49, %v2094_v16  ;;  %v2093_v26 = vld [vmem:[#allocation6 + $0x420] sm:$0xff]  ;;  %v2103_v50 = vld [vmem:[#allocation6 + $0x470] sm:$0xff]  ;;  %v2110_v41 = vld [vmem:[#allocation6 + $0x4a8] sm:$0xff] }
 0x2d7   :  { %4284 = vmatprep.mubr.f32.mxu1 %v7040_v14  ;;  %5854 = vmatprep.subr.bf16.mxu0 %v5853_v43  ;;  %v2023_v14 = vld [vmem:[#allocation6 + $0x1f0] sm:$0xff]  ;;  %v2053_v43 = vld [vmem:[#allocation6 + $0x2e0] sm:$0xff]  ;;  %v2158_v49 = vld [vmem:[#allocation6 + $0x628] sm:$0xff] }
 0x2d8   :  { %6142 = vmatprep.subr.bf16.mxu1 %v6141_v46  ;;  %v6151_v36 = vpack.c.bf16 %v2023_v14, %v2015_v8  ;;  %v2062_v46 = vld [vmem:[#allocation6 + $0x328] sm:$0xff]  ;;  %v2085_v8 = vld [vmem:[#allocation6 + $0x3e0] sm:$0xff]  ;;  %v2151_v16 = vld [vmem:[#allocation6 + $0x5f0] sm:$0xff] }
 0x2d9   :  { %5856 = vmatpush1.bf16.msra.mxu0 %v5855_v33  ;;  %v2072_v33 = vld [vmem:[#allocation6 + $0x378] sm:$0xff]  ;;  %v5873_v52 = vpack.c.bf16 %v2070_v48, %v2062_v46  ;;  %v2119_v46 = vld [vmem:[#allocation6 + $0x4f0] sm:$0xff]  ;;  %v2126_v48 = vld [vmem:[#allocation6 + $0x528] sm:$0xff] }
 0x2da   :  { %6144 = vmatpush1.bf16.msra.mxu1 %v6143_v37  ;;  %5858 = vmatprep.subr.bf16.mxu0 %v5857_v51  ;;  %v5871_v37 = vpack.c.bf16 %v2053_v43, %v2045_v32  ;;  %v6159_v51 = vpack.c.bf16 %v2055_v45, %v2047_v44  ;;  %v6161_v62 = vpack.c.bf16 %v2072_v33, %v2064_v63  ;;  %v2109_v43 = vld [vmem:[#allocation6 + $0x4a0] sm:$0xff]  ;;  %v2134_v63 = vld [vmem:[#allocation6 + $0x568] sm:$0xff]  ;;  %v2128_v33 = vld [vmem:[#allocation6 + $0x538] sm:$0xff] }
 0x2db   :  { %6146 = vmatprep.subr.bf16.mxu1 %v6145_v58  ;;  %v2063_v58 = vld [vmem:[#allocation6 + $0x330] sm:$0xff]  ;;  %v5885_v32 = vpack.c.bf16 %v2118_v27, %v2110_v41  ;;  %v2117_v44 = vld [vmem:[#allocation6 + $0x4e0] sm:$0xff]  ;;  %v2174_v27 = vld [vmem:[#allocation6 + $0x6a8] sm:$0xff] }
 0x2dc   :  { %v2167_v41 = vld [vmem:[#allocation6 + $0x670] sm:$0xff] }
 0x2dd   :  { %5860 = vmatpush1.bf16.msra.mxu0 %v5859_v55  ;;  %v2088_v55 = vld [vmem:[#allocation6 + $0x3f8] sm:$0xff] }
 0x2de   :  { %6148 = vmatpush1.bf16.msra.mxu1 %v6147_v3  ;;  %5862 = vmatprep.subr.bf16.mxu0 %v5861_v4  ;;  %v5875_v3 = vpack.c.bf16 %v2069_v56, %v2061_v53  ;;  %v6163_v4 = vpack.c.bf16 %v2071_v31, %v2063_v58  ;;  %v6165_v14 = vpack.c.bf16 %v2088_v55, %v2080_v47  ;;  %v2125_v56 = vld [vmem:[#allocation6 + $0x520] sm:$0xff]  ;;  %v2150_v47 = vld [vmem:[#allocation6 + $0x5e8] sm:$0xff]  ;;  %v2144_v55 = vld [vmem:[#allocation6 + $0x5b8] sm:$0xff] }
 0x2df   :  { %6150 = vmatprep.subr.bf16.mxu1 %v6149_v9  ;;  %v2079_v9 = vld [vmem:[#allocation6 + $0x3b0] sm:$0xff]  ;;  %v5889_v53 = vpack.c.bf16 %v2134_v63, %v2126_v48  ;;  %v2133_v58 = vld [vmem:[#allocation6 + $0x560] sm:$0xff]  ;;  %v2190_v63 = vld [vmem:[#allocation6 + $0x728] sm:$0xff] }
 0x2e0   :  { %v2183_v48 = vld [vmem:[#allocation6 + $0x6f0] sm:$0xff] }
 0x2e1   :  { %5864 = vmatpush1.bf16.msra.mxu0 %v5863_v22  ;;  %v2104_v22 = vld [vmem:[#allocation6 + $0x478] sm:$0xff] }
 0x2e2   :  { %6152 = vmatpush1.bf16.msra.mxu1 %v6151_v36  ;;  %5866 = vmatprep.subr.bf16.mxu0 %v5865_v11  ;;  %v5879_v36 = vpack.c.bf16 %v2085_v8, %v2077_v6  ;;  %v6167_v11 = vpack.c.bf16 %v2087_v15, %v2079_v9  ;;  %v6169_v40 = vpack.c.bf16 %v2104_v22, %v2096_v54  ;;  %v2141_v8 = vld [vmem:[#allocation6 + $0x5a0] sm:$0xff]  ;;  %v2166_v54 = vld [vmem:[#allocation6 + $0x668] sm:$0xff]  ;;  %v2160_v22 = vld [vmem:[#allocation6 + $0x638] sm:$0xff] }
 0x2e3   :  { %6154 = vmatprep.subr.bf16.mxu1 %v6153_v59  ;;  %v2095_v59 = vld [vmem:[#allocation6 + $0x430] sm:$0xff]  ;;  %v5893_v6 = vpack.c.bf16 %v2150_v47, %v2142_v1  ;;  %v2149_v9 = vld [vmem:[#allocation6 + $0x5e0] sm:$0xff]  ;;  %v2206_v47 = vld [vmem:[#allocation6 + $0x7a8] sm:$0xff] }
 0x2e4   :  { %v2199_v1 = vld [vmem:[#allocation6 + $0x770] sm:$0xff] }
 0x2e5   :  { %5868 = vmatpush1.bf16.msra.mxu0 %v5867_v61  ;;  %v2120_v61 = vld [vmem:[#allocation6 + $0x4f8] sm:$0xff] }
 0x2e6   :  { %6156 = vmatpush1.bf16.msra.mxu1 %v6155_v28  ;;  %5870 = vmatprep.subr.bf16.mxu0 %v5869_v42  ;;  %v5883_v28 = vpack.c.bf16 %v2101_v17, %v2093_v26  ;;  %v6171_v42 = vpack.c.bf16 %v2103_v50, %v2095_v59  ;;  %v6173_v45 = vpack.c.bf16 %v2120_v61, %v2112_v30  ;;  %v2157_v17 = vld [vmem:[#allocation6 + $0x620] sm:$0xff]  ;;  %v2182_v30 = vld [vmem:[#allocation6 + $0x6e8] sm:$0xff]  ;;  %v2176_v61 = vld [vmem:[#allocation6 + $0x6b8] sm:$0xff] }
 0x2e7   :  { %6158 = vmatprep.subr.bf16.mxu1 %v6157_v60  ;;  %v2111_v60 = vld [vmem:[#allocation6 + $0x4b0] sm:$0xff]  ;;  %v5897_v26 = vpack.c.bf16 %v2166_v54, %v2158_v49  ;;  %v2165_v59 = vld [vmem:[#allocation6 + $0x660] sm:$0xff]  ;;  %v2222_v54 = vld [vmem:[#allocation6 + $0x828] sm:$0xff] }
 0x2e8   :  { %v2215_v49 = vld [vmem:[#allocation6 + $0x7f0] sm:$0xff] }
 0x2e9   :  { %5872 = vmatpush1.bf16.msra.mxu0 %v5871_v37  ;;  %v2136_v37 = vld [vmem:[#allocation6 + $0x578] sm:$0xff] }
 0x2ea   :  { %6160 = vmatpush1.bf16.msra.mxu1 %v6159_v51  ;;  %5874 = vmatprep.subr.bf16.mxu0 %v5873_v52  ;;  %v5887_v51 = vpack.c.bf16 %v2117_v44, %v2109_v43  ;;  %v6175_v52 = vpack.c.bf16 %v2119_v46, %v2111_v60  ;;  %v6177_v31 = vpack.c.bf16 %v2136_v37, %v2128_v33  ;;  %v2173_v44 = vld [vmem:[#allocation6 + $0x6a0] sm:$0xff]  ;;  %v2198_v33 = vld [vmem:[#allocation6 + $0x768] sm:$0xff]  ;;  %v2192_v37 = vld [vmem:[#allocation6 + $0x738] sm:$0xff] }
 0x2eb   :  { %6162 = vmatprep.subr.bf16.mxu1 %v6161_v62  ;;  %v2127_v62 = vld [vmem:[#allocation6 + $0x530] sm:$0xff]  ;;  %v5901_v43 = vpack.c.bf16 %v2182_v30, %v2174_v27  ;;  %v2181_v60 = vld [vmem:[#allocation6 + $0x6e0] sm:$0xff]  ;;  %v2238_v30 = vld [vmem:[#allocation6 + $0x8a8] sm:$0xff] }
 0x2ec   :  { %v2231_v27 = vld [vmem:[#allocation6 + $0x870] sm:$0xff] }
 0x2ed   :  { %5876 = vmatpush1.bf16.msra.mxu0 %v5875_v3  ;;  %v2152_v3 = vld [vmem:[#allocation6 + $0x5f8] sm:$0xff] }
 0x2ee   :  { %6164 = vmatpush1.bf16.msra.mxu1 %v6163_v4  ;;  %5878 = vmatprep.subr.bf16.mxu0 %v5877_v5  ;;  %v5891_v4 = vpack.c.bf16 %v2133_v58, %v2125_v56  ;;  %v6179_v5 = vpack.c.bf16 %v2135_v13, %v2127_v62  ;;  %v6181_v15 = vpack.c.bf16 %v2152_v3, %v2144_v55  ;;  %v2189_v58 = vld [vmem:[#allocation6 + $0x720] sm:$0xff]  ;;  %v2214_v55 = vld [vmem:[#allocation6 + $0x7e8] sm:$0xff]  ;;  %v2208_v3 = vld [vmem:[#allocation6 + $0x7b8] sm:$0xff] }
 0x2ef   :  { %6166 = vmatprep.subr.bf16.mxu1 %v6165_v14  ;;  %v2143_v14 = vld [vmem:[#allocation6 + $0x5b0] sm:$0xff]  ;;  %v5905_v56 = vpack.c.bf16 %v2198_v33, %v2190_v63  ;;  %v2197_v62 = vld [vmem:[#allocation6 + $0x760] sm:$0xff]  ;;  %v2254_v63 = vld [vmem:[#allocation6 + $0x928] sm:$0xff] }
 0x2f0   :  { %v2262_v33 = vld [vmem:[#allocation6 + $0x968] sm:$0xff] }
 0x2f1   :  { %5880 = vmatpush1.bf16.msra.mxu0 %v5879_v36  ;;  %v2168_v36 = vld [vmem:[#allocation6 + $0x678] sm:$0xff] }
 0x2f2   :  { %6168 = vmatpush1.bf16.msra.mxu1 %v6167_v11  ;;  %5882 = vmatprep.subr.bf16.mxu0 %v5881_v25  ;;  %v5895_v11 = vpack.c.bf16 %v2149_v9, %v2141_v8  ;;  %v6183_v25 = vpack.c.bf16 %v2151_v16, %v2143_v14  ;;  %v6185_v50 = vpack.c.bf16 %v2168_v36, %v2160_v22  ;;  %v2205_v9 = vld [vmem:[#allocation6 + $0x7a0] sm:$0xff]  ;;  %v2230_v22 = vld [vmem:[#allocation6 + $0x868] sm:$0xff]  ;;  %v2224_v36 = vld [vmem:[#allocation6 + $0x838] sm:$0xff] }
 0x2f3   :  { %6170 = vmatprep.subr.bf16.mxu1 %v6169_v40  ;;  %v2159_v40 = vld [vmem:[#allocation6 + $0x630] sm:$0xff]  ;;  %v5909_v8 = vpack.c.bf16 %v2214_v55, %v2206_v47  ;;  %v2213_v14 = vld [vmem:[#allocation6 + $0x7e0] sm:$0xff]  ;;  %v2270_v55 = vld [vmem:[#allocation6 + $0x9a8] sm:$0xff] }
 0x2f4   :  { %v2263_v47 = vld [vmem:[#allocation6 + $0x970] sm:$0xff] }
 0x2f5   :  { %5884 = vmatpush1.bf16.msra.mxu0 %v5883_v28  ;;  %v2184_v28 = vld [vmem:[#allocation6 + $0x6f8] sm:$0xff] }
 0x2f6   :  { %6172 = vmatpush1.bf16.msra.mxu1 %v6171_v42  ;;  %5886 = vmatprep.subr.bf16.mxu0 %v5885_v32  ;;  %v5899_v42 = vpack.c.bf16 %v2165_v59, %v2157_v17  ;;  %v6187_v32 = vpack.c.bf16 %v2167_v41, %v2159_v40  ;;  %v6189_v46 = vpack.c.bf16 %v2184_v28, %v2176_v61  ;;  %v2221_v59 = vld [vmem:[#allocation6 + $0x820] sm:$0xff]  ;;  %v2223_v41 = vld [vmem:[#allocation6 + $0x830] sm:$0xff]  ;;  %v2246_v61 = vld [vmem:[#allocation6 + $0x8e8] sm:$0xff] }
 0x2f7   :  { %6174 = vmatprep.subr.bf16.mxu1 %v6173_v45  ;;  %v2175_v45 = vld [vmem:[#allocation6 + $0x6b0] sm:$0xff]  ;;  %v5913_v17 = vpack.c.bf16 %v2230_v22, %v2222_v54  ;;  %v2229_v40 = vld [vmem:[#allocation6 + $0x860] sm:$0xff]  ;;  %v2294_v54 = vld [vmem:[#allocation6 + $0xa68] sm:$0xff] }
 0x2f8   :  { %v5915_v28 = vpack.c.bf16 %v2229_v40, %v2221_v59  ;;  %v2288_v22 = vld [vmem:[#allocation6 + $0xa38] sm:$0xff]  ;;  %v2293_v59 = vld [vmem:[#allocation6 + $0xa60] sm:$0xff]  ;;  %v2287_v40 = vld [vmem:[#allocation6 + $0xa30] sm:$0xff] }
 0x2f9   :  { %5888 = vmatpush1.bf16.msra.mxu0 %v5887_v51  ;;  %v2200_v51 = vld [vmem:[#allocation6 + $0x778] sm:$0xff] }
 0x2fa   :  { %6176 = vmatpush1.bf16.msra.mxu1 %v6175_v52  ;;  %5890 = vmatprep.subr.bf16.mxu0 %v5889_v53  ;;  %v5903_v52 = vpack.c.bf16 %v2181_v60, %v2173_v44  ;;  %v6191_v53 = vpack.c.bf16 %v2183_v48, %v2175_v45  ;;  %v6193_v13 = vpack.c.bf16 %v2200_v51, %v2192_v37  ;;  %v2237_v44 = vld [vmem:[#allocation6 + $0x8a0] sm:$0xff]  ;;  %v2239_v45 = vld [vmem:[#allocation6 + $0x8b0] sm:$0xff]  ;;  %v2256_v51 = vld [vmem:[#allocation6 + $0x938] sm:$0xff] }
 0x2fb   :  { %6178 = vmatprep.subr.bf16.mxu1 %v6177_v31  ;;  %v2191_v31 = vld [vmem:[#allocation6 + $0x730] sm:$0xff]  ;;  %v2245_v60 = vld [vmem:[#allocation6 + $0x8e0] sm:$0xff] }
 0x2fc   :  { %v2247_v48 = vld [vmem:[#allocation6 + $0x8f0] sm:$0xff] }
 0x2fd   :  { %5892 = vmatpush1.bf16.msra.mxu0 %v5891_v4  ;;  %v2216_v4 = vld [vmem:[#allocation6 + $0x7f8] sm:$0xff] }
 0x2fe   :  { %6180 = vmatpush1.bf16.msra.mxu1 %v6179_v5  ;;  %5894 = vmatprep.subr.bf16.mxu0 %v5893_v6  ;;  %v5907_v5 = vpack.c.bf16 %v2197_v62, %v2189_v58  ;;  %v6195_v6 = vpack.c.bf16 %v2199_v1, %v2191_v31  ;;  %v6197_v16 = vpack.c.bf16 %v2216_v4, %v2208_v3  ;;  %v2253_v62 = vld [vmem:[#allocation6 + $0x920] sm:$0xff]  ;;  %v2278_v3 = vld [vmem:[#allocation6 + $0x9e8] sm:$0xff]  ;;  %v2272_v4 = vld [vmem:[#allocation6 + $0x9b8] sm:$0xff] }
 0x2ff   :  { %6182 = vmatprep.subr.bf16.mxu1 %v6181_v15  ;;  %v2207_v15 = vld [vmem:[#allocation6 + $0x7b0] sm:$0xff]  ;;  %v5921_v58 = vpack.c.bf16 %v2262_v33, %v2254_v63  ;;  %v2261_v31 = vld [vmem:[#allocation6 + $0x960] sm:$0xff]  ;;  %v2318_v63 = vld [vmem:[#allocation6 + $0xb28] sm:$0xff] }
 0x300   :  { %v2326_v33 = vld [vmem:[#allocation6 + $0xb68] sm:$0xff] }
 0x301   :  { %5896 = vmatpush1.bf16.msra.mxu0 %v5895_v11  ;;  %v2232_v11 = vld [vmem:[#allocation6 + $0x878] sm:$0xff] }
 0x302   :  { %6184 = vmatpush1.bf16.msra.mxu1 %v6183_v25  ;;  %5898 = vmatprep.subr.bf16.mxu0 %v5897_v26  ;;  %v5911_v25 = vpack.c.bf16 %v2213_v14, %v2205_v9  ;;  %v6199_v26 = vpack.c.bf16 %v2215_v49, %v2207_v15  ;;  %v2269_v9 = vld [vmem:[#allocation6 + $0x9a0] sm:$0xff]  ;;  %v2271_v15 = vld [vmem:[#allocation6 + $0x9b0] sm:$0xff]  ;;  %v2286_v49 = vld [vmem:[#allocation6 + $0xa28] sm:$0xff] }
 0x303   :  { %6186 = vmatprep.subr.bf16.mxu1 %v6185_v50  ;;  %v6201_v50 = vpack.c.bf16 %v2232_v11, %v2224_v36  ;;  %v2277_v14 = vld [vmem:[#allocation6 + $0x9e0] sm:$0xff]  ;;  %v2296_v36 = vld [vmem:[#allocation6 + $0xa78] sm:$0xff] }
 0x304   :  { %v5927_v11 = vpack.c.bf16 %v2277_v14, %v2269_v9  ;;  %v2341_v9 = vld [vmem:[#allocation6 + $0xbe0] sm:$0xff]  ;;  %v2335_v14 = vld [vmem:[#allocation6 + $0xbb0] sm:$0xff] }
 0x305   :  { %5900 = vmatpush1.bf16.msra.mxu0 %v5899_v42  ;;  %v2240_v42 = vld [vmem:[#allocation6 + $0x8b8] sm:$0xff] }
 0x306   :  { %6188 = vmatpush1.bf16.msra.mxu1 %v6187_v32  ;;  %5902 = vmatprep.subr.bf16.mxu0 %v5901_v43  ;;  %v2248_v32 = vld [vmem:[#allocation6 + $0x8f8] sm:$0xff]  ;;  %v6203_v43 = vpack.c.bf16 %v2231_v27, %v2223_v41  ;;  %v2295_v41 = vld [vmem:[#allocation6 + $0xa70] sm:$0xff]  ;;  %v2302_v27 = vld [vmem:[#allocation6 + $0xaa8] sm:$0xff] }
 0x307   :  { %6190 = vmatprep.subr.bf16.mxu1 %v6189_v46  ;;  %v5917_v46 = vpack.c.bf16 %v2246_v61, %v2238_v30  ;;  %v6205_v37 = vpack.c.bf16 %v2248_v32, %v2240_v42  ;;  %v2310_v30 = vld [vmem:[#allocation6 + $0xae8] sm:$0xff]  ;;  %v2304_v61 = vld [vmem:[#allocation6 + $0xab8] sm:$0xff]  ;;  %v6219_v32 = vpack.c.bf16 %v2295_v41, %v2287_v40 }
 0x308   :  { %v2366_v41 = vld [vmem:[#allocation6 + $0xca8] sm:$0xff] }
 0x309   :  { %5904 = vmatpush1.bf16.msra.mxu0 %v5903_v52  ;;  %v2264_v52 = vld [vmem:[#allocation6 + $0x978] sm:$0xff] }
 0x30a   :  { %6192 = vmatpush1.bf16.msra.mxu1 %v6191_v53  ;;  %5906 = vmatprep.subr.bf16.mxu0 %v5905_v56  ;;  %v5919_v53 = vpack.c.bf16 %v2245_v60, %v2237_v44  ;;  %v6207_v56 = vpack.c.bf16 %v2247_v48, %v2239_v45  ;;  %v6209_v1 = vpack.c.bf16 %v2264_v52, %v2256_v51  ;;  %v2301_v44 = vld [vmem:[#allocation6 + $0xaa0] sm:$0xff]  ;;  %v2303_v45 = vld [vmem:[#allocation6 + $0xab0] sm:$0xff]  ;;  %v2328_v51 = vld [vmem:[#allocation6 + $0xb78] sm:$0xff] }
 0x30b   :  { %6194 = vmatprep.subr.bf16.mxu1 %v6193_v13  ;;  %v2255_v13 = vld [vmem:[#allocation6 + $0x930] sm:$0xff]  ;;  %v2309_v60 = vld [vmem:[#allocation6 + $0xae0] sm:$0xff] }
 0x30c   :  { %v2311_v48 = vld [vmem:[#allocation6 + $0xaf0] sm:$0xff]  ;;  %v5935_v52 = vpack.c.bf16 %v2309_v60, %v2301_v44  ;;  %v2373_v44 = vld [vmem:[#allocation6 + $0xce0] sm:$0xff] }
 0x30d   :  { %5908 = vmatpush1.bf16.msra.mxu0 %v5907_v5  ;;  %v5923_v5 = vpack.c.bf16 %v2261_v31, %v2253_v62  ;;  %v2325_v62 = vld [vmem:[#allocation6 + $0xb60] sm:$0xff]  ;;  %v2319_v31 = vld [vmem:[#allocation6 + $0xb30] sm:$0xff] }
 0x30e   :  { %6196 = vmatpush1.bf16.msra.mxu1 %v6195_v6  ;;  %5910 = vmatprep.subr.bf16.mxu0 %v5909_v8  ;;  %v6211_v6 = vpack.c.bf16 %v2263_v47, %v2255_v13  ;;  %v5925_v8 = vpack.c.bf16 %v2278_v3, %v2270_v55  ;;  %v2334_v47 = vld [vmem:[#allocation6 + $0xba8] sm:$0xff]  ;;  %v2336_v3 = vld [vmem:[#allocation6 + $0xbb8] sm:$0xff]  ;;  %v2367_v60 = vld [vmem:[#allocation6 + $0xcb0] sm:$0xff] }
 0x30f   :  { %6198 = vmatprep.subr.bf16.mxu1 %v6197_v16  ;;  %v2342_v55 = vld [vmem:[#allocation6 + $0xbe8] sm:$0xff] }
 0x311   :  { %5912 = vmatpush1.bf16.msra.mxu0 %v5911_v25 }
 0x312   :  { %6200 = vmatpush1.bf16.msra.mxu1 %v6199_v26  ;;  %5914 = vmatprep.subr.bf16.mxu0 %v5913_v17  ;;  %v5929_v26 = vpack.c.bf16 %v2294_v54, %v2286_v49  ;;  %v2285_v17 = vld [vmem:[#allocation6 + $0xa20] sm:$0xff]  ;;  %v2358_v49 = vld [vmem:[#allocation6 + $0xc68] sm:$0xff]  ;;  %v2352_v54 = vld [vmem:[#allocation6 + $0xc38] sm:$0xff] }
 0x313   :  { %6202 = vmatprep.subr.bf16.mxu1 %v6201_v50  ;;  %v6217_v50 = vpack.c.bf16 %v2296_v36, %v2288_v22  ;;  %v5931_v42 = vpack.c.bf16 %v2293_v59, %v2285_v17  ;;  %v2360_v22 = vld [vmem:[#allocation6 + $0xc78] sm:$0xff]  ;;  %v2357_v17 = vld [vmem:[#allocation6 + $0xc60] sm:$0xff]  ;;  %v2351_v59 = vld [vmem:[#allocation6 + $0xc30] sm:$0xff] }
 0x314   :  { %3930 = vmatmul.mubr.f32.vlgmr.msra.gmra.mrb[20].mxu0 %v7031_v23  ;;  %v6233_v40 = vpack.c.bf16 %v2360_v22, %v2352_v54  ;;  %v2424_v54 = vld [vmem:[#allocation6 + $0xe78] sm:$0xff] }
 0x315   :  { %4285 = vmatmul.mubr.f32.vlgmr.msra.gmra.mrb[20].mxu1 %v7031_v23  ;;  %5916 = vmatpush1.bf16.msra.mxu0 %v5915_v28  ;;  %v2280_v23 = vld [vmem:[#allocation6 + $0x9f8] sm:$0xff] }
 0x316   :  { %4000 = vmatprep.mubr.f32.mxu0 %v7043_v24  ;;  %6204 = vmatpush1.bf16.msra.mxu1 %v6203_v43  ;;  %v6213_v16 = vpack.c.bf16 %v2280_v23, %v2272_v4  ;;  %v2312_v28 = vld [vmem:[#allocation6 + $0xaf8] sm:$0xff]  ;;  %v5933_v43 = vpack.c.bf16 %v2310_v30, %v2302_v27  ;;  %v2374_v27 = vld [vmem:[#allocation6 + $0xce8] sm:$0xff] }
 0x317   :  { %4355 = vmatprep.mubr.f32.mxu1 %v7043_v24  ;;  %5918 = vmatprep.subr.bf16.mxu0 %v5917_v46  ;;  %v2279_v24 = vld [vmem:[#allocation6 + $0x9f0] sm:$0xff]  ;;  %v6221_v46 = vpack.c.bf16 %v2312_v28, %v2304_v61  ;;  %v2344_v4 = vld [vmem:[#allocation6 + $0xbf8] sm:$0xff] }
 0x318   :  { %6206 = vmatprep.subr.bf16.mxu1 %v6205_v37  ;;  %v6215_v25 = vpack.c.bf16 %v2279_v24, %v2271_v15  ;;  %v2320_v37 = vld [vmem:[#allocation6 + $0xb38] sm:$0xff]  ;;  %v6229_v15 = vpack.c.bf16 %v2344_v4, %v2336_v3  ;;  %v2350_v24 = vld [vmem:[#allocation6 + $0xc28] sm:$0xff] }
 0x319   :  { %5920 = vmatpush1.bf16.msra.mxu0 %v5919_v53  ;;  %v6223_v53 = vpack.c.bf16 %v2311_v48, %v2303_v45  ;;  %v6225_v13 = vpack.c.bf16 %v2328_v51, %v2320_v37  ;;  %v2368_v30 = vld [vmem:[#allocation6 + $0xcb8] sm:$0xff]  ;;  %v2382_v48 = vld [vmem:[#allocation6 + $0xd28] sm:$0xff] }
 0x31a   :  { %6208 = vmatpush1.bf16.msra.mxu1 %v6207_v56  ;;  %5922 = vmatprep.subr.bf16.mxu0 %v5921_v58  ;;  %v5937_v56 = vpack.c.bf16 %v2326_v33, %v2318_v63  ;;  %v2317_v58 = vld [vmem:[#allocation6 + $0xb20] sm:$0xff]  ;;  %v2376_v61 = vld [vmem:[#allocation6 + $0xcf8] sm:$0xff]  ;;  %v2390_v63 = vld [vmem:[#allocation6 + $0xd68] sm:$0xff] }
 0x31b   :  { %6210 = vmatprep.subr.bf16.mxu1 %v6209_v1  ;;  %v2327_v1 = vld [vmem:[#allocation6 + $0xb70] sm:$0xff]  ;;  %v5939_v23 = vpack.c.bf16 %v2325_v62, %v2317_v58  ;;  %v6237_v45 = vpack.c.bf16 %v2376_v61, %v2368_v30  ;;  %v2384_v33 = vld [vmem:[#allocation6 + $0xd38] sm:$0xff]  ;;  %v2389_v58 = vld [vmem:[#allocation6 + $0xd60] sm:$0xff] }
 0x31c   :  { %v2392_v37 = vld [vmem:[#allocation6 + $0xd78] sm:$0xff]  ;;  %v2383_v62 = vld [vmem:[#allocation6 + $0xd30] sm:$0xff] }
 0x31d   :  { %5924 = vmatpush1.bf16.msra.mxu0 %v5923_v5  ;;  %v6227_v5 = vpack.c.bf16 %v2327_v1, %v2319_v31  ;;  %v6241_v31 = vpack.c.bf16 %v2392_v37, %v2384_v33  ;;  %v2398_v1 = vld [vmem:[#allocation6 + $0xda8] sm:$0xff]  ;;  %v2408_v3 = vld [vmem:[#allocation6 + $0xdf8] sm:$0xff] }
 0x31e   :  { %6212 = vmatpush1.bf16.msra.mxu1 %v6211_v6  ;;  %5926 = vmatprep.subr.bf16.mxu0 %v5925_v8  ;;  %v5941_v6 = vpack.c.bf16 %v2342_v55, %v2334_v47  ;;  %v2333_v8 = vld [vmem:[#allocation6 + $0xba0] sm:$0xff]  ;;  %v2406_v47 = vld [vmem:[#allocation6 + $0xde8] sm:$0xff]  ;;  %v2400_v55 = vld [vmem:[#allocation6 + $0xdb8] sm:$0xff] }
 0x31f   :  { %6214 = vmatprep.subr.bf16.mxu1 %v6213_v16  ;;  %v2343_v16 = vld [vmem:[#allocation6 + $0xbf0] sm:$0xff]  ;;  %v5943_v36 = vpack.c.bf16 %v2341_v9, %v2333_v8  ;;  %v2405_v8 = vld [vmem:[#allocation6 + $0xde0] sm:$0xff]  ;;  %v2440_v30 = vld [vmem:[#allocation6 + $0xef8] sm:$0xff] }
 0x320   :  { %v2399_v9 = vld [vmem:[#allocation6 + $0xdb0] sm:$0xff]  ;;  %v2456_v33 = vld [vmem:[#allocation6 + $0xf78] sm:$0xff] }
 0x321   :  { %5928 = vmatpush1.bf16.msra.mxu0 %v5927_v11  ;;  %v6231_v11 = vpack.c.bf16 %v2343_v16, %v2335_v14  ;;  %v6245_v14 = vpack.c.bf16 %v2408_v3, %v2400_v55  ;;  %v2414_v16 = vld [vmem:[#allocation6 + $0xe28] sm:$0xff]  ;;  %v2472_v55 = vld [vmem:[#allocation6 + $0xff8] sm:$0xff] }
 0x322   :  { %6216 = vmatpush1.bf16.msra.mxu1 %v6215_v25  ;;  %5930 = vmatprep.subr.bf16.mxu0 %v5929_v26  ;;  %v5945_v25 = vpack.c.bf16 %v2358_v49, %v2350_v24  ;;  %v2349_v26 = vld [vmem:[#allocation6 + $0xc20] sm:$0xff]  ;;  %v2422_v24 = vld [vmem:[#allocation6 + $0xe68] sm:$0xff]  ;;  %v2416_v49 = vld [vmem:[#allocation6 + $0xe38] sm:$0xff] }
 0x323   :  { %6218 = vmatprep.subr.bf16.mxu1 %v6217_v50  ;;  %v2359_v50 = vld [vmem:[#allocation6 + $0xc70] sm:$0xff]  ;;  %v5947_v28 = vpack.c.bf16 %v2357_v17, %v2349_v26  ;;  %v2421_v26 = vld [vmem:[#allocation6 + $0xe60] sm:$0xff] }
 0x324   :  { %v2415_v17 = vld [vmem:[#allocation6 + $0xe30] sm:$0xff] }
 0x325   :  { %5932 = vmatpush1.bf16.msra.mxu0 %v5931_v42  ;;  %v6235_v42 = vpack.c.bf16 %v2359_v50, %v2351_v59  ;;  %v6249_v59 = vpack.c.bf16 %v2424_v54, %v2416_v49  ;;  %v2430_v50 = vld [vmem:[#allocation6 + $0xea8] sm:$0xff]  ;;  %v2488_v49 = vld [vmem:[#allocation6 + $0x1078] sm:$0xff] }
 0x326   :  { %6220 = vmatpush1.bf16.msra.mxu1 %v6219_v32  ;;  %5934 = vmatprep.subr.bf16.mxu0 %v5933_v43  ;;  %v5949_v32 = vpack.c.bf16 %v2374_v27, %v2366_v41  ;;  %v2365_v43 = vld [vmem:[#allocation6 + $0xca0] sm:$0xff]  ;;  %v2438_v41 = vld [vmem:[#allocation6 + $0xee8] sm:$0xff]  ;;  %v2432_v27 = vld [vmem:[#allocation6 + $0xeb8] sm:$0xff] }
 0x327   :  { %6222 = vmatprep.subr.bf16.mxu1 %v6221_v46  ;;  %v2375_v46 = vld [vmem:[#allocation6 + $0xcf0] sm:$0xff]  ;;  %v5951_v51 = vpack.c.bf16 %v2373_v44, %v2365_v43  ;;  %v2437_v43 = vld [vmem:[#allocation6 + $0xee0] sm:$0xff] }
 0x328   :  { %v2431_v44 = vld [vmem:[#allocation6 + $0xeb0] sm:$0xff] }
 0x329   :  { %5936 = vmatpush1.bf16.msra.mxu0 %v5935_v52  ;;  %v6239_v52 = vpack.c.bf16 %v2375_v46, %v2367_v60  ;;  %v6253_v60 = vpack.c.bf16 %v2440_v30, %v2432_v27  ;;  %v2446_v46 = vld [vmem:[#allocation6 + $0xf28] sm:$0xff]  ;;  %v2496_v27 = vld [vmem:[#allocation6 + $0x10b8] sm:$0xff] }
 0x32a   :  { %6224 = vmatpush1.bf16.msra.mxu1 %v6223_v53  ;;  %5938 = vmatprep.subr.bf16.mxu0 %v5937_v56  ;;  %v5953_v53 = vpack.c.bf16 %v2390_v63, %v2382_v48  ;;  %v2381_v56 = vld [vmem:[#allocation6 + $0xd20] sm:$0xff]  ;;  %v2454_v48 = vld [vmem:[#allocation6 + $0xf68] sm:$0xff]  ;;  %v2448_v63 = vld [vmem:[#allocation6 + $0xf38] sm:$0xff] }
 0x32b   :  { %6226 = vmatprep.subr.bf16.mxu1 %v6225_v13  ;;  %v2391_v13 = vld [vmem:[#allocation6 + $0xd70] sm:$0xff]  ;;  %v5955_v4 = vpack.c.bf16 %v2389_v58, %v2381_v56  ;;  %v2453_v56 = vld [vmem:[#allocation6 + $0xf60] sm:$0xff]  ;;  %v2504_v30 = vld [vmem:[#allocation6 + $0x10f8] sm:$0xff] }
 0x32c   :  { %v2447_v58 = vld [vmem:[#allocation6 + $0xf30] sm:$0xff] }
 0x32d   :  { %5940 = vmatpush1.bf16.msra.mxu0 %v5939_v23  ;;  %v6243_v23 = vpack.c.bf16 %v2391_v13, %v2383_v62  ;;  %v6257_v62 = vpack.c.bf16 %v2456_v33, %v2448_v63  ;;  %v2462_v13 = vld [vmem:[#allocation6 + $0xfa8] sm:$0xff]  ;;  %v2520_v63 = vld [vmem:[#allocation6 + $0x1178] sm:$0xff] }
 0x32e   :  { %6228 = vmatpush1.bf16.msra.mxu1 %v6227_v5  ;;  %5942 = vmatprep.subr.bf16.mxu0 %v5941_v6  ;;  %v5957_v5 = vpack.c.bf16 %v2406_v47, %v2398_v1  ;;  %v2397_v6 = vld [vmem:[#allocation6 + $0xda0] sm:$0xff]  ;;  %v2470_v1 = vld [vmem:[#allocation6 + $0xfe8] sm:$0xff]  ;;  %v2464_v47 = vld [vmem:[#allocation6 + $0xfb8] sm:$0xff] }
 0x32f   :  { %6230 = vmatprep.subr.bf16.mxu1 %v6229_v15  ;;  %v2407_v15 = vld [vmem:[#allocation6 + $0xdf0] sm:$0xff]  ;;  %v5959_v22 = vpack.c.bf16 %v2405_v8, %v2397_v6  ;;  %v2469_v6 = vld [vmem:[#allocation6 + $0xfe0] sm:$0xff] }
 0x330   :  { %v2463_v8 = vld [vmem:[#allocation6 + $0xfb0] sm:$0xff] }
 0x331   :  { %5944 = vmatpush1.bf16.msra.mxu0 %v5943_v36  ;;  %v6247_v36 = vpack.c.bf16 %v2407_v15, %v2399_v9  ;;  %v6261_v9 = vpack.c.bf16 %v2472_v55, %v2464_v47  ;;  %v2478_v15 = vld [vmem:[#allocation6 + $0x1028] sm:$0xff] }
 0x332   :  { %6232 = vmatpush1.bf16.msra.mxu1 %v6231_v11  ;;  %5946 = vmatprep.subr.bf16.mxu0 %v5945_v25  ;;  %v5961_v11 = vpack.c.bf16 %v2422_v24, %v2414_v16  ;;  %v2413_v25 = vld [vmem:[#allocation6 + $0xe20] sm:$0xff]  ;;  %v2486_v16 = vld [vmem:[#allocation6 + $0x1068] sm:$0xff]  ;;  %v2480_v24 = vld [vmem:[#allocation6 + $0x1038] sm:$0xff] }
 0x333   :  { %6234 = vmatprep.subr.bf16.mxu1 %v6233_v40  ;;  %v2423_v40 = vld [vmem:[#allocation6 + $0xe70] sm:$0xff]  ;;  %v5963_v61 = vpack.c.bf16 %v2421_v26, %v2413_v25  ;;  %v2485_v25 = vld [vmem:[#allocation6 + $0x1060] sm:$0xff]  ;;  %v6265_v26 = vpack.c.bf16 %v2488_v49, %v2480_v24 }
 0x335   :  { %5948 = vmatpush1.bf16.msra.mxu0 %v5947_v28  ;;  %v6251_v28 = vpack.c.bf16 %v2423_v40, %v2415_v17  ;;  %v2479_v17 = vld [vmem:[#allocation6 + $0x1030] sm:$0xff]  ;;  %v2494_v40 = vld [vmem:[#allocation6 + $0x10a8] sm:$0xff] }
 0x336   :  { %6236 = vmatpush1.bf16.msra.mxu1 %v6235_v42  ;;  %5950 = vmatprep.subr.bf16.mxu0 %v5949_v32  ;;  %v5965_v42 = vpack.c.bf16 %v2438_v41, %v2430_v50  ;;  %v2429_v32 = vld [vmem:[#allocation6 + $0xea0] sm:$0xff]  ;;  %v2502_v50 = vld [vmem:[#allocation6 + $0x10e8] sm:$0xff] }
 0x337   :  { %6238 = vmatprep.subr.bf16.mxu1 %v6237_v45  ;;  %v2439_v45 = vld [vmem:[#allocation6 + $0xef0] sm:$0xff]  ;;  %v5967_v37 = vpack.c.bf16 %v2437_v43, %v2429_v32  ;;  %v5981_v43 = vpack.c.bf16 %v2502_v50, %v2494_v40  ;;  %v2568_v40 = vld [vmem:[#allocation6 + $0x12f8] sm:$0xff] }
 0x338   :  { %v2495_v32 = vld [vmem:[#allocation6 + $0x10b0] sm:$0xff] }
 0x339   :  { %5952 = vmatpush1.bf16.msra.mxu0 %v5951_v51  ;;  %v6255_v51 = vpack.c.bf16 %v2439_v45, %v2431_v44  ;;  %v2503_v44 = vld [vmem:[#allocation6 + $0x10f0] sm:$0xff]  ;;  %v2518_v45 = vld [vmem:[#allocation6 + $0x1168] sm:$0xff] }
 0x33a   :  { %6240 = vmatpush1.bf16.msra.mxu1 %v6239_v52  ;;  %5954 = vmatprep.subr.bf16.mxu0 %v5953_v53  ;;  %v5969_v52 = vpack.c.bf16 %v2454_v48, %v2446_v46  ;;  %v2445_v53 = vld [vmem:[#allocation6 + $0xf20] sm:$0xff]  ;;  %v6269_v46 = vpack.c.bf16 %v2504_v30, %v2496_v27  ;;  %v2512_v48 = vld [vmem:[#allocation6 + $0x1138] sm:$0xff] }
 0x33b   :  { %6242 = vmatprep.subr.bf16.mxu1 %v6241_v31  ;;  %v2455_v31 = vld [vmem:[#allocation6 + $0xf70] sm:$0xff]  ;;  %v5971_v3 = vpack.c.bf16 %v2453_v56, %v2445_v53  ;;  %v2517_v53 = vld [vmem:[#allocation6 + $0x1160] sm:$0xff] }
 0x33c   :  { %v2511_v56 = vld [vmem:[#allocation6 + $0x1130] sm:$0xff]  ;;  %v2557_v30 = vld [vmem:[#allocation6 + $0x12a0] sm:$0xff] }
 0x33d   :  { %5956 = vmatpush1.bf16.msra.mxu0 %v5955_v4  ;;  %v6259_v4 = vpack.c.bf16 %v2455_v31, %v2447_v58  ;;  %v6273_v58 = vpack.c.bf16 %v2520_v63, %v2512_v48  ;;  %v2526_v31 = vld [vmem:[#allocation6 + $0x11a8] sm:$0xff] }
 0x33e   :  { %6244 = vmatpush1.bf16.msra.mxu1 %v6243_v23  ;;  %5958 = vmatprep.subr.bf16.mxu0 %v5957_v5  ;;  %v5973_v23 = vpack.c.bf16 %v2470_v1, %v2462_v13  ;;  %v2461_v5 = vld [vmem:[#allocation6 + $0xfa0] sm:$0xff]  ;;  %v2534_v13 = vld [vmem:[#allocation6 + $0x11e8] sm:$0xff]  ;;  %v2528_v1 = vld [vmem:[#allocation6 + $0x11b8] sm:$0xff] }
 0x33f   :  { %6246 = vmatprep.subr.bf16.mxu1 %v6245_v14  ;;  %v2471_v14 = vld [vmem:[#allocation6 + $0xff0] sm:$0xff]  ;;  %v5975_v54 = vpack.c.bf16 %v2469_v6, %v2461_v5 }
 0x340   :  { %v2527_v5 = vld [vmem:[#allocation6 + $0x11b0] sm:$0xff] }
 0x341   :  { %5960 = vmatpush1.bf16.msra.mxu0 %v5959_v22  ;;  %v6263_v22 = vpack.c.bf16 %v2471_v14, %v2463_v8  ;;  %v2542_v8 = vld [vmem:[#allocation6 + $0x1228] sm:$0xff]  ;;  %v2544_v14 = vld [vmem:[#allocation6 + $0x1238] sm:$0xff] }
 0x342   :  { %6248 = vmatpush1.bf16.msra.mxu1 %v6247_v36  ;;  %5962 = vmatprep.subr.bf16.mxu0 %v5961_v11  ;;  %v5977_v36 = vpack.c.bf16 %v2486_v16, %v2478_v15  ;;  %v2477_v11 = vld [vmem:[#allocation6 + $0x1020] sm:$0xff]  ;;  %v2552_v15 = vld [vmem:[#allocation6 + $0x1278] sm:$0xff] }
 0x343   :  { %6250 = vmatprep.subr.bf16.mxu1 %v6249_v59  ;;  %v2487_v59 = vld [vmem:[#allocation6 + $0x1070] sm:$0xff]  ;;  %v5979_v41 = vpack.c.bf16 %v2485_v25, %v2477_v11  ;;  %v6281_v11 = vpack.c.bf16 %v2552_v15, %v2544_v14 }
 0x344   :  { %v2551_v25 = vld [vmem:[#allocation6 + $0x1270] sm:$0xff] }
 0x345   :  { %5964 = vmatpush1.bf16.msra.mxu0 %v5963_v61  ;;  %v6267_v61 = vpack.c.bf16 %v2487_v59, %v2479_v17  ;;  %v2566_v17 = vld [vmem:[#allocation6 + $0x12e8] sm:$0xff]  ;;  %v2560_v59 = vld [vmem:[#allocation6 + $0x12b8] sm:$0xff] }
 0x346   :  { %6252 = vmatpush1.bf16.msra.mxu1 %v6251_v28  ;;  %5966 = vmatprep.subr.bf16.mxu0 %v5965_v42  ;;  %v2493_v28 = vld [vmem:[#allocation6 + $0x10a0] sm:$0xff] }
 0x347   :  { %6254 = vmatprep.subr.bf16.mxu1 %v6253_v60  ;;  %v2501_v42 = vld [vmem:[#allocation6 + $0x10e0] sm:$0xff]  ;;  %v2510_v60 = vld [vmem:[#allocation6 + $0x1128] sm:$0xff] }
 0x348   :  { %v5983_v33 = vpack.c.bf16 %v2501_v42, %v2493_v28  ;;  %v2559_v28 = vld [vmem:[#allocation6 + $0x12b0] sm:$0xff]  ;;  %v6285_v42 = vpack.c.bf16 %v2568_v40, %v2560_v59 }
 0x349   :  { %5968 = vmatpush1.bf16.msra.mxu0 %v5967_v37  ;;  %v6271_v37 = vpack.c.bf16 %v2503_v44, %v2495_v32  ;;  %v2567_v32 = vld [vmem:[#allocation6 + $0x12f0] sm:$0xff]  ;;  %v2582_v44 = vld [vmem:[#allocation6 + $0x1368] sm:$0xff] }
 0x34a   :  { %6256 = vmatpush1.bf16.msra.mxu1 %v6255_v51  ;;  %5970 = vmatprep.subr.bf16.mxu0 %v5969_v52  ;;  %v5985_v51 = vpack.c.bf16 %v2518_v45, %v2510_v60  ;;  %v2509_v52 = vld [vmem:[#allocation6 + $0x1120] sm:$0xff]  ;;  %v2576_v60 = vld [vmem:[#allocation6 + $0x1338] sm:$0xff]  ;;  %v6287_v48 = vpack.c.bf16 %v2567_v32, %v2559_v28  ;;  %v2638_v28 = vld [vmem:[#allocation6 + $0x1528] sm:$0xff] }
 0x34b   :  { %6258 = vmatprep.subr.bf16.mxu1 %v6257_v62  ;;  %v2519_v62 = vld [vmem:[#allocation6 + $0x1170] sm:$0xff]  ;;  %v5987_v47 = vpack.c.bf16 %v2517_v53, %v2509_v52  ;;  %v2584_v45 = vld [vmem:[#allocation6 + $0x1378] sm:$0xff] }
 0x34c   :  { %v6275_v55 = vpack.c.bf16 %v2519_v62, %v2511_v56  ;;  %v6289_v52 = vpack.c.bf16 %v2584_v45, %v2576_v60  ;;  %v2583_v53 = vld [vmem:[#allocation6 + $0x1370] sm:$0xff]  ;;  %v2590_v56 = vld [vmem:[#allocation6 + $0x13a8] sm:$0xff]  ;;  %v2592_v62 = vld [vmem:[#allocation6 + $0x13b8] sm:$0xff] }
 0x34d   :  { %5972 = vmatpush1.bf16.msra.mxu0 %v5971_v3  ;;  %v5989_v3 = vpack.c.bf16 %v2534_v13, %v2526_v31  ;;  %v2600_v31 = vld [vmem:[#allocation6 + $0x13f8] sm:$0xff] }
 0x34e   :  { %6260 = vmatpush1.bf16.msra.mxu1 %v6259_v4  ;;  %5974 = vmatprep.subr.bf16.mxu0 %v5973_v23  ;;  %v2525_v4 = vld [vmem:[#allocation6 + $0x11a0] sm:$0xff]  ;;  %v2640_v32 = vld [vmem:[#allocation6 + $0x1538] sm:$0xff] }
 0x34f   :  { %6262 = vmatprep.subr.bf16.mxu1 %v6261_v9  ;;  %v2533_v23 = vld [vmem:[#allocation6 + $0x11e0] sm:$0xff]  ;;  %v2550_v9 = vld [vmem:[#allocation6 + $0x1268] sm:$0xff] }
 0x350   :  { %v5991_v16 = vpack.c.bf16 %v2533_v23, %v2525_v4  ;;  %v5993_v49 = vpack.c.bf16 %v2550_v9, %v2542_v8  ;;  %v6293_v4 = vpack.c.bf16 %v2600_v31, %v2592_v62  ;;  %v2599_v23 = vld [vmem:[#allocation6 + $0x13f0] sm:$0xff]  ;;  %v2616_v8 = vld [vmem:[#allocation6 + $0x1478] sm:$0xff] }
 0x351   :  { %5976 = vmatpush1.bf16.msra.mxu0 %v5975_v54  ;;  %v2541_v54 = vld [vmem:[#allocation6 + $0x1220] sm:$0xff] }
 0x352   :  { %6264 = vmatpush1.bf16.msra.mxu1 %v6263_v22  ;;  %5978 = vmatprep.subr.bf16.mxu0 %v5977_v36  ;;  %v2549_v22 = vld [vmem:[#allocation6 + $0x1260] sm:$0xff]  ;;  %v2543_v36 = vld [vmem:[#allocation6 + $0x1230] sm:$0xff] }
 0x353   :  { %6266 = vmatprep.subr.bf16.mxu1 %v6265_v26  ;;  %v2558_v26 = vld [vmem:[#allocation6 + $0x12a8] sm:$0xff]  ;;  %v5995_v50 = vpack.c.bf16 %v2549_v22, %v2541_v54  ;;  %v2615_v22 = vld [vmem:[#allocation6 + $0x1470] sm:$0xff] }
 0x354   :  { %4001 = vmatmul.mubr.f32.vlgmr.msra.gmra.mrb[20].mxu0 %v7046_v57  ;;  %v5997_v27 = vpack.c.bf16 %v2566_v17, %v2558_v26  ;;  %v2632_v26 = vld [vmem:[#allocation6 + $0x14f8] sm:$0xff] }
 0x355   :  { %4356 = vmatmul.mubr.f32.vlgmr.msra.gmra.mrb[20].mxu1 %v7046_v57  ;;  %5980 = vmatpush1.bf16.msra.mxu0 %v5979_v41  ;;  %v2536_v57 = vld [vmem:[#allocation6 + $0x11f8] sm:$0xff]  ;;  %v6283_v41 = vpack.c.bf16 %v2551_v25, %v2543_v36  ;;  %v2622_v36 = vld [vmem:[#allocation6 + $0x14a8] sm:$0xff] }
 0x356   :  { %4071 = vmatprep.mubr.f32.mxu0 %v7066_v7  ;;  %6268 = vmatpush1.bf16.msra.mxu1 %v6267_v61  ;;  %v6277_v6 = vpack.c.bf16 %v2536_v57, %v2528_v1  ;;  %v2565_v61 = vld [vmem:[#allocation6 + $0x12e0] sm:$0xff]  ;;  %v2624_v25 = vld [vmem:[#allocation6 + $0x14b8] sm:$0xff] }
 0x357   :  { %4426 = vmatprep.mubr.f32.mxu1 %v7066_v7  ;;  %5982 = vmatprep.subr.bf16.mxu0 %v5981_v43  ;;  %v2535_v7 = vld [vmem:[#allocation6 + $0x11f0] sm:$0xff]  ;;  %v2574_v43 = vld [vmem:[#allocation6 + $0x1328] sm:$0xff] }
 0x358   :  { %6270 = vmatprep.subr.bf16.mxu1 %v6269_v46  ;;  %v6279_v24 = vpack.c.bf16 %v2535_v7, %v2527_v5  ;;  %v5999_v46 = vpack.c.bf16 %v2565_v61, %v2557_v30  ;;  %v6001_v63 = vpack.c.bf16 %v2582_v44, %v2574_v43  ;;  %v2606_v5 = vld [vmem:[#allocation6 + $0x1428] sm:$0xff]  ;;  %v2608_v7 = vld [vmem:[#allocation6 + $0x1438] sm:$0xff]  ;;  %v6301_v30 = vpack.c.bf16 %v2632_v26, %v2624_v25  ;;  %v2631_v61 = vld [vmem:[#allocation6 + $0x14f0] sm:$0xff] }
 0x359   :  { %5984 = vmatpush1.bf16.msra.mxu0 %v5983_v33  ;;  %v2573_v33 = vld [vmem:[#allocation6 + $0x1320] sm:$0xff]  ;;  %v6297_v54 = vpack.c.bf16 %v2616_v8, %v2608_v7  ;;  %v2648_v43 = vld [vmem:[#allocation6 + $0x1578] sm:$0xff] }
 0x35a   :  { %6272 = vmatpush1.bf16.msra.mxu1 %v6271_v37  ;;  %5986 = vmatprep.subr.bf16.mxu0 %v5985_v51  ;;  %v2581_v37 = vld [vmem:[#allocation6 + $0x1360] sm:$0xff]  ;;  %v2575_v51 = vld [vmem:[#allocation6 + $0x1330] sm:$0xff] }
 0x35b   :  { %6274 = vmatprep.subr.bf16.mxu1 %v6273_v58  ;;  %v2598_v58 = vld [vmem:[#allocation6 + $0x13e8] sm:$0xff]  ;;  %v6003_v13 = vpack.c.bf16 %v2581_v37, %v2573_v33  ;;  %v6291_v1 = vpack.c.bf16 %v2583_v53, %v2575_v51  ;;  %v6305_v33 = vpack.c.bf16 %v2648_v43, %v2640_v32  ;;  %v2647_v37 = vld [vmem:[#allocation6 + $0x1570] sm:$0xff]  ;;  %v2656_v53 = vld [vmem:[#allocation6 + $0x15b8] sm:$0xff] }
 0x35c   :  { %v6005_v57 = vpack.c.bf16 %v2598_v58, %v2590_v56  ;;  %v2654_v51 = vld [vmem:[#allocation6 + $0x15a8] sm:$0xff]  ;;  %v2664_v56 = vld [vmem:[#allocation6 + $0x15f8] sm:$0xff] }
 0x35d   :  { %5988 = vmatpush1.bf16.msra.mxu0 %v5987_v47  ;;  %v2589_v47 = vld [vmem:[#allocation6 + $0x13a0] sm:$0xff] }
 0x35e   :  { %6276 = vmatpush1.bf16.msra.mxu1 %v6275_v55  ;;  %5990 = vmatprep.subr.bf16.mxu0 %v5989_v3  ;;  %v2597_v55 = vld [vmem:[#allocation6 + $0x13e0] sm:$0xff]  ;;  %v2591_v3 = vld [vmem:[#allocation6 + $0x13b0] sm:$0xff] }
 0x35f   :  { %6278 = vmatprep.subr.bf16.mxu1 %v6277_v6  ;;  %v2614_v6 = vld [vmem:[#allocation6 + $0x1468] sm:$0xff]  ;;  %v6007_v9 = vpack.c.bf16 %v2597_v55, %v2589_v47  ;;  %v6295_v14 = vpack.c.bf16 %v2599_v23, %v2591_v3  ;;  %v6309_v47 = vpack.c.bf16 %v2664_v56, %v2656_v53  ;;  %v2663_v55 = vld [vmem:[#allocation6 + $0x15f0] sm:$0xff]  ;;  %v2672_v23 = vld [vmem:[#allocation6 + $0x1638] sm:$0xff] }
 0x360   :  { %v6009_v15 = vpack.c.bf16 %v2614_v6, %v2606_v5  ;;  %v2670_v3 = vld [vmem:[#allocation6 + $0x1628] sm:$0xff]  ;;  %v2680_v5 = vld [vmem:[#allocation6 + $0x1678] sm:$0xff] }
 0x361   :  { %5992 = vmatpush1.bf16.msra.mxu0 %v5991_v16  ;;  %v2605_v16 = vld [vmem:[#allocation6 + $0x1420] sm:$0xff] }
 0x362   :  { %6280 = vmatpush1.bf16.msra.mxu1 %v6279_v24  ;;  %5994 = vmatprep.subr.bf16.mxu0 %v5993_v49  ;;  %v2613_v24 = vld [vmem:[#allocation6 + $0x1460] sm:$0xff]  ;;  %v2607_v49 = vld [vmem:[#allocation6 + $0x1430] sm:$0xff] }
 0x363   :  { %6282 = vmatprep.subr.bf16.mxu1 %v6281_v11  ;;  %v2630_v11 = vld [vmem:[#allocation6 + $0x14e8] sm:$0xff]  ;;  %v6011_v17 = vpack.c.bf16 %v2613_v24, %v2605_v16  ;;  %v6299_v59 = vpack.c.bf16 %v2615_v22, %v2607_v49  ;;  %v6313_v16 = vpack.c.bf16 %v2680_v5, %v2672_v23  ;;  %v2679_v24 = vld [vmem:[#allocation6 + $0x1670] sm:$0xff]  ;;  %v2688_v22 = vld [vmem:[#allocation6 + $0x16b8] sm:$0xff] }
 0x364   :  { %v6013_v40 = vpack.c.bf16 %v2630_v11, %v2622_v36  ;;  %v2686_v49 = vld [vmem:[#allocation6 + $0x16a8] sm:$0xff]  ;;  %v2696_v36 = vld [vmem:[#allocation6 + $0x16f8] sm:$0xff] }
 0x365   :  { %5996 = vmatpush1.bf16.msra.mxu0 %v5995_v50  ;;  %v2621_v50 = vld [vmem:[#allocation6 + $0x14a0] sm:$0xff] }
 0x366   :  { %6284 = vmatpush1.bf16.msra.mxu1 %v6283_v41  ;;  %5998 = vmatprep.subr.bf16.mxu0 %v5997_v27  ;;  %v2629_v41 = vld [vmem:[#allocation6 + $0x14e0] sm:$0xff]  ;;  %v2623_v27 = vld [vmem:[#allocation6 + $0x14b0] sm:$0xff] }
 0x367   :  { %6286 = vmatprep.subr.bf16.mxu1 %v6285_v42  ;;  %v2646_v42 = vld [vmem:[#allocation6 + $0x1568] sm:$0xff]  ;;  %v6015_v44 = vpack.c.bf16 %v2629_v41, %v2621_v50  ;;  %v6303_v60 = vpack.c.bf16 %v2631_v61, %v2623_v27  ;;  %v6317_v50 = vpack.c.bf16 %v2696_v36, %v2688_v22  ;;  %v2695_v41 = vld [vmem:[#allocation6 + $0x16f0] sm:$0xff]  ;;  %v2704_v61 = vld [vmem:[#allocation6 + $0x1738] sm:$0xff] }
 0x368   :  { %v6017_v45 = vpack.c.bf16 %v2646_v42, %v2638_v28  ;;  %v2702_v27 = vld [vmem:[#allocation6 + $0x1728] sm:$0xff]  ;;  %v2712_v28 = vld [vmem:[#allocation6 + $0x1778] sm:$0xff]  ;;  %v2749_v36 = vld [vmem:[#allocation6 + $0x18a0] sm:$0xff] }
 0x369   :  { %6000 = vmatpush1.bf16.msra.mxu0 %v5999_v46  ;;  %v2637_v46 = vld [vmem:[#allocation6 + $0x1520] sm:$0xff] }
 0x36a   :  { %6288 = vmatpush1.bf16.msra.mxu1 %v6287_v48  ;;  %6002 = vmatprep.subr.bf16.mxu0 %v6001_v63  ;;  %v2645_v48 = vld [vmem:[#allocation6 + $0x1560] sm:$0xff]  ;;  %v2639_v63 = vld [vmem:[#allocation6 + $0x1530] sm:$0xff] }
 0x36b   :  { %6290 = vmatprep.subr.bf16.mxu1 %v6289_v52  ;;  %v2662_v52 = vld [vmem:[#allocation6 + $0x15e8] sm:$0xff]  ;;  %v6019_v58 = vpack.c.bf16 %v2645_v48, %v2637_v46  ;;  %v6307_v62 = vpack.c.bf16 %v2647_v37, %v2639_v63  ;;  %v6321_v46 = vpack.c.bf16 %v2712_v28, %v2704_v61  ;;  %v2711_v48 = vld [vmem:[#allocation6 + $0x1770] sm:$0xff]  ;;  %v2720_v37 = vld [vmem:[#allocation6 + $0x17b8] sm:$0xff] }
 0x36c   :  { %v6021_v31 = vpack.c.bf16 %v2662_v52, %v2654_v51  ;;  %v2718_v63 = vld [vmem:[#allocation6 + $0x17a8] sm:$0xff]  ;;  %v2728_v51 = vld [vmem:[#allocation6 + $0x17f8] sm:$0xff] }
 0x36d   :  { %6004 = vmatpush1.bf16.msra.mxu0 %v6003_v13  ;;  %v2653_v13 = vld [vmem:[#allocation6 + $0x15a0] sm:$0xff] }
 0x36e   :  { %6292 = vmatpush1.bf16.msra.mxu1 %v6291_v1  ;;  %6006 = vmatprep.subr.bf16.mxu0 %v6005_v57  ;;  %v2661_v1 = vld [vmem:[#allocation6 + $0x15e0] sm:$0xff]  ;;  %v2655_v57 = vld [vmem:[#allocation6 + $0x15b0] sm:$0xff] }
 0x36f   :  { %6294 = vmatprep.subr.bf16.mxu1 %v6293_v4  ;;  %v2678_v4 = vld [vmem:[#allocation6 + $0x1668] sm:$0xff]  ;;  %v6023_v6 = vpack.c.bf16 %v2661_v1, %v2653_v13  ;;  %v6311_v7 = vpack.c.bf16 %v2663_v55, %v2655_v57  ;;  %v6325_v13 = vpack.c.bf16 %v2728_v51, %v2720_v37  ;;  %v2727_v1 = vld [vmem:[#allocation6 + $0x17f0] sm:$0xff]  ;;  %v2736_v55 = vld [vmem:[#allocation6 + $0x1838] sm:$0xff] }
 0x370   :  { %v6025_v8 = vpack.c.bf16 %v2678_v4, %v2670_v3  ;;  %v2734_v57 = vld [vmem:[#allocation6 + $0x1828] sm:$0xff]  ;;  %v2744_v3 = vld [vmem:[#allocation6 + $0x1878] sm:$0xff]  ;;  %v2781_v51 = vld [vmem:[#allocation6 + $0x19a0] sm:$0xff] }
 0x371   :  { %6008 = vmatpush1.bf16.msra.mxu0 %v6007_v9  ;;  %v2669_v9 = vld [vmem:[#allocation6 + $0x1620] sm:$0xff] }
 0x372   :  { %6296 = vmatpush1.bf16.msra.mxu1 %v6295_v14  ;;  %6010 = vmatprep.subr.bf16.mxu0 %v6009_v15  ;;  %v2677_v14 = vld [vmem:[#allocation6 + $0x1660] sm:$0xff]  ;;  %v2671_v15 = vld [vmem:[#allocation6 + $0x1630] sm:$0xff] }
 0x373   :  { %6298 = vmatprep.subr.bf16.mxu1 %v6297_v54  ;;  %v2694_v54 = vld [vmem:[#allocation6 + $0x16e8] sm:$0xff]  ;;  %v6027_v11 = vpack.c.bf16 %v2677_v14, %v2669_v9  ;;  %v6315_v25 = vpack.c.bf16 %v2679_v24, %v2671_v15  ;;  %v2735_v9 = vld [vmem:[#allocation6 + $0x1830] sm:$0xff] }
 0x374   :  { %v6029_v26 = vpack.c.bf16 %v2694_v54, %v2686_v49  ;;  %v2743_v14 = vld [vmem:[#allocation6 + $0x1870] sm:$0xff]  ;;  %v2750_v15 = vld [vmem:[#allocation6 + $0x18a8] sm:$0xff]  ;;  %v2752_v49 = vld [vmem:[#allocation6 + $0x18b8] sm:$0xff] }
 0x375   :  { %6012 = vmatpush1.bf16.msra.mxu0 %v6011_v17  ;;  %v2685_v17 = vld [vmem:[#allocation6 + $0x16a0] sm:$0xff]  ;;  %v2760_v54 = vld [vmem:[#allocation6 + $0x18f8] sm:$0xff]  ;;  %v6331_v22 = vpack.c.bf16 %v2743_v14, %v2735_v9 }
 0x376   :  { %6300 = vmatpush1.bf16.msra.mxu1 %v6299_v59  ;;  %6014 = vmatprep.subr.bf16.mxu0 %v6013_v40  ;;  %v2693_v59 = vld [vmem:[#allocation6 + $0x16e0] sm:$0xff]  ;;  %v2687_v40 = vld [vmem:[#allocation6 + $0x16b0] sm:$0xff]  ;;  %v2824_v9 = vld [vmem:[#allocation6 + $0x1af8] sm:$0xff] }
 0x377   :  { %6302 = vmatprep.subr.bf16.mxu1 %v6301_v30  ;;  %v2710_v30 = vld [vmem:[#allocation6 + $0x1768] sm:$0xff]  ;;  %v6031_v42 = vpack.c.bf16 %v2693_v59, %v2685_v17  ;;  %v6319_v32 = vpack.c.bf16 %v2695_v41, %v2687_v40  ;;  %v2759_v17 = vld [vmem:[#allocation6 + $0x18f0] sm:$0xff]  ;;  %v2768_v41 = vld [vmem:[#allocation6 + $0x1938] sm:$0xff] }
 0x378   :  { %v6033_v43 = vpack.c.bf16 %v2710_v30, %v2702_v27  ;;  %v2766_v59 = vld [vmem:[#allocation6 + $0x1928] sm:$0xff]  ;;  %v2776_v27 = vld [vmem:[#allocation6 + $0x1978] sm:$0xff] }
 0x379   :  { %6016 = vmatpush1.bf16.msra.mxu0 %v6015_v44  ;;  %v2701_v44 = vld [vmem:[#allocation6 + $0x1720] sm:$0xff]  ;;  %v2774_v40 = vld [vmem:[#allocation6 + $0x1968] sm:$0xff] }
 0x37a   :  { %6304 = vmatpush1.bf16.msra.mxu1 %v6303_v60  ;;  %6018 = vmatprep.subr.bf16.mxu0 %v6017_v45  ;;  %v2709_v60 = vld [vmem:[#allocation6 + $0x1760] sm:$0xff]  ;;  %v2703_v45 = vld [vmem:[#allocation6 + $0x1730] sm:$0xff]  ;;  %v6049_v28 = vpack.c.bf16 %v2774_v40, %v2766_v59  ;;  %v2832_v59 = vld [vmem:[#allocation6 + $0x1b38] sm:$0xff] }
 0x37b   :  { %6306 = vmatprep.subr.bf16.mxu1 %v6305_v33  ;;  %v2726_v33 = vld [vmem:[#allocation6 + $0x17e8] sm:$0xff]  ;;  %v6035_v52 = vpack.c.bf16 %v2709_v60, %v2701_v44  ;;  %v6323_v53 = vpack.c.bf16 %v2711_v48, %v2703_v45  ;;  %v6337_v44 = vpack.c.bf16 %v2776_v27, %v2768_v41  ;;  %v2775_v60 = vld [vmem:[#allocation6 + $0x1970] sm:$0xff]  ;;  %v2784_v48 = vld [vmem:[#allocation6 + $0x19b8] sm:$0xff] }
 0x37c   :  { %v6037_v56 = vpack.c.bf16 %v2726_v33, %v2718_v63  ;;  %v2782_v45 = vld [vmem:[#allocation6 + $0x19a8] sm:$0xff]  ;;  %v2840_v40 = vld [vmem:[#allocation6 + $0x1b78] sm:$0xff] }
 0x37d   :  { %6020 = vmatpush1.bf16.msra.mxu0 %v6019_v58  ;;  %v2717_v58 = vld [vmem:[#allocation6 + $0x17a0] sm:$0xff] }
 0x37e   :  { %6308 = vmatpush1.bf16.msra.mxu1 %v6307_v62  ;;  %6022 = vmatprep.subr.bf16.mxu0 %v6021_v31  ;;  %v2725_v62 = vld [vmem:[#allocation6 + $0x17e0] sm:$0xff]  ;;  %v2719_v31 = vld [vmem:[#allocation6 + $0x17b0] sm:$0xff] }
 0x37f   :  { %6310 = vmatprep.subr.bf16.mxu1 %v6309_v47  ;;  %v2742_v47 = vld [vmem:[#allocation6 + $0x1868] sm:$0xff]  ;;  %v6039_v4 = vpack.c.bf16 %v2725_v62, %v2717_v58  ;;  %v6327_v23 = vpack.c.bf16 %v2727_v1, %v2719_v31  ;;  %v2800_v31 = vld [vmem:[#allocation6 + $0x1a38] sm:$0xff] }
 0x380   :  { %v6041_v5 = vpack.c.bf16 %v2742_v47, %v2734_v57  ;;  %v2798_v58 = vld [vmem:[#allocation6 + $0x1a28] sm:$0xff] }
 0x381   :  { %6024 = vmatpush1.bf16.msra.mxu0 %v6023_v6  ;;  %v2733_v6 = vld [vmem:[#allocation6 + $0x1820] sm:$0xff]  ;;  %v2806_v62 = vld [vmem:[#allocation6 + $0x1a68] sm:$0xff] }
 0x382   :  { %6312 = vmatpush1.bf16.msra.mxu1 %v6311_v7  ;;  %6026 = vmatprep.subr.bf16.mxu0 %v6025_v8  ;;  %v2741_v7 = vld [vmem:[#allocation6 + $0x1860] sm:$0xff]  ;;  %v6329_v8 = vpack.c.bf16 %v2744_v3, %v2736_v55  ;;  %v6057_v47 = vpack.c.bf16 %v2806_v62, %v2798_v58 }
 0x383   :  { %6314 = vmatprep.subr.bf16.mxu1 %v6313_v16  ;;  %v2758_v16 = vld [vmem:[#allocation6 + $0x18e8] sm:$0xff]  ;;  %v6043_v24 = vpack.c.bf16 %v2741_v7, %v2733_v6  ;;  %v2797_v55 = vld [vmem:[#allocation6 + $0x1a20] sm:$0xff] }
 0x384   :  { %v2805_v3 = vld [vmem:[#allocation6 + $0x1a60] sm:$0xff]  ;;  %v2814_v6 = vld [vmem:[#allocation6 + $0x1aa8] sm:$0xff] }
 0x385   :  { %6028 = vmatpush1.bf16.msra.mxu0 %v6027_v11  ;;  %v2757_v11 = vld [vmem:[#allocation6 + $0x18e0] sm:$0xff]  ;;  %v2822_v7 = vld [vmem:[#allocation6 + $0x1ae8] sm:$0xff]  ;;  %v6059_v14 = vpack.c.bf16 %v2805_v3, %v2797_v55 }
 0x386   :  { %6316 = vmatpush1.bf16.msra.mxu1 %v6315_v25  ;;  %6030 = vmatprep.subr.bf16.mxu0 %v6029_v26  ;;  %v2751_v25 = vld [vmem:[#allocation6 + $0x18b0] sm:$0xff]  ;;  %v6045_v26 = vpack.c.bf16 %v2758_v16, %v2750_v15  ;;  %v6047_v30 = vpack.c.bf16 %v2757_v11, %v2749_v36  ;;  %v7105_v15 = vld [vmem:[#allocation7] sm:$0xff]  ;;  %v2862_v55 = vld [vmem:[#allocation6 + $0x1c28] sm:$0xff] }
 0x387   :  { %6318 = vmatprep.subr.bf16.mxu1 %v6317_v50  ;;  %v6333_v50 = vpack.c.bf16 %v2760_v54, %v2752_v49  ;;  %v6335_v61 = vpack.c.bf16 %v2759_v17, %v2751_v25  ;;  %v2813_v49 = vld [vmem:[#allocation6 + $0x1aa0] sm:$0xff]  ;;  %v2823_v11 = vld [vmem:[#allocation6 + $0x1af0] sm:$0xff]  ;;  %v2830_v25 = vld [vmem:[#allocation6 + $0x1b28] sm:$0xff]  ;;  %v3118_v17 = vrot.slane %v7105_v15, %v6976_v34  ;;  %v3122_v41 = vrot.slane %v7105_v15, %v6978_v35 }
 0x388   :  { %v2821_v54 = vld [vmem:[#allocation6 + $0x1ae0] sm:$0xff]  ;;  %v2831_v34 = vld [vmem:[#allocation6 + $0x1b30] sm:$0xff]  ;;  %v2870_v3 = vld [vmem:[#allocation6 + $0x1c68] sm:$0xff] }
 0x389   :  { %6032 = vmatpush1.bf16.msra.mxu0 %v6031_v42  ;;  %v2765_v42 = vld [vmem:[#allocation6 + $0x1920] sm:$0xff]  ;;  %v6063_v27 = vpack.c.bf16 %v2821_v54, %v2813_v49  ;;  %v2863_v49 = vld [vmem:[#allocation6 + $0x1c30] sm:$0xff] }
 0x38a   :  { %6320 = vmatpush1.bf16.msra.mxu1 %v6319_v32  ;;  %6034 = vmatprep.subr.bf16.mxu0 %v6033_v43  ;;  %v2773_v32 = vld [vmem:[#allocation6 + $0x1960] sm:$0xff]  ;;  %v2767_v43 = vld [vmem:[#allocation6 + $0x1930] sm:$0xff] }
 0x38b   :  { %6322 = vmatprep.subr.bf16.mxu1 %v6321_v46  ;;  %v2790_v46 = vld [vmem:[#allocation6 + $0x19e8] sm:$0xff]  ;;  %v6051_v63 = vpack.c.bf16 %v2773_v32, %v2765_v42  ;;  %v6339_v33 = vpack.c.bf16 %v2775_v60, %v2767_v43  ;;  %v2829_v42 = vld [vmem:[#allocation6 + $0x1b20] sm:$0xff]  ;;  %v2839_v60 = vld [vmem:[#allocation6 + $0x1b70] sm:$0xff] }
 0x38c   :  { %v6053_v37 = vpack.c.bf16 %v2790_v46, %v2782_v45  ;;  %v2837_v32 = vld [vmem:[#allocation6 + $0x1b60] sm:$0xff]  ;;  %v2846_v45 = vld [vmem:[#allocation6 + $0x1ba8] sm:$0xff] }
 0x38d   :  { %6036 = vmatpush1.bf16.msra.mxu0 %v6035_v52  ;;  %v2789_v52 = vld [vmem:[#allocation6 + $0x19e0] sm:$0xff] }
 0x38e   :  { %6324 = vmatpush1.bf16.msra.mxu1 %v6323_v53  ;;  %6038 = vmatprep.subr.bf16.mxu0 %v6037_v56  ;;  %v2783_v53 = vld [vmem:[#allocation6 + $0x19b0] sm:$0xff]  ;;  %v6055_v1 = vpack.c.bf16 %v2789_v52, %v2781_v51  ;;  %v6067_v51 = vpack.c.bf16 %v2837_v32, %v2829_v42  ;;  %v2845_v58 = vld [vmem:[#allocation6 + $0x1ba0] sm:$0xff]  ;;  %v2902_v42 = vld [vmem:[#allocation6 + $0x1d68] sm:$0xff] }
 0x38f   :  { %6326 = vmatprep.subr.bf16.mxu1 %v6325_v13  ;;  %v2808_v13 = vld [vmem:[#allocation6 + $0x1a78] sm:$0xff]  ;;  %v2853_v62 = vld [vmem:[#allocation6 + $0x1be0] sm:$0xff] }
 0x390   :  { %v2896_v32 = vld [vmem:[#allocation6 + $0x1d38] sm:$0xff] }
 0x391   :  { %6040 = vmatpush1.bf16.msra.mxu0 %v6039_v4  ;;  %v2799_v4 = vld [vmem:[#allocation6 + $0x1a30] sm:$0xff] }
 0x392   :  { %6328 = vmatpush1.bf16.msra.mxu1 %v6327_v23  ;;  %6042 = vmatprep.subr.bf16.mxu0 %v6041_v5  ;;  %v6345_v23 = vpack.c.bf16 %v2808_v13, %v2800_v31  ;;  %v2807_v5 = vld [vmem:[#allocation6 + $0x1a70] sm:$0xff] }
 0x393   :  { %6330 = vmatprep.subr.bf16.mxu1 %v6329_v8  ;;  %v2816_v8 = vld [vmem:[#allocation6 + $0x1ab8] sm:$0xff]  ;;  %v6347_v16 = vpack.c.bf16 %v2807_v5, %v2799_v4  ;;  %v2847_v31 = vld [vmem:[#allocation6 + $0x1bb0] sm:$0xff] }
 0x394   :  { %4072 = vmatmul.mubr.f32.vlgmr.msra.gmra.mrb[20].mxu0 %v7049_v38  ;;  %v6349_v36 = vpack.c.bf16 %v2824_v9, %v2816_v8  ;;  %v2872_v5 = vld [vmem:[#allocation6 + $0x1c78] sm:$0xff] }
 0x395   :  { %4427 = vmatmul.mubr.f32.vlgmr.msra.gmra.mrb[20].mxu1 %v7049_v38  ;;  %6044 = vmatpush1.bf16.msra.mxu0 %v6043_v24  ;;  %v2792_v38 = vld [vmem:[#allocation6 + $0x19f8] sm:$0xff]  ;;  %v6061_v24 = vpack.c.bf16 %v2822_v7, %v2814_v6  ;;  %v6071_v7 = vpack.c.bf16 %v2853_v62, %v2845_v58  ;;  %v2919_v62 = vld [vmem:[#allocation6 + $0x1df0] sm:$0xff] }
 0x396   :  { %4142 = vmatprep.mubr.f32.mxu0 %v7069_v2  ;;  %6332 = vmatpush1.bf16.msra.mxu1 %v6331_v22  ;;  %v6341_v56 = vpack.c.bf16 %v2792_v38, %v2784_v48  ;;  %v2815_v22 = vld [vmem:[#allocation6 + $0x1ab0] sm:$0xff]  ;;  %v2848_v38 = vld [vmem:[#allocation6 + $0x1bb8] sm:$0xff] }
 0x397   :  { %4497 = vmatprep.mubr.f32.mxu1 %v7069_v2  ;;  %6046 = vmatprep.subr.bf16.mxu0 %v6045_v26  ;;  %v2791_v2 = vld [vmem:[#allocation6 + $0x19f0] sm:$0xff]  ;;  %v2838_v26 = vld [vmem:[#allocation6 + $0x1b68] sm:$0xff] }
 0x398   :  { %6334 = vmatprep.subr.bf16.mxu1 %v6333_v50  ;;  %v6343_v57 = vpack.c.bf16 %v2791_v2, %v2783_v53  ;;  %v3126_v50 = vrot.slane %v7105_v15, %v6959_v10  ;;  %v2854_v10 = vld [vmem:[#allocation6 + $0x1be8] sm:$0xff] }
 0x399   :  { %6048 = vmatpush1.bf16.msra.mxu0 %v6047_v30  ;;  %v3130_v30 = vrot.slane %v7105_v15, %v6982_v39  ;;  %v6069_v2 = vpack.c.bf16 %v2854_v10, %v2846_v45  ;;  %v2893_v45 = vld [vmem:[#allocation6 + $0x1d20] sm:$0xff] }
 0x39a   :  { %6336 = vmatpush1.bf16.msra.mxu1 %v6335_v61  ;;  %6050 = vmatprep.subr.bf16.mxu0 %v6049_v28  ;;  %v6351_v61 = vpack.c.bf16 %v2823_v11, %v2815_v22  ;;  %v6065_v28 = vpack.c.bf16 %v2838_v26, %v2830_v25  ;;  %v2871_v22 = vld [vmem:[#allocation6 + $0x1c70] sm:$0xff]  ;;  %v2886_v11 = vld [vmem:[#allocation6 + $0x1ce8] sm:$0xff]  ;;  %v2880_v25 = vld [vmem:[#allocation6 + $0x1cb8] sm:$0xff] }
 0x39b   :  { %6338 = vmatprep.subr.bf16.mxu1 %v6337_v44  ;;  %v6353_v44 = vpack.c.bf16 %v2840_v40, %v2832_v59  ;;  %v2888_v26 = vld [vmem:[#allocation6 + $0x1cf8] sm:$0xff]  ;;  %v6363_v59 = vpack.c.bf16 %v2871_v22, %v2863_v49  ;;  %v2901_v10 = vld [vmem:[#allocation6 + $0x1d60] sm:$0xff] }
 0x39c   :  { %v2952_v49 = vld [vmem:[#allocation6 + $0x1ef8] sm:$0xff] }
 0x39d   :  { %6052 = vmatpush1.bf16.msra.mxu0 %v6051_v63  ;;  %v2856_v63 = vld [vmem:[#allocation6 + $0x1bf8] sm:$0xff] }
 0x39e   :  { %6340 = vmatpush1.bf16.msra.mxu1 %v6339_v33  ;;  %6054 = vmatprep.subr.bf16.mxu0 %v6053_v37 }
 0x39f   :  { %6342 = vmatprep.subr.bf16.mxu1 %v6341_v56  ;;  %v6355_v56 = vpack.c.bf16 %v2839_v60, %v2831_v34  ;;  %v2904_v34 = vld [vmem:[#allocation6 + $0x1d78] sm:$0xff] }
 0x3a1   :  { %6056 = vmatpush1.bf16.msra.mxu0 %v6055_v1 }
 0x3a2   :  { %6344 = vmatpush1.bf16.msra.mxu1 %v6343_v57  ;;  %6058 = vmatprep.subr.bf16.mxu0 %v6057_v47  ;;  %v6357_v57 = vpack.c.bf16 %v2856_v63, %v2848_v38  ;;  %v2855_v47 = vld [vmem:[#allocation6 + $0x1bf0] sm:$0xff]  ;;  %v2910_v38 = vld [vmem:[#allocation6 + $0x1da8] sm:$0xff] }
 0x3a3   :  { %6346 = vmatprep.subr.bf16.mxu1 %v6345_v23  ;;  %v2864_v23 = vld [vmem:[#allocation6 + $0x1c38] sm:$0xff]  ;;  %v6359_v9 = vpack.c.bf16 %v2855_v47, %v2847_v31  ;;  %v2918_v63 = vld [vmem:[#allocation6 + $0x1de8] sm:$0xff] }
 0x3a4   :  { %v6361_v54 = vpack.c.bf16 %v2872_v5, %v2864_v23  ;;  %v2926_v31 = vld [vmem:[#allocation6 + $0x1e28] sm:$0xff]  ;;  %v2933_v23 = vld [vmem:[#allocation6 + $0x1e60] sm:$0xff]  ;;  %v2927_v5 = vld [vmem:[#allocation6 + $0x1e30] sm:$0xff] }
 0x3a5   :  { %6060 = vmatpush1.bf16.msra.mxu0 %v6059_v14  ;;  %v6073_v14 = vpack.c.bf16 %v2870_v3, %v2862_v55 }
 0x3a6   :  { %6348 = vmatpush1.bf16.msra.mxu1 %v6347_v16  ;;  %6062 = vmatprep.subr.bf16.mxu0 %v6061_v24  ;;  %v2861_v16 = vld [vmem:[#allocation6 + $0x1c20] sm:$0xff] }
 0x3a7   :  { %v3505_v43 = vpop.f32.mrb[18].mxu0  ;;  %6350 = vmatprep.subr.bf16.mxu1 %v6349_v36  ;;  %v2869_v24 = vld [vmem:[#allocation6 + $0x1c60] sm:$0xff]  ;;  %v2878_v36 = vld [vmem:[#allocation6 + $0x1ca8] sm:$0xff] }
 0x3a8   :  { %v6475_v46 = vadd.f32 %v3505_v43, %v3118_v17  ;;  %v3860_v48 = vpop.f32.mrb[18].mxu1  ;;  %v3507_v35 = vpop.f32.mrb[19].mxu0  ;;  %v6075_v17 = vpack.c.bf16 %v2869_v24, %v2861_v16  ;;  %v6077_v40 = vpack.c.bf16 %v2886_v11, %v2878_v36  ;;  %v2950_v16 = vld [vmem:[#allocation6 + $0x1ee8] sm:$0xff]  ;;  %v2944_v24 = vld [vmem:[#allocation6 + $0x1eb8] sm:$0xff]  ;;  %v2941_v11 = vld [vmem:[#allocation6 + $0x1ea0] sm:$0xff] }
 0x3a9   :  { %v6477_v33 = vadd.f32 %v3860_v48, %v3126_v50  ;;  %v6476_v37 = vadd.f32 %v3507_v35, %v3122_v41  ;;  %v3862_v39 = vpop.f32.mrb[19].mxu1  ;;  %6064 = vmatpush1.bf16.msra.mxu0 %v6063_v27  ;;  %v2877_v50 = vld [vmem:[#allocation6 + $0x1ca0] sm:$0xff]  ;;  %v2879_v27 = vld [vmem:[#allocation6 + $0x1cb0] sm:$0xff]  ;;  %v6369_v48 = vpack.c.bf16 %v2904_v34, %v2896_v32 }
 0x3aa   :  { %v4575_v52 = vmax.f32 %v6475_v46, 0.0  ;;  %v6478_v53 = vadd.f32 %v3862_v39, %v3130_v30  ;;  %6352 = vmatpush1.bf16.msra.mxu1 %v6351_v61  ;;  %6066 = vmatprep.subr.bf16.mxu0 %v6065_v28  ;;  %v2885_v41 = vld [vmem:[#allocation6 + $0x1ce0] sm:$0xff]  ;;  %v6365_v30 = vpack.c.bf16 %v2888_v26, %v2880_v25  ;;  %v2887_v61 = vld [vmem:[#allocation6 + $0x1cf0] sm:$0xff]  ;;  %v2894_v28 = vld [vmem:[#allocation6 + $0x1d28] sm:$0xff]  ;;  %v6083_v39 = vpack.c.bf16 %v2901_v10, %v2893_v45 }
 0x3ab   :  { %v4577_v13 = vmax.f32 %v6477_v33, 0.0  ;;  %v4576_v1 = vmax.f32 %v6476_v37, 0.0  ;;  %6354 = vmatprep.subr.bf16.mxu1 %v6353_v44  ;;  %v6079_v43 = vpack.c.bf16 %v2885_v41, %v2877_v50  ;;  %v6367_v44 = vpack.c.bf16 %v2887_v61, %v2879_v27  ;;  %v2895_v46 = vld [vmem:[#allocation6 + $0x1d30] sm:$0xff]  ;;  %v2912_v33 = vld [vmem:[#allocation6 + $0x1db8] sm:$0xff]  ;;  %v2949_v25 = vld [vmem:[#allocation6 + $0x1ee0] sm:$0xff] }
 0x3ac   :  { %v4578_v4 = vmax.f32 %v6478_v53, 0.0  ;;  %v6081_v60 = vpack.c.bf16 %v2902_v42, %v2894_v28  ;;  %v2903_v35 = vld [vmem:[#allocation6 + $0x1d70] sm:$0xff]  ;;  %v2920_v37 = vld [vmem:[#allocation6 + $0x1df8] sm:$0xff]  ;;  %v2909_v53 = vld [vmem:[#allocation6 + $0x1da0] sm:$0xff] }
 0x3ad   :  { %v7115_v6 = vmax.f32 %v4575_v52, %v4577_v13  ;;  %6068 = vmatpush1.bf16.msra.mxu0 %v6067_v51  ;;  %v6371_v51 = vpack.c.bf16 %v2903_v35, %v2895_v46  ;;  %v6085_v52 = vpack.c.bf16 %v2918_v63, %v2910_v38  ;;  %v6373_v58 = vpack.c.bf16 %v2920_v37, %v2912_v33  ;;  %v2934_v13 = vld [vmem:[#allocation6 + $0x1e68] sm:$0xff]  ;;  %v2943_v26 = vld [vmem:[#allocation6 + $0x1eb0] sm:$0xff]  ;;  %v2960_v41 = vld [vmem:[#allocation6 + $0x1f38] sm:$0xff] }
 0x3ae   :  { %v7117_v8 = vmax.f32 %v4576_v1, %v4578_v4  ;;  %6356 = vmatpush1.bf16.msra.mxu1 %v6355_v56  ;;  %6070 = vmatprep.subr.bf16.mxu0 %v6069_v2  ;;  %v2917_v56 = vld [vmem:[#allocation6 + $0x1de0] sm:$0xff]  ;;  %v2911_v2 = vld [vmem:[#allocation6 + $0x1db0] sm:$0xff]  ;;  %v2928_v1 = vld [vmem:[#allocation6 + $0x1e38] sm:$0xff]  ;;  %v6089_v3 = vpack.c.bf16 %v2934_v13, %v2926_v31 }
 0x3af   :  { %6358 = vmatprep.subr.bf16.mxu1 %v6357_v57  ;;  %v2936_v57 = vld [vmem:[#allocation6 + $0x1e78] sm:$0xff]  ;;  %v6087_v47 = vpack.c.bf16 %v2917_v56, %v2909_v53  ;;  %v6375_v55 = vpack.c.bf16 %v2919_v62, %v2911_v2  ;;  %v2925_v4 = vld [vmem:[#allocation6 + $0x1e20] sm:$0xff]  ;;  %v2966_v50 = vld [vmem:[#allocation6 + $0x1f68] sm:$0xff] }
 0x3b0   :  { %v2968_v27 = vld [vmem:[#allocation6 + $0x1f78] sm:$0xff]  ;;  %v2957_v42 = vld [vmem:[#allocation6 + $0x1f20] sm:$0xff]  ;;  %v2959_v34 = vld [vmem:[#allocation6 + $0x1f30] sm:$0xff] }
 0x3b1   :  { %6072 = vmatpush1.bf16.msra.mxu0 %v6071_v7  ;;  %v6377_v7 = vpack.c.bf16 %v2936_v57, %v2928_v1  ;;  %v2965_v32 = vld [vmem:[#allocation6 + $0x1f60] sm:$0xff]  ;;  %v2982_v45 = vld [vmem:[#allocation6 + $0x1fe8] sm:$0xff]  ;;  %v2976_v10 = vld [vmem:[#allocation6 + $0x1fb8] sm:$0xff] }
 0x3b2   :  { %6360 = vmatpush1.bf16.msra.mxu1 %v6359_v9  ;;  %6074 = vmatprep.subr.bf16.mxu0 %v6073_v14  ;;  %v2935_v9 = vld [vmem:[#allocation6 + $0x1e70] sm:$0xff]  ;;  %v2942_v14 = vld [vmem:[#allocation6 + $0x1ea8] sm:$0xff]  ;;  %v2984_v46 = vld [vmem:[#allocation6 + $0x1ff8] sm:$0xff] }
 0x3b3   :  { %6362 = vmatprep.subr.bf16.mxu1 %v6361_v54  ;;  %v6091_v54 = vpack.c.bf16 %v2933_v23, %v2925_v4  ;;  %v6379_v22 = vpack.c.bf16 %v2935_v9, %v2927_v5  ;;  %v6093_v36 = vpack.c.bf16 %v2950_v16, %v2942_v14  ;;  %v2973_v63 = vld [vmem:[#allocation6 + $0x1fa0] sm:$0xff]  ;;  %v2975_v37 = vld [vmem:[#allocation6 + $0x1fb0] sm:$0xff]  ;;  %v2998_v53 = vld [vmem:[#allocation6 + $0x2068] sm:$0xff] }
 0x3b4   :  { %v2981_v33 = vld [vmem:[#allocation6 + $0x1fe0] sm:$0xff]  ;;  %v2992_v56 = vld [vmem:[#allocation6 + $0x2038] sm:$0xff]  ;;  %v2991_v57 = vld [vmem:[#allocation6 + $0x2030] sm:$0xff] }
 0x3b5   :  { %6076 = vmatpush1.bf16.msra.mxu0 %v6075_v17  ;;  %v6381_v17 = vpack.c.bf16 %v2952_v49, %v2944_v24  ;;  %v3000_v2 = vld [vmem:[#allocation6 + $0x2078] sm:$0xff]  ;;  %v2989_v13 = vld [vmem:[#allocation6 + $0x2020] sm:$0xff]  ;;  %v3014_v4 = vld [vmem:[#allocation6 + $0x20e8] sm:$0xff] }
 0x3b6   :  { %6364 = vmatpush1.bf16.msra.mxu1 %v6363_v59  ;;  %6078 = vmatprep.subr.bf16.mxu0 %v6077_v40  ;;  %v2951_v59 = vld [vmem:[#allocation6 + $0x1ef0] sm:$0xff]  ;;  %v2958_v40 = vld [vmem:[#allocation6 + $0x1f28] sm:$0xff]  ;;  %v2997_v1 = vld [vmem:[#allocation6 + $0x2060] sm:$0xff] }
 0x3b7   :  { %6366 = vmatprep.subr.bf16.mxu1 %v6365_v30  ;;  %v6095_v30 = vpack.c.bf16 %v2949_v25, %v2941_v11  ;;  %v6383_v61 = vpack.c.bf16 %v2951_v59, %v2943_v26  ;;  %v6097_v28 = vpack.c.bf16 %v2966_v50, %v2958_v40  ;;  %v3008_v23 = vld [vmem:[#allocation6 + $0x20b8] sm:$0xff]  ;;  %v3005_v16 = vld [vmem:[#allocation6 + $0x20a0] sm:$0xff]  ;;  %v3007_v49 = vld [vmem:[#allocation6 + $0x20b0] sm:$0xff] }
 0x3b8   :  { %v3016_v5 = vld [vmem:[#allocation6 + $0x20f8] sm:$0xff]  ;;  %v3013_v24 = vld [vmem:[#allocation6 + $0x20e0] sm:$0xff]  ;;  %v3030_v11 = vld [vmem:[#allocation6 + $0x2168] sm:$0xff] }
 0x3b9   :  { %6080 = vmatpush1.bf16.msra.mxu0 %v6079_v43  ;;  %v6385_v43 = vpack.c.bf16 %v2968_v27, %v2960_v41  ;;  %v3024_v25 = vld [vmem:[#allocation6 + $0x2138] sm:$0xff]  ;;  %v3021_v50 = vld [vmem:[#allocation6 + $0x2120] sm:$0xff]  ;;  %v3023_v27 = vld [vmem:[#allocation6 + $0x2130] sm:$0xff] }
 0x3ba   :  { %6368 = vmatpush1.bf16.msra.mxu1 %v6367_v44  ;;  %6082 = vmatprep.subr.bf16.mxu0 %v6081_v60  ;;  %v2967_v44 = vld [vmem:[#allocation6 + $0x1f70] sm:$0xff]  ;;  %v2974_v60 = vld [vmem:[#allocation6 + $0x1fa8] sm:$0xff]  ;;  %v3032_v26 = vld [vmem:[#allocation6 + $0x2178] sm:$0xff] }
 0x3bb   :  { %6370 = vmatprep.subr.bf16.mxu1 %v6369_v48  ;;  %v6099_v48 = vpack.c.bf16 %v2965_v32, %v2957_v42  ;;  %v6387_v35 = vpack.c.bf16 %v2967_v44, %v2959_v34  ;;  %v6101_v38 = vpack.c.bf16 %v2982_v45, %v2974_v60  ;;  %v3029_v41 = vld [vmem:[#allocation6 + $0x2160] sm:$0xff]  ;;  %v3046_v42 = vld [vmem:[#allocation6 + $0x21e8] sm:$0xff]  ;;  %v3040_v32 = vld [vmem:[#allocation6 + $0x21b8] sm:$0xff] }
 0x3bc   :  { %v3048_v34 = vld [vmem:[#allocation6 + $0x21f8] sm:$0xff]  ;;  %v3037_v60 = vld [vmem:[#allocation6 + $0x21a0] sm:$0xff] }
 0x3bd   :  { %6084 = vmatpush1.bf16.msra.mxu0 %v6083_v39  ;;  %v6389_v39 = vpack.c.bf16 %v2984_v46, %v2976_v10  ;;  %v3045_v45 = vld [vmem:[#allocation6 + $0x21e0] sm:$0xff]  ;;  %v3039_v10 = vld [vmem:[#allocation6 + $0x21b0] sm:$0xff]  ;;  %v6405_v46 = vpack.c.bf16 %v3048_v34, %v3040_v32 }
 0x3be   :  { %6372 = vmatpush1.bf16.msra.mxu1 %v6371_v51  ;;  %6086 = vmatprep.subr.bf16.mxu0 %v6085_v52  ;;  %v2983_v51 = vld [vmem:[#allocation6 + $0x1ff0] sm:$0xff]  ;;  %v2990_v52 = vld [vmem:[#allocation6 + $0x2028] sm:$0xff] }
 0x3bf   :  { %6374 = vmatprep.subr.bf16.mxu1 %v6373_v58  ;;  %v6103_v58 = vpack.c.bf16 %v2981_v33, %v2973_v63  ;;  %v6391_v62 = vpack.c.bf16 %v2983_v51, %v2975_v37  ;;  %v6105_v31 = vpack.c.bf16 %v2998_v53, %v2990_v52  ;;  %v3056_v63 = vld [vmem:[#allocation6 + $0x2238] sm:$0xff]  ;;  %v6119_v37 = vpack.c.bf16 %v3045_v45, %v3037_v60  ;;  %v3053_v52 = vld [vmem:[#allocation6 + $0x2220] sm:$0xff]  ;;  %v3103_v32 = vld [vmem:[#allocation6 + $0x23b0] sm:$0xff] }
 0x3c0   :  { %v3064_v33 = vld [vmem:[#allocation6 + $0x2278] sm:$0xff]  ;;  %v3061_v53 = vld [vmem:[#allocation6 + $0x2260] sm:$0xff] }
 0x3c1   :  { %6088 = vmatpush1.bf16.msra.mxu0 %v6087_v47  ;;  %v6393_v47 = vpack.c.bf16 %v3000_v2, %v2992_v56  ;;  %v3055_v56 = vld [vmem:[#allocation6 + $0x2230] sm:$0xff]  ;;  %v6409_v2 = vpack.c.bf16 %v3064_v33, %v3056_v63 }
 0x3c2   :  { %6376 = vmatpush1.bf16.msra.mxu1 %v6375_v55  ;;  %6090 = vmatprep.subr.bf16.mxu0 %v6089_v3  ;;  %v2999_v55 = vld [vmem:[#allocation6 + $0x2070] sm:$0xff]  ;;  %v3006_v3 = vld [vmem:[#allocation6 + $0x20a8] sm:$0xff] }
 0x3c3   :  { %6378 = vmatprep.subr.bf16.mxu1 %v6377_v7  ;;  %v6107_v7 = vpack.c.bf16 %v2997_v1, %v2989_v13  ;;  %v6395_v9 = vpack.c.bf16 %v2999_v55, %v2991_v57  ;;  %v6109_v14 = vpack.c.bf16 %v3014_v4, %v3006_v3  ;;  %v3072_v13 = vld [vmem:[#allocation6 + $0x22b8] sm:$0xff]  ;;  %v6123_v57 = vpack.c.bf16 %v3061_v53, %v3053_v52  ;;  %v3069_v3 = vld [vmem:[#allocation6 + $0x22a0] sm:$0xff] }
 0x3c4   :  { %v3080_v1 = vld [vmem:[#allocation6 + $0x22f8] sm:$0xff]  ;;  %v3077_v4 = vld [vmem:[#allocation6 + $0x22e0] sm:$0xff] }
 0x3c5   :  { %6092 = vmatpush1.bf16.msra.mxu0 %v6091_v54  ;;  %v6397_v54 = vpack.c.bf16 %v3016_v5, %v3008_v23  ;;  %v3071_v23 = vld [vmem:[#allocation6 + $0x22b0] sm:$0xff]  ;;  %v6413_v5 = vpack.c.bf16 %v3080_v1, %v3072_v13  ;;  %v4610_v52 = vld [vmem:[%s7266_s5 + $0xa8] sm:$0xff] }
 0x3c6   :  { %6380 = vmatpush1.bf16.msra.mxu1 %v6379_v22  ;;  %6094 = vmatprep.subr.bf16.mxu0 %v6093_v36  ;;  %v3015_v22 = vld [vmem:[#allocation6 + $0x20f0] sm:$0xff]  ;;  %v3022_v36 = vld [vmem:[#allocation6 + $0x2128] sm:$0xff] }
 0x3c7   :  { %6382 = vmatprep.subr.bf16.mxu1 %v6381_v17  ;;  %v6111_v17 = vpack.c.bf16 %v3013_v24, %v3005_v16  ;;  %v6399_v59 = vpack.c.bf16 %v3015_v22, %v3007_v49  ;;  %v6113_v40 = vpack.c.bf16 %v3030_v11, %v3022_v36  ;;  %v3088_v16 = vld [vmem:[#allocation6 + $0x2338] sm:$0xff]  ;;  %v6127_v49 = vpack.c.bf16 %v3077_v4, %v3069_v3  ;;  %v3085_v36 = vld [vmem:[#allocation6 + $0x2320] sm:$0xff]  ;;  %v4595_v1 = vld [vmem:[%s7266_s5 + $0x30] sm:$0xff] }
 0x3c8   :  { %v3096_v24 = vld [vmem:[#allocation6 + $0x2378] sm:$0xff]  ;;  %v3093_v11 = vld [vmem:[#allocation6 + $0x2360] sm:$0xff] }
 0x3c9   :  { %6096 = vmatpush1.bf16.msra.mxu0 %v6095_v30  ;;  %v6401_v30 = vpack.c.bf16 %v3032_v26, %v3024_v25  ;;  %v3087_v25 = vld [vmem:[#allocation6 + $0x2330] sm:$0xff]  ;;  %v6417_v26 = vpack.c.bf16 %v3096_v24, %v3088_v16 }
 0x3ca   :  { %6384 = vmatpush1.bf16.msra.mxu1 %v6383_v61  ;;  %6098 = vmatprep.subr.bf16.mxu0 %v6097_v28  ;;  %v3031_v61 = vld [vmem:[#allocation6 + $0x2170] sm:$0xff]  ;;  %v3038_v28 = vld [vmem:[#allocation6 + $0x21a8] sm:$0xff] }
 0x3cb   :  { %6386 = vmatprep.subr.bf16.mxu1 %v6385_v43  ;;  %v6403_v43 = vpack.c.bf16 %v3031_v61, %v3023_v27  ;;  %v6117_v44 = vpack.c.bf16 %v3046_v42, %v3038_v28  ;;  %v6131_v27 = vpack.c.bf16 %v3093_v11, %v3085_v36  ;;  %v3101_v28 = vld [vmem:[#allocation6 + $0x23a0] sm:$0xff]  ;;  %v4599_v24 = vld [vmem:[%s7266_s5 + $0x50] sm:$0xff] }
 0x3cc   :  { %v3109_v42 = vld [vmem:[#allocation6 + $0x23e0] sm:$0xff] }
 0x3cd   :  { %6100 = vmatpush1.bf16.msra.mxu0 %v6099_v48  ;;  %v3047_v48 = vld [vmem:[#allocation6 + $0x21f0] sm:$0xff]  ;;  %v6135_v60 = vpack.c.bf16 %v3109_v42, %v3101_v28  ;;  %v4618_v36 = vld [vmem:[%s7266_s5 + $0xe8] sm:$0xff] }
 0x3ce   :  { %6388 = vmatpush1.bf16.msra.mxu1 %v6387_v35  ;;  %6102 = vmatprep.subr.bf16.mxu0 %v6101_v38  ;;  %v3054_v35 = vld [vmem:[#allocation6 + $0x2228] sm:$0xff] }
 0x3cf   :  { %6390 = vmatprep.subr.bf16.mxu1 %v6389_v39  ;;  %v3062_v38 = vld [vmem:[#allocation6 + $0x2268] sm:$0xff]  ;;  %v6407_v39 = vpack.c.bf16 %v3047_v48, %v3039_v10 }
 0x3d0   :  { %v6121_v51 = vpack.c.bf16 %v3062_v38, %v3054_v35  ;;  %v4590_v48 = vld [vmem:[%s7266_s5 + $0x8] sm:$0xff]  ;;  %v4607_v35 = vld [vmem:[%s7266_s5 + $0x90] sm:$0xff]  ;;  %v4608_v38 = vld [vmem:[%s7266_s5 + $0x98] sm:$0xff] }
 0x3d1   :  { %6104 = vmatpush1.bf16.msra.mxu0 %v6103_v58  ;;  %v3063_v58 = vld [vmem:[#allocation6 + $0x2270] sm:$0xff]  ;;  %v6429_v33 = vpack.c.bf16 %v4608_v38, %v4607_v35  ;;  %v4700_v28 = vld [vmem:[%s7268_s7 + $0x8] sm:$0xff] }
 0x3d2   :  { %6392 = vmatpush1.bf16.msra.mxu1 %v6391_v62  ;;  %6106 = vmatprep.subr.bf16.mxu0 %v6105_v31  ;;  %v3070_v62 = vld [vmem:[#allocation6 + $0x22a8] sm:$0xff] }
 0x3d3   :  { %6394 = vmatprep.subr.bf16.mxu1 %v6393_v47  ;;  %v3078_v31 = vld [vmem:[#allocation6 + $0x22e8] sm:$0xff]  ;;  %v6411_v47 = vpack.c.bf16 %v3063_v58, %v3055_v56 }
 0x3d4   :  { %4143 = vmatmul.mubr.f32.vlgmr.msra.gmra.mrb[20].mxu0 %v7072_v12  ;;  %v6125_v55 = vpack.c.bf16 %v3078_v31, %v3070_v62  ;;  %v4594_v58 = vld [vmem:[%s7266_s5 + $0x28] sm:$0xff]  ;;  %v4611_v62 = vld [vmem:[%s7266_s5 + $0xb0] sm:$0xff] }
 0x3d5   :  { %4498 = vmatmul.mubr.f32.vlgmr.msra.gmra.mrb[20].mxu1 %v7072_v12  ;;  %6108 = vmatpush1.bf16.msra.mxu0 %v6107_v7  ;;  %v6115_v12 = vpack.c.bf16 %v3029_v41, %v3021_v50  ;;  %v3079_v7 = vld [vmem:[#allocation6 + $0x22f0] sm:$0xff]  ;;  %v3104_v50 = vld [vmem:[#allocation6 + $0x23b8] sm:$0xff] }
 0x3d6   :  { %6396 = vmatpush1.bf16.msra.mxu1 %v6395_v9  ;;  %6110 = vmatprep.subr.bf16.mxu0 %v6109_v14  ;;  %v3086_v9 = vld [vmem:[#allocation6 + $0x2328] sm:$0xff]  ;;  %v3112_v41 = vld [vmem:[#allocation6 + $0x23f8] sm:$0xff] }
 0x3d7   :  { %6398 = vmatprep.subr.bf16.mxu1 %v6397_v54  ;;  %4213 = vmatprep.mubr.f32.mxu0 %v6733_v0  ;;  %v3094_v14 = vld [vmem:[#allocation6 + $0x2368] sm:$0xff]  ;;  %v6415_v54 = vpack.c.bf16 %v3079_v7, %v3071_v23  ;;  %v6421_v34 = vpack.c.bf16 %v3112_v41, %v3104_v50  ;;  %v4597_v23 = vld [vmem:[%s7266_s5 + $0x40] sm:$0xff] }
 0x3d8   :  { %4568 = vmatprep.mubr.f32.mxu1 %v6733_v0  ;;  %v6129_v22 = vpack.c.bf16 %v3094_v14, %v3086_v9  ;;  %v4615_v7 = vld [vmem:[%s7266_s5 + $0xd0] sm:$0xff]  ;;  %v4616_v9 = vld [vmem:[%s7266_s5 + $0xd8] sm:$0xff] }
 0x3d9   :  { %6112 = vmatpush1.bf16.msra.mxu0 %v6111_v17  ;;  %v3095_v17 = vld [vmem:[#allocation6 + $0x2370] sm:$0xff]  ;;  %v6445_v16 = vpack.c.bf16 %v4616_v9, %v4615_v7  ;;  %v4902_v9 = vld [vmem:[#allocation10] ss:$0 sm:$0xff] }
 0x3da   :  { %6400 = vmatpush1.bf16.msra.mxu1 %v6399_v59  ;;  %6114 = vmatprep.subr.bf16.mxu0 %v6113_v40  ;;  %v3102_v59 = vld [vmem:[#allocation6 + $0x23a8] sm:$0xff] }
 0x3db   :  { %6402 = vmatprep.subr.bf16.mxu1 %v6401_v30  ;;  %v3110_v40 = vld [vmem:[#allocation6 + $0x23e8] sm:$0xff]  ;;  %v6419_v30 = vpack.c.bf16 %v3095_v17, %v3087_v25  ;;  %v4601_v25 = vld [vmem:[%s7266_s5 + $0x60] sm:$0xff] }
 0x3dc   :  { %v6133_v61 = vpack.c.bf16 %v3110_v40, %v3102_v59  ;;  %v4619_v59 = vld [vmem:[%s7266_s5 + $0xf0] sm:$0xff]  ;;  %v4620_v40 = vld [vmem:[%s7266_s5 + $0xf8] sm:$0xff] }
 0x3dd   :  { %6116 = vmatpush1.bf16.msra.mxu0 %v6115_v12  ;;  %v3111_v12 = vld [vmem:[#allocation6 + $0x23f0] sm:$0xff]  ;;  %v6453_v50 = vpack.c.bf16 %v4620_v40, %v4619_v59 }
 0x3de   :  { %6404 = vmatpush1.bf16.msra.mxu1 %v6403_v43  ;;  %6118 = vmatprep.subr.bf16.mxu0 %v6117_v44  ;;  %v4605_v43 = vld [vmem:[%s7266_s5 + $0x80] sm:$0xff]  ;;  %v4606_v44 = vld [vmem:[%s7266_s5 + $0x88] sm:$0xff]  ;;  %v6423_v45 = vpack.c.bf16 %v3111_v12, %v3103_v32  ;;  %v4603_v41 = vld [vmem:[%s7266_s5 + $0x70] sm:$0xff]  ;;  %v6734_v32 = vmov 0.0|0.0  }
 0x3df   :  { %6406 = vmatprep.subr.bf16.mxu1 %v6405_v46  ;;  %v6425_v10 = vpack.c.bf16 %v4606_v44, %v4605_v43  ;;  %v4589_v46 = vld [vmem:[%s7266_s5] sm:$0xff]  ;;  %v4701_v42 = vld [vmem:[%s7268_s7 + $0x10] sm:$0xff]  ;;  %v4702_v12 = vld [vmem:[%s7268_s7 + $0x18] sm:$0xff]  ;;  %v3134_v44 = vrot.slane %v7105_v15, %v6962_v18 }
 0x3e0   :  { %v6427_v63 = vpack.c.bf16 %v4590_v48, %v4589_v46  ;;  %v6461_v43 = vpack.c.bf16 %v4702_v12, %v4701_v42 }
 0x3e1   :  { %6120 = vmatpush1.bf16.msra.mxu0 %v6119_v37  ;;  %v4591_v37 = vld [vmem:[%s7266_s5 + $0x10] sm:$0xff] }
 0x3e2   :  { %6408 = vmatpush1.bf16.msra.mxu1 %v6407_v39  ;;  %6122 = vmatprep.subr.bf16.mxu0 %v6121_v51  ;;  %v4592_v39 = vld [vmem:[%s7266_s5 + $0x18] sm:$0xff]  ;;  %v4609_v51 = vld [vmem:[%s7266_s5 + $0xa0] sm:$0xff] }
 0x3e3   :  { %6410 = vmatprep.subr.bf16.mxu1 %v6409_v2  ;;  %v6431_v53 = vpack.c.bf16 %v4592_v39, %v4591_v37  ;;  %v6433_v56 = vpack.c.bf16 %v4610_v52, %v4609_v51  ;;  %v4593_v2 = vld [vmem:[%s7266_s5 + $0x20] sm:$0xff] }
 0x3e4   :  { %v6435_v31 = vpack.c.bf16 %v4594_v58, %v4593_v2 }
 0x3e5   :  { %6124 = vmatpush1.bf16.msra.mxu0 %v6123_v57  ;;  %v4596_v57 = vld [vmem:[%s7266_s5 + $0x38] sm:$0xff] }
 0x3e6   :  { %6412 = vmatpush1.bf16.msra.mxu1 %v6411_v47  ;;  %6126 = vmatprep.subr.bf16.mxu0 %v6125_v55  ;;  %v4613_v47 = vld [vmem:[%s7266_s5 + $0xc0] sm:$0xff]  ;;  %v4614_v55 = vld [vmem:[%s7266_s5 + $0xc8] sm:$0xff]  ;;  %v6439_v3 = vpack.c.bf16 %v4596_v57, %v4595_v1  ;;  %v4788_v57 = vld [vmem:[#allocation12] sm:$0xff] }
 0x3e7   :  { %6414 = vmatprep.subr.bf16.mxu1 %v6413_v5  ;;  %v6441_v4 = vpack.c.bf16 %v4614_v55, %v4613_v47  ;;  %v4598_v5 = vld [vmem:[%s7266_s5 + $0x48] sm:$0xff]  ;;  %v4789_v47 = vld [vmem:[#allocation12 + $0x8] sm:$0xff] }
 0x3e8   :  { %v6443_v14 = vpack.c.bf16 %v4598_v5, %v4597_v23  ;;  %v4790_v23 = vld [vmem:[#allocation12 + $0x10] sm:$0xff]  ;;  %v4791_v5 = vld [vmem:[#allocation12 + $0x18] sm:$0xff] }
 0x3e9   :  { %6128 = vmatpush1.bf16.msra.mxu0 %v6127_v49  ;;  %v4600_v49 = vld [vmem:[%s7266_s5 + $0x58] sm:$0xff]  ;;  %v6473_v7 = vpack.c.bf16 %v4791_v5, %v4790_v23 }
 0x3ea   :  { %6416 = vmatpush1.bf16.msra.mxu1 %v6415_v54  ;;  %6130 = vmatprep.subr.bf16.mxu0 %v6129_v22  ;;  %v6447_v54 = vpack.c.bf16 %v4600_v49, %v4599_v24  ;;  %v4617_v22 = vld [vmem:[%s7266_s5 + $0xe0] sm:$0xff] }
 0x3eb   :  { %6418 = vmatprep.subr.bf16.mxu1 %v6417_v26  ;;  %v6449_v11 = vpack.c.bf16 %v4618_v36, %v4617_v22  ;;  %v4602_v26 = vld [vmem:[%s7266_s5 + $0x68] sm:$0xff] }
 0x3ec   :  { %v6451_v17 = vpack.c.bf16 %v4602_v26, %v4601_v25 }
 0x3ed   :  { %6132 = vmatpush1.bf16.msra.mxu0 %v6131_v27  ;;  %v4604_v27 = vld [vmem:[%s7266_s5 + $0x78] sm:$0xff] }
 0x3ee   :  { %6420 = vmatpush1.bf16.msra.mxu1 %v6419_v30  ;;  %6134 = vmatprep.subr.bf16.mxu0 %v6133_v61  ;;  %v6455_v30 = vpack.c.bf16 %v4604_v27, %v4603_v41  ;;  %v4699_v61 = vld [vmem:[%s7268_s7] sm:$0xff] }
 0x3ef   :  { %6422 = vmatprep.subr.bf16.mxu1 %v6421_v34  ;;  %v6458_v34 = vpack.c.bf16 %v4700_v28, %v4699_v61 }
 0x3f1   :  { %6136 = vmatpush1.bf16.msra.mxu0 %v6135_v60  ;;  %v3142_v60 = vrot.slane %v7105_v15, %v6966_v20 }
 0x3f2   :  { %6424 = vmatpush1.bf16.msra.mxu1 %v6423_v45  ;;  %6426 = vmatprep.subr.bf16.mxu0 %v6425_v10  ;;  %v3138_v45 = vrot.slane %v7105_v15, %v6964_v19  ;;  %v3146_v10 = vrot.slane %v7105_v15, %v6968_v21  ;;  %v4703_v21 = vld [vmem:[%s7268_s7 + $0x20] sm:$0xff]  ;;  %v4704_v15 = vld [vmem:[%s7268_s7 + $0x28] sm:$0xff] }
 0x3f3   :  { %6457 = vmatprep.subr.bf16.mxu1 %v6734_v32  ;;  %v6464_v58 = vpack.c.bf16 %v4704_v15, %v4703_v21 }
 0x3f4   :  { %4214 = vmatmul.mubr.f32.vlgmr.msra.gmra.mrb[20].mxu0 %v7075_v29 }
 0x3f5   :  { %4569 = vmatmul.mubr.f32.vlgmr.msra.gmra.mrb[20].mxu1 %v7075_v29  ;;  %6428 = vmatpush3.bf16.msra.mxu0 %v6427_v63  ;;  %v4612_v29 = vld [vmem:[%s7266_s5 + $0xb8] sm:$0xff] }
 0x3f6   :  { %6430 = vmatprep.subr.bf16.mxu0 %v6429_v33  ;;  %v6437_v13 = vpack.c.bf16 %v4612_v29, %v4611_v62  ;;  %6459 = vmatpush3.bf16.msra.mxu1 %v6458_v34  ;;  %v4705_v62 = vld [vmem:[%s7268_s7 + $0x30] sm:$0xff] }
 0x3f7   :  { %6460 = vmatprep.subr.bf16.mxu1 %v6734_v32  ;;  %4971 = vmatprep.mubr.msk.f32.mxu1 %vm6735_vm1, %v6733_v0 }
 0x3f9   :  { %6432 = vmatpush3.bf16.msra.mxu0 %v6431_v53 }
 0x3fa   :  { %6434 = vmatprep.subr.bf16.mxu0 %v6433_v56  ;;  %6462 = vmatpush3.bf16.msra.mxu1 %v6461_v43 }
 0x3fb   :  { %6463 = vmatprep.subr.bf16.mxu1 %v6734_v32 }
 0x3fd   :  { %6436 = vmatpush3.bf16.msra.mxu0 %v6435_v31  ;;  %v4901_v31 = vld [vmem:[#allocation9] ss:$0 sm:$0xff] }
 0x3fe   :  { %6438 = vmatprep.subr.bf16.mxu0 %v6437_v13  ;;  %6465 = vmatpush3.bf16.msra.mxu1 %v6464_v58 }
 0x3ff   :  { %6466 = vmatprep.subr.bf16.mxu1 %v6734_v32 }
 0x401   :  { %6440 = vmatpush3.bf16.msra.mxu0 %v6439_v3  ;;  %v6470_v3 = vpack.c.bf16 %v4789_v47, %v4788_v57 }
 0x402   :  { %6442 = vmatprep.subr.bf16.mxu0 %v6441_v4 }
 0x405   :  { %6444 = vmatpush3.bf16.msra.mxu0 %v6443_v14 }
 0x406   :  { %6446 = vmatprep.subr.bf16.mxu0 %v6445_v16 }
 0x409   :  { %6448 = vmatpush3.bf16.msra.mxu0 %v6447_v54  ;;  %v4904_v54 = vld [vmem:[#allocation13] ss:$0 sm:$0xff] }
 0x40a   :  { %6450 = vmatprep.subr.bf16.mxu0 %v6449_v11 }
 0x40d   :  { %6452 = vmatpush3.bf16.msra.mxu0 %v6451_v17 }
 0x40e   :  { %6454 = vmatprep.subr.bf16.mxu0 %v6453_v50 }
 0x411   :  { %6456 = vmatpush3.bf16.msra.mxu0 %v6455_v30 }
 0x4c7   :  { %v4215_v46 = vpop.f32.mrb[20].mxu0 }
 0x4c8   :  { %v6479_v48 = vadd.f32 %v4215_v46, %v3134_v44  ;;  %v4570_v35 = vpop.f32.mrb[20].mxu1  ;;  %v4217_v38 = vpop.f32.mrb[21].mxu0 }
 0x4c9   :  { %v6481_v63 = vadd.f32 %v4570_v35, %v3142_v60  ;;  %v6480_v33 = vadd.f32 %v4217_v38, %v3138_v45  ;;  %v4572_v37 = vpop.f32.mrb[21].mxu1 }
 0x4ca   :  { %v4579_v39 = vmax.f32 %v6479_v48, 0.0  ;;  %v6482_v51 = vadd.f32 %v4572_v37, %v3146_v10 }
 0x4cb   :  { %v4581_v52 = vmax.f32 %v6481_v63, 0.0  ;;  %v4580_v18 = vmax.f32 %v6480_v33, 0.0 }
 0x4cc   :  { %v4582_v53 = vmax.f32 %v6482_v51, 0.0 }
 0x4cd   :  { %v4585_v56 = vmax.f32 %v4579_v39, %v4581_v52 }
 0x4ce   :  { %v4586_v20 = vmax.f32 %v4580_v18, %v4582_v53 }
 0x4cf   :  { %v4587_v2 = vmax.f32 %v7115_v6, %v4585_v56  ;;  %v4706_v6 = vld [vmem:[%s7268_s7 + $0x38] sm:$0xff] }
 0x4d0   :  { %v4588_v19 = vmax.f32 %v7117_v8, %v4586_v20  ;;  %v6467_v8 = vpack.c.bf16 %v4706_v6, %v4705_v62 }
 0x4d2   :  { %4692 = vmatprep.mubr.f32.mxu0 %v4588_v19  ;;  %6468 = vmatpush3.bf16.msra.mxu1 %v6467_v8 }
 0x4d3   :  { %4693 = vmatmul.mubr.f32.vlgmr.msra.gmra.mrb[22].mxu0 %v4587_v2  ;;  %6469 = vmatprep.subr.bf16.mxu1 %v6734_v32 }
 0x5a6   :  { %v4938_v29 = vpop.f32.mrb[22].mxu0 }
 0x5a7   :  { %v4939_v13 = vpop.f32.mrb[23].mxu0 }
 0x5a8   :  { %v4940_v1 = vadd.f32 %v4939_v13, %v4938_v29 }
 0x5aa   :  { %v4695_v55 = vadd.f32 %v4940_v1, %v4901_v31 }
 0x5ac   :  { %v4698_v4 = vmax.f32 %v4695_v55, 0.0 }
 0x5ae   :  { %4972 = vmatmul.mubr.msk.f32.vlgmr.msra.gmra.mrb[22].mxu1 %vm616_vm0, %v4698_v4 }
 0x5af   :  { %6471 = vmatpush3.bf16.msra.mxu1 %v6470_v3  ;;  %4982 = vmatprep.mubr.msk.f32.mxu1 %vm6735_vm1, %v6733_v0 }
 0x5b0   :  { %6472 = vmatprep.subr.bf16.mxu1 %v6734_v32 }
 0x5b3   :  { %6474 = vmatpush3.bf16.msra.mxu1 %v6473_v7 }
 0x681   :  { %v4783_v14 = vpop.f32.mrb[22].mxu1 }
 0x682   :  { %v4784_v16 = vadd.f32 %v4902_v9, %v4783_v14  ;;  %v4973_v24 = vpop.f32.mrb[23].mxu1 }
 0x684   :  { %v4787_v49 = vmax.f32 %v4784_v16, 0.0 }
 0x686   :  { %4983 = vmatmul.mubr.msk.f32.vlgmr.msra.gmra.mrb[24].mxu1 %vm4799_vm2, %v4787_v49 }
 0x759   :  { %v4869_v22 = vpop.f32.mrb[24].mxu1 }
 0x75a   :  { %v4870_v36 = vadd.f32 %v4904_v54, %v4869_v22  ;;  %v4984_v11 = vpop.f32.mrb[25].mxu1 }
 0x75c   :  { %4873 = vst [vmem:[%s7272_s11] sm:$0xff] %v4870_v36 }
 0x75d   :  { %4878 = vsyncpa [#allocation3], 1 }
 0x75e   :  { %4879 = vsyncpa [#allocation5], 1 }
 0x75f   :  { %4880 = vsyncpa [#allocation8], 1 }
 0x760   :  { %4881 = vsyncpa [#allocation11], 1 }
 0x761   :  { %4882 = vsyncpa [#allocation14], 1 }

</bundles_post_ra>
